<compile_context>
chip_gen: v7x
topology: tpu7x:2x2x1
jax: 0.10.0
libtpu: 0.0.40
codegen_flags: <defaults>
</compile_context>

<pallas_src>
import math
from functools import partial

import jax
import jax.numpy as jnp
from jax.experimental import pallas as pl
from jax.experimental.pallas import tpu as pltpu


# ------------------------------- fused kernel -------------------------------

def _decoder_stack_kernel(x0_ref, enc_ref, tb_ref, sb_ref,
                          wqkv_ref, wo_ref, w1_ref, w2_ref,
                          nrm_ref, battn_ref, bvec_ref, b1_ref, fnorm_ref,
                          o_ref, x_sc,
                          *, heads, d_k, B, S_trg, S_src, eps):
    """One decoder layer per grid step; final Norm fused into the last step.

    Activations are (B*S, D) f32 (batch folded into the matmul M dim); the
    residual stream persists in the x_sc VMEM scratch across the layer grid.
    """
    l = pl.program_id(0)
    last = pl.num_programs(0) - 1

    @pl.when(l == 0)
    def _():
        x_sc[...] = x0_ref[...]

    x = x_sc[...]                                    # (B*S_trg, D) f32
    enc16 = enc_ref[...]                             # (B*S_src, D) bf16 (pre-cast)
    trg_bias = tb_ref[...]                           # (B, S_trg, S_trg) f32 additive
    # Hoist the (B,1,S_src) -> (B,S_trg,S_src) broadcast out of the head loop.
    src_bias = jnp.broadcast_to(sb_ref[...], (B, S_trg, S_src))

    def norm(v, row):
        # Tutorial Norm: alpha * (v - mean) / (std_unbiased + eps) + bias.
        alpha = nrm_ref[0, row]                      # (1, D) f32
        beta = nrm_ref[0, row + 1]                   # (1, D) f32
        d = v.shape[-1]
        mean = jnp.mean(v, axis=-1, keepdims=True)
        vc = v - mean
        var = jnp.sum(vc * vc, axis=-1, keepdims=True) * jnp.float32(1.0 / (d - 1))
        inv = jnp.float32(1.0) / (jnp.sqrt(var) + jnp.float32(eps))   # exact
        return vc * inv * alpha + beta

    def mha(q_src16, kv_src16, bias_full, a, sq, skv, bo):
        """Multi-head attention; `a` selects self (0) / cross (1) weights.

        Per-head Q/K/V projections avoid lane slicing; head outputs are
        accumulated through per-head (d_k, D) output-projection blocks instead
        of a lane concatenate.
        """
        scale = jnp.float32(1.0 / math.sqrt(d_k))
        acc = None
        for h in range(heads):                       # static unrolled (tiny)
            wq = wqkv_ref[0, (a * 3 + 0) * heads + h]    # (D, d_k) bf16
            wk = wqkv_ref[0, (a * 3 + 1) * heads + h]
            wv = wqkv_ref[0, (a * 3 + 2) * heads + h]
            bq = battn_ref[0, (a * 3 + 0) * heads + h]   # (1, d_k) f32
            bk = battn_ref[0, (a * 3 + 1) * heads + h]
            bv = battn_ref[0, (a * 3 + 2) * heads + h]

            q = jnp.dot(q_src16, wq, preferred_element_type=jnp.float32) + bq
            k = jnp.dot(kv_src16, wk, preferred_element_type=jnp.float32) + bk
            v = jnp.dot(kv_src16, wv, preferred_element_type=jnp.float32) + bv

            # (B*S, d_k) -> (B, S, d_k): sublane-aligned split, layout-preserving.
            q3 = q.reshape(B, sq, d_k).astype(jnp.bfloat16)
            k3 = k.reshape(B, skv, d_k).astype(jnp.bfloat16)
            v3 = v.reshape(B, skv, d_k).astype(jnp.bfloat16)

            s = jnp.einsum('bqd,bkd->bqk', q3, k3,
                           preferred_element_type=jnp.float32) * scale
            s = s + bias_full
            s = s - jnp.max(s, axis=-1, keepdims=True)
            p = jnp.exp(s)
            p = p * pl.reciprocal(jnp.sum(p, axis=-1, keepdims=True), approx=True)

            o3 = jnp.einsum('bqk,bkd->bqd', p.astype(jnp.bfloat16), v3,
                            preferred_element_type=jnp.float32)       # (B, sq, d_k)
            o2 = o3.reshape(B * sq, d_k).astype(jnp.bfloat16)
            wo_h = wo_ref[0, a * heads + h]                           # (d_k, D) bf16
            part = jnp.dot(o2, wo_h, preferred_element_type=jnp.float32)
            acc = part if acc is None else acc + part
        return acc + bo

    # ---- sublayer 1: norm1 -> masked self-attention -> residual -------------
    x2 = norm(x, 0).astype(jnp.bfloat16)
    x = x + mha(x2, x2, trg_bias, 0, S_trg, S_trg, bvec_ref[0, 0])

    # ---- sublayer 2: norm2 -> cross-attention over encoder outputs ----------
    x2 = norm(x, 2).astype(jnp.bfloat16)
    x = x + mha(x2, enc16, src_bias, 1, S_trg, S_src, bvec_ref[0, 1])

    # ---- sublayer 3: norm3 -> position-wise FFN -> residual ------------------
    x2 = norm(x, 4).astype(jnp.bfloat16)
    hidden = jnp.dot(x2, w1_ref[0], preferred_element_type=jnp.float32) + b1_ref[0]
    hidden = jnp.maximum(hidden, jnp.float32(0.0)).astype(jnp.bfloat16)
    x = x + jnp.dot(hidden, w2_ref[0], preferred_element_type=jnp.float32) + bvec_ref[0, 2]

    x_sc[...] = x

    @pl.when(l == last)
    def _():
        fa = fnorm_ref[0]                            # (1, D)
        fb = fnorm_ref[1]
        d = x.shape[-1]
        mean = jnp.mean(x, axis=-1, keepdims=True)
        xc = x - mean
        var = jnp.sum(xc * xc, axis=-1, keepdims=True) * jnp.float32(1.0 / (d - 1))
        inv = jnp.float32(1.0) / (jnp.sqrt(var) + jnp.float32(eps))
        o_ref[...] = xc * inv * fa + fb


# ------------------------- params / constants (glue) -------------------------

def positional_encoding_table(max_len, d_model):
    # Matches the tutorial: column c uses 10000^(2c/d_model); sin even, cos odd.
    pos = jnp.arange(max_len, dtype=jnp.float32)[:, None]
    col = jnp.arange(d_model, dtype=jnp.float32)[None, :]
    angle = pos / jnp.power(10000.0, (2.0 * col) / d_model)
    even = (jnp.arange(d_model)[None, :] % 2) == 0
    return jnp.where(even, jnp.sin(angle), jnp.cos(angle)).astype(jnp.float32)


def init_decoder_params(key, vocab_size, d_model, N, heads, d_ff, max_len=64):
    assert d_model % heads == 0
    d_k = d_model // heads
    f32, bf16 = jnp.float32, jnp.bfloat16

    def lin_w(k, din, dout):
        return jax.random.normal(k, (din, dout), f32) * (1.0 / math.sqrt(din))

    def lin_b(k, dout):
        return jax.random.normal(k, (dout,), f32) * 0.02

    def per_head_in(w):    # (D, D) -> (heads, D, d_k): head h = output cols h*d_k:(h+1)*d_k
        return jnp.transpose(w.reshape(d_model, heads, d_k), (1, 0, 2))

    def per_head_out(w):   # (D, D) -> (heads, d_k, D): head h = input rows h*d_k:(h+1)*d_k
        return w.reshape(heads, d_k, d_model)

    keys = jax.random.split(key, 1 + N)
    wqkv_l, wo_l, w1_l, w2_l = [], [], [], []
    nrm_l, battn_l, bvec_l, b1_l = [], [], [], []

    ones_row = jnp.ones((1, 1, d_model), f32)
    zeros_row = jnp.zeros((1, 1, d_model), f32)

    for i in range(N):
        lk = jax.random.split(keys[1 + i], 20)
        wq1, wk1, wv1, wo1 = (lin_w(lk[j], d_model, d_model) for j in range(4))
        bq1, bk1, bv1, bo1 = (lin_b(lk[4 + j], d_model) for j in range(4))
        wq2, wk2, wv2, wo2 = (lin_w(lk[8 + j], d_model, d_model) for j in range(4))
        bq2, bk2, bv2, bo2 = (lin_b(lk[12 + j], d_model) for j in range(4))
        w1 = lin_w(lk[16], d_model, d_ff)
        b1 = lin_b(lk[17], d_ff)
        w2 = lin_w(lk[18], d_ff, d_model)
        b2 = lin_b(lk[19], d_model)

        # [self-q heads | self-k | self-v | cross-q | cross-k | cross-v]
        wqkv_l.append(jnp.concatenate(
            [per_head_in(w) for w in (wq1, wk1, wv1, wq2, wk2, wv2)], axis=0))   # (6h, D, d_k)
        wo_l.append(jnp.concatenate(
            [per_head_out(wo1), per_head_out(wo2)], axis=0))                      # (2h, d_k, D)
        battn_l.append(jnp.concatenate(
            [b.reshape(heads, d_k)[:, None, :] for b in (bq1, bk1, bv1, bq2, bk2, bv2)],
            axis=0))                                                              # (6h, 1, d_k)
        nrm_l.append(jnp.concatenate([ones_row, zeros_row] * 3, axis=0))          # (6, 1, D)
        bvec_l.append(jnp.stack([bo1, bo2, b2], axis=0)[:, None, :])              # (3, 1, D)
        b1_l.append(b1.reshape(1, d_ff))                                          # (1, d_ff)
        w1_l.append(w1)
        w2_l.append(w2)

    params = {
        "embed": jax.random.normal(keys[0], (vocab_size, d_model), f32) * 0.1,
        "pe": positional_encoding_table(max_len, d_model),
        "wqkv": jnp.stack(wqkv_l).astype(bf16),      # (N, 6h, D, d_k)
        "wo": jnp.stack(wo_l).astype(bf16),          # (N, 2h, d_k, D)
        "w1": jnp.stack(w1_l).astype(bf16),          # (N, D, d_ff)
        "w2": jnp.stack(w2_l).astype(bf16),          # (N, d_ff, D)
        "nrm": jnp.stack(nrm_l),                     # (N, 6, 1, D) f32
        "battn": jnp.stack(battn_l),                 # (N, 6h, 1, d_k) f32
        "bvec": jnp.stack(bvec_l),                   # (N, 3, 1, D) f32
        "b1": jnp.stack(b1_l),                       # (N, 1, d_ff) f32
        "fnorm": jnp.stack([jnp.ones((1, d_model), f32),
                            jnp.zeros((1, d_model), f32)], axis=0),   # (2, 1, D)
    }
    return params


# ------------------------------- forward pass --------------------------------

def decoder_forward(params, trg, e_outputs, src_mask, trg_mask, *, heads):
    B, S = trg.shape
    S_src = e_outputs.shape[1]
    D = params["embed"].shape[1]
    N = params["wqkv"].shape[0]
    d_ff = params["w1"].shape[-1]
    d_k = D // heads

    # Embedding gather + x*sqrt(D) + PE as plain-JAX glue (fuses under jit).
    x0 = (jnp.take(params["embed"], trg, axis=0) * jnp.float32(math.sqrt(D))
          + params["pe"][None, :S, :]).reshape(B * S, D).astype(jnp.float32)
    enc16 = e_outputs.astype(jnp.bfloat16).reshape(B * S_src, D)
    # Additive -1e9 mask biases built once per forward (loaded once by the kernel).
    trg_bias = jnp.where(trg_mask == 0, jnp.float32(-1e9), jnp.float32(0.0))   # (B,S,S)
    src_bias = jnp.where(src_mask == 0, jnp.float32(-1e9), jnp.float32(0.0))   # (B,1,Ss)

    kernel = partial(_decoder_stack_kernel, heads=heads, d_k=d_k,
                     B=B, S_trg=S, S_src=S_src, eps=1e-6)

    out = pl.pallas_call(
        kernel,
        out_shape=jax.ShapeDtypeStruct((B * S, D), jnp.float32),
        grid=(N,),
        in_specs=[
            pl.BlockSpec((B * S, D), lambda l: (0, 0)),                   # x0 (loaded once)
            pl.BlockSpec((B * S_src, D), lambda l: (0, 0)),               # enc bf16
            pl.BlockSpec((B, S, S), lambda l: (0, 0, 0)),                 # trg bias
            pl.BlockSpec((B, 1, S_src), lambda l: (0, 0, 0)),             # src bias
            pl.BlockSpec((1, 6 * heads, D, d_k), lambda l: (l, 0, 0, 0)),  # wqkv
            pl.BlockSpec((1, 2 * heads, d_k, D), lambda l: (l, 0, 0, 0)),  # wo
            pl.BlockSpec((1, D, d_ff), lambda l: (l, 0, 0)),               # w1
            pl.BlockSpec((1, d_ff, D), lambda l: (l, 0, 0)),               # w2
            pl.BlockSpec((1, 6, 1, D), lambda l: (l, 0, 0, 0)),            # norm a/b
            pl.BlockSpec((1, 6 * heads, 1, d_k), lambda l: (l, 0, 0, 0)),  # qkv biases
            pl.BlockSpec((1, 3, 1, D), lambda l: (l, 0, 0, 0)),            # bo1/bo2/b2
            pl.BlockSpec((1, 1, d_ff), lambda l: (l, 0, 0)),               # b1
            pl.BlockSpec((2, 1, D), lambda l: (0, 0, 0)),                  # final norm
        ],
        out_specs=pl.BlockSpec((B * S, D), lambda l: (0, 0)),
        scratch_shapes=[pltpu.VMEM((B * S, D), jnp.float32)],
        compiler_params=pltpu.CompilerParams(
            dimension_semantics=("arbitrary",),
            vmem_limit_bytes=32 * 1024 * 1024),
    )(x0, enc16, trg_bias, src_bias,
      params["wqkv"], params["wo"], params["w1"], params["w2"],
      params["nrm"], params["battn"], params["bvec"], params["b1"],
      params["fnorm"])

    return out.reshape(B, S, D)


decoder_forward_jit = jax.jit(decoder_forward, static_argnames=("heads",))


# --------------------------------- main ---------------------------------------

if __name__ == "__main__":
    B, S_trg, S_src = 2, 8, 16
    vocab_size, d_model, N, heads, d_ff = 50, 32, 2, 4, 128

    key = jax.random.PRNGKey(0)
    kp, kt, ke = jax.random.split(key, 3)
    params = init_decoder_params(kp, vocab_size, d_model, N, heads, d_ff)

    trg = jax.random.randint(kt, (B, S_trg), 0, vocab_size, dtype=jnp.int32)
    e_outputs = jax.random.normal(ke, (B, S_src, d_model), jnp.float32)

    # trg mask: no-peek lower triangle combined with padding on the last position
    nopeek = jnp.tril(jnp.ones((S_trg, S_trg), jnp.int32))
    trg_pad = jnp.ones((B, 1, S_trg), jnp.int32).at[:, :, -1:].set(0)
    trg_mask = (trg_pad * nopeek[None, :, :]).astype(jnp.int32)       # (B, S, S)
    # src mask: (B, 1, S_src), last two source positions padded
    src_mask = jnp.ones((B, 1, S_src), jnp.int32).at[:, :, -2:].set(0)

    out = decoder_forward_jit(params, trg, e_outputs, src_mask, trg_mask, heads=heads)
    jax.block_until_ready(out)
    assert out.shape == (B, S_trg, d_model)
    assert bool(jnp.all(jnp.isfinite(out)))
    print("KERNEL_OK")
</pallas_src>

<mosaic_0001>
module attributes {stable_mosaic.version = 11 : i64} {
  func.func @_decoder_stack_kernel(%arg0: i32, %arg1: memref<16x32xf32, #tpu.memory_space<vmem>>, %arg2: memref<32x32xbf16, #tpu.memory_space<vmem>>, %arg3: memref<2x8x8xf32, #tpu.memory_space<vmem>>, %arg4: memref<2x1x16xf32, #tpu.memory_space<vmem>>, %arg5: memref<1x24x32x8xbf16, #tpu.memory_space<vmem>>, %arg6: memref<1x8x8x32xbf16, #tpu.memory_space<vmem>>, %arg7: memref<1x32x128xbf16, #tpu.memory_space<vmem>>, %arg8: memref<1x128x32xbf16, #tpu.memory_space<vmem>>, %arg9: memref<1x6x1x32xf32, #tpu.memory_space<vmem>>, %arg10: memref<1x24x1x8xf32, #tpu.memory_space<vmem>>, %arg11: memref<1x3x1x32xf32, #tpu.memory_space<vmem>>, %arg12: memref<1x1x128xf32, #tpu.memory_space<vmem>>, %arg13: memref<2x1x32xf32, #tpu.memory_space<vmem>>, %arg14: memref<16x32xf32, #tpu.memory_space<vmem>>, %arg15: memref<16x32xf32, #tpu.memory_space<vmem>>) attributes {dimension_semantics = [#tpu.dimension_semantics<arbitrary>], iteration_bounds = array<i64: 2>, scalar_prefetch = 0 : i64, scratch_operands = 1 : i64, tpu.core_type = #tpu.core_type<tc>, window_params = [{pipeline_mode = #tpu.pipeline_mode<synchronous>, transform_indices = @transform_0, window_bounds = array<i64: 16, 32>}, {pipeline_mode = #tpu.pipeline_mode<synchronous>, transform_indices = @transform_1, window_bounds = array<i64: 32, 32>}, {pipeline_mode = #tpu.pipeline_mode<synchronous>, transform_indices = @transform_2, window_bounds = array<i64: 2, 8, 8>}, {pipeline_mode = #tpu.pipeline_mode<synchronous>, transform_indices = @transform_3, window_bounds = array<i64: 2, 1, 16>}, {transform_indices = @transform_4, window_bounds = array<i64: 1, 24, 32, 8>}, {transform_indices = @transform_5, window_bounds = array<i64: 1, 8, 8, 32>}, {transform_indices = @transform_6, window_bounds = array<i64: 1, 32, 128>}, {transform_indices = @transform_7, window_bounds = array<i64: 1, 128, 32>}, {transform_indices = @transform_8, window_bounds = array<i64: 1, 6, 1, 32>}, {transform_indices = @transform_9, window_bounds = array<i64: 1, 24, 1, 8>}, {transform_indices = @transform_10, window_bounds = array<i64: 1, 3, 1, 32>}, {transform_indices = @transform_11, window_bounds = array<i64: 1, 1, 128>}, {pipeline_mode = #tpu.pipeline_mode<synchronous>, transform_indices = @transform_12, window_bounds = array<i64: 2, 1, 32>}, {pipeline_mode = #tpu.pipeline_mode<synchronous>, transform_indices = @transform_13, window_bounds = array<i64: 16, 32>}]} {
    %c0_i32 = arith.constant 0 : i32
    %0 = arith.cmpi eq, %arg0, %c0_i32 : i32
    %1 = arith.extui %0 : i1 to i32
    %c0_i32_0 = arith.constant 0 : i32
    %2 = arith.cmpi ne, %1, %c0_i32_0 : i32
    scf.if %2 {
      %c0_351 = arith.constant 0 : index
      %c0_352 = arith.constant 0 : index
      %512 = vector.load %arg1[%c0_351, %c0_352] : memref<16x32xf32, #tpu.memory_space<vmem>>, vector<16x32xf32>
      %c0_353 = arith.constant 0 : index
      %c0_354 = arith.constant 0 : index
      %513 = vector.load %arg15[%c0_353, %c0_354] : memref<16x32xf32, #tpu.memory_space<vmem>>, vector<16x32xf32>
      tpu.vector_store %arg15[%c0_353, %c0_354], %512 {strides = array<i32>} : memref<16x32xf32, #tpu.memory_space<vmem>>, vector<16x32xf32>,
    } else {
    }
    %c0 = arith.constant 0 : index
    %c0_1 = arith.constant 0 : index
    %3 = vector.load %arg15[%c0, %c0_1] : memref<16x32xf32, #tpu.memory_space<vmem>>, vector<16x32xf32>
    %c0_2 = arith.constant 0 : index
    %c0_3 = arith.constant 0 : index
    %4 = vector.load %arg2[%c0_2, %c0_3] : memref<32x32xbf16, #tpu.memory_space<vmem>>, vector<32x32xbf16>
    %c0_4 = arith.constant 0 : index
    %c0_5 = arith.constant 0 : index
    %c0_6 = arith.constant 0 : index
    %5 = vector.load %arg3[%c0_4, %c0_5, %c0_6] : memref<2x8x8xf32, #tpu.memory_space<vmem>>, vector<2x8x8xf32>
    %c0_7 = arith.constant 0 : index
    %c0_8 = arith.constant 0 : index
    %c0_9 = arith.constant 0 : index
    %6 = vector.load %arg4[%c0_7, %c0_8, %c0_9] : memref<2x1x16xf32, #tpu.memory_space<vmem>>, vector<2x1x16xf32>
    %7 = vector.shape_cast %6 : vector<2x1x16xf32> to vector<2x1x16xf32>
    %8 = vector.broadcast %7 : vector<2x1x16xf32> to vector<2x8x16xf32>
    %c0_10 = arith.constant 0 : index
    %c0_11 = arith.constant 0 : index
    %c0_12 = arith.constant 0 : index
    %c0_13 = arith.constant 0 : index
    %9 = vector.load %arg9[%c0_10, %c0_11, %c0_12, %c0_13] : memref<1x6x1x32xf32, #tpu.memory_space<vmem>>, vector<1x1x1x32xf32>
    %10 = vector.shape_cast %9 : vector<1x1x1x32xf32> to vector<1x32xf32>
    %c0_14 = arith.constant 0 : index
    %c1 = arith.constant 1 : index
    %c0_15 = arith.constant 0 : index
    %c0_16 = arith.constant 0 : index
    %11 = vector.load %arg9[%c0_14, %c1, %c0_15, %c0_16] : memref<1x6x1x32xf32, #tpu.memory_space<vmem>>, vector<1x1x1x32xf32>
    %12 = vector.shape_cast %11 : vector<1x1x1x32xf32> to vector<1x32xf32>
    %cst = arith.constant dense<0.000000e+00> : vector<16xf32>
    %13 = vector.multi_reduction <add>, %3, %cst [1] : vector<16x32xf32> to vector<16xf32>
    %14 = vector.shape_cast %13 : vector<16xf32> to vector<16x1xf32>
    %cst_17 = arith.constant 3.200000e+01 : f32
    %15 = vector.broadcast %cst_17 : f32 to vector<16x1xf32>
    %16 = arith.divf %14, %15 : vector<16x1xf32>
    %17 = vector.broadcast %16 : vector<16x1xf32> to vector<16x32xf32>
    %18 = arith.subf %3, %17 : vector<16x32xf32>
    %19 = arith.mulf %18, %18 : vector<16x32xf32>
    %cst_18 = arith.constant dense<0.000000e+00> : vector<16xf32>
    %20 = vector.multi_reduction <add>, %19, %cst_18 [1] : vector<16x32xf32> to vector<16xf32>
    %21 = vector.shape_cast %20 : vector<16xf32> to vector<16x1xf32>
    %cst_19 = arith.constant 0.0322580636 : f32
    %22 = vector.broadcast %cst_19 : f32 to vector<16x1xf32>
    %23 = arith.mulf %21, %22 : vector<16x1xf32>
    %24 = math.sqrt %23 : vector<16x1xf32>
    %cst_20 = arith.constant 9.99999997E-7 : f32
    %25 = vector.broadcast %cst_20 : f32 to vector<16x1xf32>
    %26 = arith.addf %24, %25 : vector<16x1xf32>
    %cst_21 = arith.constant 1.000000e+00 : f32
    %27 = vector.broadcast %cst_21 : f32 to vector<16x1xf32>
    %28 = arith.divf %27, %26 : vector<16x1xf32>
    %29 = vector.broadcast %28 : vector<16x1xf32> to vector<16x32xf32>
    %30 = arith.mulf %18, %29 : vector<16x32xf32>
    %31 = vector.broadcast %10 : vector<1x32xf32> to vector<16x32xf32>
    %32 = arith.mulf %30, %31 : vector<16x32xf32>
    %33 = vector.broadcast %12 : vector<1x32xf32> to vector<16x32xf32>
    %34 = arith.addf %32, %33 : vector<16x32xf32>
    %35 = arith.truncf %34 : vector<16x32xf32> to vector<16x32xbf16>
    %c0_22 = arith.constant 0 : index
    %c0_23 = arith.constant 0 : index
    %c0_24 = arith.constant 0 : index
    %c0_25 = arith.constant 0 : index
    %36 = vector.load %arg11[%c0_22, %c0_23, %c0_24, %c0_25] : memref<1x3x1x32xf32, #tpu.memory_space<vmem>>, vector<1x1x1x32xf32>
    %37 = vector.shape_cast %36 : vector<1x1x1x32xf32> to vector<1x32xf32>
    %c0_26 = arith.constant 0 : index
    %c0_27 = arith.constant 0 : index
    %c0_28 = arith.constant 0 : index
    %c0_29 = arith.constant 0 : index
    %38 = vector.load %arg5[%c0_26, %c0_27, %c0_28, %c0_29] : memref<1x24x32x8xbf16, #tpu.memory_space<vmem>>, vector<1x1x32x8xbf16>
    %39 = vector.shape_cast %38 : vector<1x1x32x8xbf16> to vector<32x8xbf16>
    %c0_30 = arith.constant 0 : index
    %c4 = arith.constant 4 : index
    %c0_31 = arith.constant 0 : index
    %c0_32 = arith.constant 0 : index
    %40 = vector.load %arg5[%c0_30, %c4, %c0_31, %c0_32] : memref<1x24x32x8xbf16, #tpu.memory_space<vmem>>, vector<1x1x32x8xbf16>
    %41 = vector.shape_cast %40 : vector<1x1x32x8xbf16> to vector<32x8xbf16>
    %c0_33 = arith.constant 0 : index
    %c8 = arith.constant 8 : index
    %c0_34 = arith.constant 0 : index
    %c0_35 = arith.constant 0 : index
    %42 = vector.load %arg5[%c0_33, %c8, %c0_34, %c0_35] : memref<1x24x32x8xbf16, #tpu.memory_space<vmem>>, vector<1x1x32x8xbf16>
    %43 = vector.shape_cast %42 : vector<1x1x32x8xbf16> to vector<32x8xbf16>
    %c0_36 = arith.constant 0 : index
    %c0_37 = arith.constant 0 : index
    %c0_38 = arith.constant 0 : index
    %c0_39 = arith.constant 0 : index
    %44 = vector.load %arg10[%c0_36, %c0_37, %c0_38, %c0_39] : memref<1x24x1x8xf32, #tpu.memory_space<vmem>>, vector<1x1x1x8xf32>
    %45 = vector.shape_cast %44 : vector<1x1x1x8xf32> to vector<1x8xf32>
    %c0_40 = arith.constant 0 : index
    %c4_41 = arith.constant 4 : index
    %c0_42 = arith.constant 0 : index
    %c0_43 = arith.constant 0 : index
    %46 = vector.load %arg10[%c0_40, %c4_41, %c0_42, %c0_43] : memref<1x24x1x8xf32, #tpu.memory_space<vmem>>, vector<1x1x1x8xf32>
    %47 = vector.shape_cast %46 : vector<1x1x1x8xf32> to vector<1x8xf32>
    %c0_44 = arith.constant 0 : index
    %c8_45 = arith.constant 8 : index
    %c0_46 = arith.constant 0 : index
    %c0_47 = arith.constant 0 : index
    %48 = vector.load %arg10[%c0_44, %c8_45, %c0_46, %c0_47] : memref<1x24x1x8xf32, #tpu.memory_space<vmem>>, vector<1x1x1x8xf32>
    %49 = vector.shape_cast %48 : vector<1x1x1x8xf32> to vector<1x8xf32>
    %cst_48 = arith.constant dense<0.000000e+00> : vector<16x8xf32>
    %50 = tpu.matmul %35, %39, %cst_48 {dimension_numbers = #tpu.dot_dimension_numbers<[1], [0], [0], [1], [0, 0, 1, 1], [], []>} : vector<16x32xbf16>, vector<32x8xbf16>, vector<16x8xf32> -> vector<16x8xf32>
    %51 = vector.broadcast %45 : vector<1x8xf32> to vector<16x8xf32>
    %52 = arith.addf %50, %51 : vector<16x8xf32>
    %cst_49 = arith.constant dense<0.000000e+00> : vector<16x8xf32>
    %53 = tpu.matmul %35, %41, %cst_49 {dimension_numbers = #tpu.dot_dimension_numbers<[1], [0], [0], [1], [0, 0, 1, 1], [], []>} : vector<16x32xbf16>, vector<32x8xbf16>, vector<16x8xf32> -> vector<16x8xf32>
    %54 = vector.broadcast %47 : vector<1x8xf32> to vector<16x8xf32>
    %55 = arith.addf %53, %54 : vector<16x8xf32>
    %cst_50 = arith.constant dense<0.000000e+00> : vector<16x8xf32>
    %56 = tpu.matmul %35, %43, %cst_50 {dimension_numbers = #tpu.dot_dimension_numbers<[1], [0], [0], [1], [0, 0, 1, 1], [], []>} : vector<16x32xbf16>, vector<32x8xbf16>, vector<16x8xf32> -> vector<16x8xf32>
    %57 = vector.broadcast %49 : vector<1x8xf32> to vector<16x8xf32>
    %58 = arith.addf %56, %57 : vector<16x8xf32>
    %59 = vector.shape_cast %52 : vector<16x8xf32> to vector<2x8x8xf32>
    %60 = arith.truncf %59 : vector<2x8x8xf32> to vector<2x8x8xbf16>
    %61 = vector.shape_cast %55 : vector<16x8xf32> to vector<2x8x8xf32>
    %62 = arith.truncf %61 : vector<2x8x8xf32> to vector<2x8x8xbf16>
    %63 = vector.shape_cast %58 : vector<16x8xf32> to vector<2x8x8xf32>
    %64 = arith.truncf %63 : vector<2x8x8xf32> to vector<2x8x8xbf16>
    "tpu.trace_start"() <{level = 10 : i32, message = "bqd,bkd->bqk"}> : () -> ()
    %cst_51 = arith.constant dense<0.000000e+00> : vector<2x8x8xf32>
    %65 = tpu.matmul %60, %62, %cst_51 {dimension_numbers = #tpu.dot_dimension_numbers<[2], [2], [1], [1], [0, 0, 0, 1, 1, 1], [0], [0]>} : vector<2x8x8xbf16>, vector<2x8x8xbf16>, vector<2x8x8xf32> -> vector<2x8x8xf32>
    "tpu.trace_stop"() : () -> ()
    %cst_52 = arith.constant 0.353553385 : f32
    %66 = vector.broadcast %cst_52 : f32 to vector<2x8x8xf32>
    %67 = arith.mulf %65, %66 : vector<2x8x8xf32>
    %68 = arith.addf %67, %5 : vector<2x8x8xf32>
    %cst_53 = arith.constant dense<0xFF800000> : vector<2x8xf32>
    %69 = vector.multi_reduction <maximumf>, %68, %cst_53 [2] : vector<2x8x8xf32> to vector<2x8xf32>
    %70 = vector.shape_cast %69 : vector<2x8xf32> to vector<2x8x1xf32>
    %71 = vector.broadcast %70 : vector<2x8x1xf32> to vector<2x8x8xf32>
    %72 = arith.subf %68, %71 : vector<2x8x8xf32>
    %73 = math.exp %72 : vector<2x8x8xf32>
    %cst_54 = arith.constant dense<0.000000e+00> : vector<2x8xf32>
    %74 = vector.multi_reduction <add>, %73, %cst_54 [2] : vector<2x8x8xf32> to vector<2x8xf32>
    %75 = vector.shape_cast %74 : vector<2x8xf32> to vector<2x8x1xf32>
    %76 = tpu.reciprocal %75 {approx = true} : vector<2x8x1xf32> -> vector<2x8x1xf32>
    %77 = vector.broadcast %76 : vector<2x8x1xf32> to vector<2x8x8xf32>
    %78 = arith.mulf %73, %77 : vector<2x8x8xf32>
    %79 = arith.truncf %78 : vector<2x8x8xf32> to vector<2x8x8xbf16>
    "tpu.trace_start"() <{level = 10 : i32, message = "bqk,bkd->bqd"}> : () -> ()
    %cst_55 = arith.constant dense<0.000000e+00> : vector<2x8x8xf32>
    %80 = tpu.matmul %79, %64, %cst_55 {dimension_numbers = #tpu.dot_dimension_numbers<[2], [1], [1], [2], [0, 0, 0, 1, 1, 2], [0], [0]>} : vector<2x8x8xbf16>, vector<2x8x8xbf16>, vector<2x8x8xf32> -> vector<2x8x8xf32>
    "tpu.trace_stop"() : () -> ()
    %81 = vector.shape_cast %80 : vector<2x8x8xf32> to vector<16x8xf32>
    %82 = arith.truncf %81 : vector<16x8xf32> to vector<16x8xbf16>
    %c0_56 = arith.constant 0 : index
    %c0_57 = arith.constant 0 : index
    %c0_58 = arith.constant 0 : index
    %c0_59 = arith.constant 0 : index
    %83 = vector.load %arg6[%c0_56, %c0_57, %c0_58, %c0_59] : memref<1x8x8x32xbf16, #tpu.memory_space<vmem>>, vector<1x1x8x32xbf16>
    %84 = vector.shape_cast %83 : vector<1x1x8x32xbf16> to vector<8x32xbf16>
    %cst_60 = arith.constant dense<0.000000e+00> : vector<16x32xf32>
    %85 = tpu.matmul %82, %84, %cst_60 {dimension_numbers = #tpu.dot_dimension_numbers<[1], [0], [0], [1], [0, 0, 1, 1], [], []>} : vector<16x8xbf16>, vector<8x32xbf16>, vector<16x32xf32> -> vector<16x32xf32>
    %c0_61 = arith.constant 0 : index
    %c1_62 = arith.constant 1 : index
    %c0_63 = arith.constant 0 : index
    %c0_64 = arith.constant 0 : index
    %86 = vector.load %arg5[%c0_61, %c1_62, %c0_63, %c0_64] : memref<1x24x32x8xbf16, #tpu.memory_space<vmem>>, vector<1x1x32x8xbf16>
    %87 = vector.shape_cast %86 : vector<1x1x32x8xbf16> to vector<32x8xbf16>
    %c0_65 = arith.constant 0 : index
    %c5 = arith.constant 5 : index
    %c0_66 = arith.constant 0 : index
    %c0_67 = arith.constant 0 : index
    %88 = vector.load %arg5[%c0_65, %c5, %c0_66, %c0_67] : memref<1x24x32x8xbf16, #tpu.memory_space<vmem>>, vector<1x1x32x8xbf16>
    %89 = vector.shape_cast %88 : vector<1x1x32x8xbf16> to vector<32x8xbf16>
    %c0_68 = arith.constant 0 : index
    %c9 = arith.constant 9 : index
    %c0_69 = arith.constant 0 : index
    %c0_70 = arith.constant 0 : index
    %90 = vector.load %arg5[%c0_68, %c9, %c0_69, %c0_70] : memref<1x24x32x8xbf16, #tpu.memory_space<vmem>>, vector<1x1x32x8xbf16>
    %91 = vector.shape_cast %90 : vector<1x1x32x8xbf16> to vector<32x8xbf16>
    %c0_71 = arith.constant 0 : index
    %c1_72 = arith.constant 1 : index
    %c0_73 = arith.constant 0 : index
    %c0_74 = arith.constant 0 : index
    %92 = vector.load %arg10[%c0_71, %c1_72, %c0_73, %c0_74] : memref<1x24x1x8xf32, #tpu.memory_space<vmem>>, vector<1x1x1x8xf32>
    %93 = vector.shape_cast %92 : vector<1x1x1x8xf32> to vector<1x8xf32>
    %c0_75 = arith.constant 0 : index
    %c5_76 = arith.constant 5 : index
    %c0_77 = arith.constant 0 : index
    %c0_78 = arith.constant 0 : index
    %94 = vector.load %arg10[%c0_75, %c5_76, %c0_77, %c0_78] : memref<1x24x1x8xf32, #tpu.memory_space<vmem>>, vector<1x1x1x8xf32>
    %95 = vector.shape_cast %94 : vector<1x1x1x8xf32> to vector<1x8xf32>
    %c0_79 = arith.constant 0 : index
    %c9_80 = arith.constant 9 : index
    %c0_81 = arith.constant 0 : index
    %c0_82 = arith.constant 0 : index
    %96 = vector.load %arg10[%c0_79, %c9_80, %c0_81, %c0_82] : memref<1x24x1x8xf32, #tpu.memory_space<vmem>>, vector<1x1x1x8xf32>
    %97 = vector.shape_cast %96 : vector<1x1x1x8xf32> to vector<1x8xf32>
    %cst_83 = arith.constant dense<0.000000e+00> : vector<16x8xf32>
    %98 = tpu.matmul %35, %87, %cst_83 {dimension_numbers = #tpu.dot_dimension_numbers<[1], [0], [0], [1], [0, 0, 1, 1], [], []>} : vector<16x32xbf16>, vector<32x8xbf16>, vector<16x8xf32> -> vector<16x8xf32>
    %99 = vector.broadcast %93 : vector<1x8xf32> to vector<16x8xf32>
    %100 = arith.addf %98, %99 : vector<16x8xf32>
    %cst_84 = arith.constant dense<0.000000e+00> : vector<16x8xf32>
    %101 = tpu.matmul %35, %89, %cst_84 {dimension_numbers = #tpu.dot_dimension_numbers<[1], [0], [0], [1], [0, 0, 1, 1], [], []>} : vector<16x32xbf16>, vector<32x8xbf16>, vector<16x8xf32> -> vector<16x8xf32>
    %102 = vector.broadcast %95 : vector<1x8xf32> to vector<16x8xf32>
    %103 = arith.addf %101, %102 : vector<16x8xf32>
    %cst_85 = arith.constant dense<0.000000e+00> : vector<16x8xf32>
    %104 = tpu.matmul %35, %91, %cst_85 {dimension_numbers = #tpu.dot_dimension_numbers<[1], [0], [0], [1], [0, 0, 1, 1], [], []>} : vector<16x32xbf16>, vector<32x8xbf16>, vector<16x8xf32> -> vector<16x8xf32>
    %105 = vector.broadcast %97 : vector<1x8xf32> to vector<16x8xf32>
    %106 = arith.addf %104, %105 : vector<16x8xf32>
    %107 = vector.shape_cast %100 : vector<16x8xf32> to vector<2x8x8xf32>
    %108 = arith.truncf %107 : vector<2x8x8xf32> to vector<2x8x8xbf16>
    %109 = vector.shape_cast %103 : vector<16x8xf32> to vector<2x8x8xf32>
    %110 = arith.truncf %109 : vector<2x8x8xf32> to vector<2x8x8xbf16>
    %111 = vector.shape_cast %106 : vector<16x8xf32> to vector<2x8x8xf32>
    %112 = arith.truncf %111 : vector<2x8x8xf32> to vector<2x8x8xbf16>
    "tpu.trace_start"() <{level = 10 : i32, message = "bqd,bkd->bqk"}> : () -> ()
    %cst_86 = arith.constant dense<0.000000e+00> : vector<2x8x8xf32>
    %113 = tpu.matmul %108, %110, %cst_86 {dimension_numbers = #tpu.dot_dimension_numbers<[2], [2], [1], [1], [0, 0, 0, 1, 1, 1], [0], [0]>} : vector<2x8x8xbf16>, vector<2x8x8xbf16>, vector<2x8x8xf32> -> vector<2x8x8xf32>
    "tpu.trace_stop"() : () -> ()
    %cst_87 = arith.constant 0.353553385 : f32
    %114 = vector.broadcast %cst_87 : f32 to vector<2x8x8xf32>
    %115 = arith.mulf %113, %114 : vector<2x8x8xf32>
    %116 = arith.addf %115, %5 : vector<2x8x8xf32>
    %cst_88 = arith.constant dense<0xFF800000> : vector<2x8xf32>
    %117 = vector.multi_reduction <maximumf>, %116, %cst_88 [2] : vector<2x8x8xf32> to vector<2x8xf32>
    %118 = vector.shape_cast %117 : vector<2x8xf32> to vector<2x8x1xf32>
    %119 = vector.broadcast %118 : vector<2x8x1xf32> to vector<2x8x8xf32>
    %120 = arith.subf %116, %119 : vector<2x8x8xf32>
    %121 = math.exp %120 : vector<2x8x8xf32>
    %cst_89 = arith.constant dense<0.000000e+00> : vector<2x8xf32>
    %122 = vector.multi_reduction <add>, %121, %cst_89 [2] : vector<2x8x8xf32> to vector<2x8xf32>
    %123 = vector.shape_cast %122 : vector<2x8xf32> to vector<2x8x1xf32>
    %124 = tpu.reciprocal %123 {approx = true} : vector<2x8x1xf32> -> vector<2x8x1xf32>
    %125 = vector.broadcast %124 : vector<2x8x1xf32> to vector<2x8x8xf32>
    %126 = arith.mulf %121, %125 : vector<2x8x8xf32>
    %127 = arith.truncf %126 : vector<2x8x8xf32> to vector<2x8x8xbf16>
    "tpu.trace_start"() <{level = 10 : i32, message = "bqk,bkd->bqd"}> : () -> ()
    %cst_90 = arith.constant dense<0.000000e+00> : vector<2x8x8xf32>
    %128 = tpu.matmul %127, %112, %cst_90 {dimension_numbers = #tpu.dot_dimension_numbers<[2], [1], [1], [2], [0, 0, 0, 1, 1, 2], [0], [0]>} : vector<2x8x8xbf16>, vector<2x8x8xbf16>, vector<2x8x8xf32> -> vector<2x8x8xf32>
    "tpu.trace_stop"() : () -> ()
    %129 = vector.shape_cast %128 : vector<2x8x8xf32> to vector<16x8xf32>
    %130 = arith.truncf %129 : vector<16x8xf32> to vector<16x8xbf16>
    %c0_91 = arith.constant 0 : index
    %c1_92 = arith.constant 1 : index
    %c0_93 = arith.constant 0 : index
    %c0_94 = arith.constant 0 : index
    %131 = vector.load %arg6[%c0_91, %c1_92, %c0_93, %c0_94] : memref<1x8x8x32xbf16, #tpu.memory_space<vmem>>, vector<1x1x8x32xbf16>
    %132 = vector.shape_cast %131 : vector<1x1x8x32xbf16> to vector<8x32xbf16>
    %cst_95 = arith.constant dense<0.000000e+00> : vector<16x32xf32>
    %133 = tpu.matmul %130, %132, %cst_95 {dimension_numbers = #tpu.dot_dimension_numbers<[1], [0], [0], [1], [0, 0, 1, 1], [], []>} : vector<16x8xbf16>, vector<8x32xbf16>, vector<16x32xf32> -> vector<16x32xf32>
    %134 = arith.addf %85, %133 : vector<16x32xf32>
    %c0_96 = arith.constant 0 : index
    %c2 = arith.constant 2 : index
    %c0_97 = arith.constant 0 : index
    %c0_98 = arith.constant 0 : index
    %135 = vector.load %arg5[%c0_96, %c2, %c0_97, %c0_98] : memref<1x24x32x8xbf16, #tpu.memory_space<vmem>>, vector<1x1x32x8xbf16>
    %136 = vector.shape_cast %135 : vector<1x1x32x8xbf16> to vector<32x8xbf16>
    %c0_99 = arith.constant 0 : index
    %c6 = arith.constant 6 : index
    %c0_100 = arith.constant 0 : index
    %c0_101 = arith.constant 0 : index
    %137 = vector.load %arg5[%c0_99, %c6, %c0_100, %c0_101] : memref<1x24x32x8xbf16, #tpu.memory_space<vmem>>, vector<1x1x32x8xbf16>
    %138 = vector.shape_cast %137 : vector<1x1x32x8xbf16> to vector<32x8xbf16>
    %c0_102 = arith.constant 0 : index
    %c10 = arith.constant 10 : index
    %c0_103 = arith.constant 0 : index
    %c0_104 = arith.constant 0 : index
    %139 = vector.load %arg5[%c0_102, %c10, %c0_103, %c0_104] : memref<1x24x32x8xbf16, #tpu.memory_space<vmem>>, vector<1x1x32x8xbf16>
    %140 = vector.shape_cast %139 : vector<1x1x32x8xbf16> to vector<32x8xbf16>
    %c0_105 = arith.constant 0 : index
    %c2_106 = arith.constant 2 : index
    %c0_107 = arith.constant 0 : index
    %c0_108 = arith.constant 0 : index
    %141 = vector.load %arg10[%c0_105, %c2_106, %c0_107, %c0_108] : memref<1x24x1x8xf32, #tpu.memory_space<vmem>>, vector<1x1x1x8xf32>
    %142 = vector.shape_cast %141 : vector<1x1x1x8xf32> to vector<1x8xf32>
    %c0_109 = arith.constant 0 : index
    %c6_110 = arith.constant 6 : index
    %c0_111 = arith.constant 0 : index
    %c0_112 = arith.constant 0 : index
    %143 = vector.load %arg10[%c0_109, %c6_110, %c0_111, %c0_112] : memref<1x24x1x8xf32, #tpu.memory_space<vmem>>, vector<1x1x1x8xf32>
    %144 = vector.shape_cast %143 : vector<1x1x1x8xf32> to vector<1x8xf32>
    %c0_113 = arith.constant 0 : index
    %c10_114 = arith.constant 10 : index
    %c0_115 = arith.constant 0 : index
    %c0_116 = arith.constant 0 : index
    %145 = vector.load %arg10[%c0_113, %c10_114, %c0_115, %c0_116] : memref<1x24x1x8xf32, #tpu.memory_space<vmem>>, vector<1x1x1x8xf32>
    %146 = vector.shape_cast %145 : vector<1x1x1x8xf32> to vector<1x8xf32>
    %cst_117 = arith.constant dense<0.000000e+00> : vector<16x8xf32>
    %147 = tpu.matmul %35, %136, %cst_117 {dimension_numbers = #tpu.dot_dimension_numbers<[1], [0], [0], [1], [0, 0, 1, 1], [], []>} : vector<16x32xbf16>, vector<32x8xbf16>, vector<16x8xf32> -> vector<16x8xf32>
    %148 = vector.broadcast %142 : vector<1x8xf32> to vector<16x8xf32>
    %149 = arith.addf %147, %148 : vector<16x8xf32>
    %cst_118 = arith.constant dense<0.000000e+00> : vector<16x8xf32>
    %150 = tpu.matmul %35, %138, %cst_118 {dimension_numbers = #tpu.dot_dimension_numbers<[1], [0], [0], [1], [0, 0, 1, 1], [], []>} : vector<16x32xbf16>, vector<32x8xbf16>, vector<16x8xf32> -> vector<16x8xf32>
    %151 = vector.broadcast %144 : vector<1x8xf32> to vector<16x8xf32>
    %152 = arith.addf %150, %151 : vector<16x8xf32>
    %cst_119 = arith.constant dense<0.000000e+00> : vector<16x8xf32>
    %153 = tpu.matmul %35, %140, %cst_119 {dimension_numbers = #tpu.dot_dimension_numbers<[1], [0], [0], [1], [0, 0, 1, 1], [], []>} : vector<16x32xbf16>, vector<32x8xbf16>, vector<16x8xf32> -> vector<16x8xf32>
    %154 = vector.broadcast %146 : vector<1x8xf32> to vector<16x8xf32>
    %155 = arith.addf %153, %154 : vector<16x8xf32>
    %156 = vector.shape_cast %149 : vector<16x8xf32> to vector<2x8x8xf32>
    %157 = arith.truncf %156 : vector<2x8x8xf32> to vector<2x8x8xbf16>
    %158 = vector.shape_cast %152 : vector<16x8xf32> to vector<2x8x8xf32>
    %159 = arith.truncf %158 : vector<2x8x8xf32> to vector<2x8x8xbf16>
    %160 = vector.shape_cast %155 : vector<16x8xf32> to vector<2x8x8xf32>
    %161 = arith.truncf %160 : vector<2x8x8xf32> to vector<2x8x8xbf16>
    "tpu.trace_start"() <{level = 10 : i32, message = "bqd,bkd->bqk"}> : () -> ()
    %cst_120 = arith.constant dense<0.000000e+00> : vector<2x8x8xf32>
    %162 = tpu.matmul %157, %159, %cst_120 {dimension_numbers = #tpu.dot_dimension_numbers<[2], [2], [1], [1], [0, 0, 0, 1, 1, 1], [0], [0]>} : vector<2x8x8xbf16>, vector<2x8x8xbf16>, vector<2x8x8xf32> -> vector<2x8x8xf32>
    "tpu.trace_stop"() : () -> ()
    %cst_121 = arith.constant 0.353553385 : f32
    %163 = vector.broadcast %cst_121 : f32 to vector<2x8x8xf32>
    %164 = arith.mulf %162, %163 : vector<2x8x8xf32>
    %165 = arith.addf %164, %5 : vector<2x8x8xf32>
    %cst_122 = arith.constant dense<0xFF800000> : vector<2x8xf32>
    %166 = vector.multi_reduction <maximumf>, %165, %cst_122 [2] : vector<2x8x8xf32> to vector<2x8xf32>
    %167 = vector.shape_cast %166 : vector<2x8xf32> to vector<2x8x1xf32>
    %168 = vector.broadcast %167 : vector<2x8x1xf32> to vector<2x8x8xf32>
    %169 = arith.subf %165, %168 : vector<2x8x8xf32>
    %170 = math.exp %169 : vector<2x8x8xf32>
    %cst_123 = arith.constant dense<0.000000e+00> : vector<2x8xf32>
    %171 = vector.multi_reduction <add>, %170, %cst_123 [2] : vector<2x8x8xf32> to vector<2x8xf32>
    %172 = vector.shape_cast %171 : vector<2x8xf32> to vector<2x8x1xf32>
    %173 = tpu.reciprocal %172 {approx = true} : vector<2x8x1xf32> -> vector<2x8x1xf32>
    %174 = vector.broadcast %173 : vector<2x8x1xf32> to vector<2x8x8xf32>
    %175 = arith.mulf %170, %174 : vector<2x8x8xf32>
    %176 = arith.truncf %175 : vector<2x8x8xf32> to vector<2x8x8xbf16>
    "tpu.trace_start"() <{level = 10 : i32, message = "bqk,bkd->bqd"}> : () -> ()
    %cst_124 = arith.constant dense<0.000000e+00> : vector<2x8x8xf32>
    %177 = tpu.matmul %176, %161, %cst_124 {dimension_numbers = #tpu.dot_dimension_numbers<[2], [1], [1], [2], [0, 0, 0, 1, 1, 2], [0], [0]>} : vector<2x8x8xbf16>, vector<2x8x8xbf16>, vector<2x8x8xf32> -> vector<2x8x8xf32>
    "tpu.trace_stop"() : () -> ()
    %178 = vector.shape_cast %177 : vector<2x8x8xf32> to vector<16x8xf32>
    %179 = arith.truncf %178 : vector<16x8xf32> to vector<16x8xbf16>
    %c0_125 = arith.constant 0 : index
    %c2_126 = arith.constant 2 : index
    %c0_127 = arith.constant 0 : index
    %c0_128 = arith.constant 0 : index
    %180 = vector.load %arg6[%c0_125, %c2_126, %c0_127, %c0_128] : memref<1x8x8x32xbf16, #tpu.memory_space<vmem>>, vector<1x1x8x32xbf16>
    %181 = vector.shape_cast %180 : vector<1x1x8x32xbf16> to vector<8x32xbf16>
    %cst_129 = arith.constant dense<0.000000e+00> : vector<16x32xf32>
    %182 = tpu.matmul %179, %181, %cst_129 {dimension_numbers = #tpu.dot_dimension_numbers<[1], [0], [0], [1], [0, 0, 1, 1], [], []>} : vector<16x8xbf16>, vector<8x32xbf16>, vector<16x32xf32> -> vector<16x32xf32>
    %183 = arith.addf %134, %182 : vector<16x32xf32>
    %c0_130 = arith.constant 0 : index
    %c3 = arith.constant 3 : index
    %c0_131 = arith.constant 0 : index
    %c0_132 = arith.constant 0 : index
    %184 = vector.load %arg5[%c0_130, %c3, %c0_131, %c0_132] : memref<1x24x32x8xbf16, #tpu.memory_space<vmem>>, vector<1x1x32x8xbf16>
    %185 = vector.shape_cast %184 : vector<1x1x32x8xbf16> to vector<32x8xbf16>
    %c0_133 = arith.constant 0 : index
    %c7 = arith.constant 7 : index
    %c0_134 = arith.constant 0 : index
    %c0_135 = arith.constant 0 : index
    %186 = vector.load %arg5[%c0_133, %c7, %c0_134, %c0_135] : memref<1x24x32x8xbf16, #tpu.memory_space<vmem>>, vector<1x1x32x8xbf16>
    %187 = vector.shape_cast %186 : vector<1x1x32x8xbf16> to vector<32x8xbf16>
    %c0_136 = arith.constant 0 : index
    %c11 = arith.constant 11 : index
    %c0_137 = arith.constant 0 : index
    %c0_138 = arith.constant 0 : index
    %188 = vector.load %arg5[%c0_136, %c11, %c0_137, %c0_138] : memref<1x24x32x8xbf16, #tpu.memory_space<vmem>>, vector<1x1x32x8xbf16>
    %189 = vector.shape_cast %188 : vector<1x1x32x8xbf16> to vector<32x8xbf16>
    %c0_139 = arith.constant 0 : index
    %c3_140 = arith.constant 3 : index
    %c0_141 = arith.constant 0 : index
    %c0_142 = arith.constant 0 : index
    %190 = vector.load %arg10[%c0_139, %c3_140, %c0_141, %c0_142] : memref<1x24x1x8xf32, #tpu.memory_space<vmem>>, vector<1x1x1x8xf32>
    %191 = vector.shape_cast %190 : vector<1x1x1x8xf32> to vector<1x8xf32>
    %c0_143 = arith.constant 0 : index
    %c7_144 = arith.constant 7 : index
    %c0_145 = arith.constant 0 : index
    %c0_146 = arith.constant 0 : index
    %192 = vector.load %arg10[%c0_143, %c7_144, %c0_145, %c0_146] : memref<1x24x1x8xf32, #tpu.memory_space<vmem>>, vector<1x1x1x8xf32>
    %193 = vector.shape_cast %192 : vector<1x1x1x8xf32> to vector<1x8xf32>
    %c0_147 = arith.constant 0 : index
    %c11_148 = arith.constant 11 : index
    %c0_149 = arith.constant 0 : index
    %c0_150 = arith.constant 0 : index
    %194 = vector.load %arg10[%c0_147, %c11_148, %c0_149, %c0_150] : memref<1x24x1x8xf32, #tpu.memory_space<vmem>>, vector<1x1x1x8xf32>
    %195 = vector.shape_cast %194 : vector<1x1x1x8xf32> to vector<1x8xf32>
    %cst_151 = arith.constant dense<0.000000e+00> : vector<16x8xf32>
    %196 = tpu.matmul %35, %185, %cst_151 {dimension_numbers = #tpu.dot_dimension_numbers<[1], [0], [0], [1], [0, 0, 1, 1], [], []>} : vector<16x32xbf16>, vector<32x8xbf16>, vector<16x8xf32> -> vector<16x8xf32>
    %197 = vector.broadcast %191 : vector<1x8xf32> to vector<16x8xf32>
    %198 = arith.addf %196, %197 : vector<16x8xf32>
    %cst_152 = arith.constant dense<0.000000e+00> : vector<16x8xf32>
    %199 = tpu.matmul %35, %187, %cst_152 {dimension_numbers = #tpu.dot_dimension_numbers<[1], [0], [0], [1], [0, 0, 1, 1], [], []>} : vector<16x32xbf16>, vector<32x8xbf16>, vector<16x8xf32> -> vector<16x8xf32>
    %200 = vector.broadcast %193 : vector<1x8xf32> to vector<16x8xf32>
    %201 = arith.addf %199, %200 : vector<16x8xf32>
    %cst_153 = arith.constant dense<0.000000e+00> : vector<16x8xf32>
    %202 = tpu.matmul %35, %189, %cst_153 {dimension_numbers = #tpu.dot_dimension_numbers<[1], [0], [0], [1], [0, 0, 1, 1], [], []>} : vector<16x32xbf16>, vector<32x8xbf16>, vector<16x8xf32> -> vector<16x8xf32>
    %203 = vector.broadcast %195 : vector<1x8xf32> to vector<16x8xf32>
    %204 = arith.addf %202, %203 : vector<16x8xf32>
    %205 = vector.shape_cast %198 : vector<16x8xf32> to vector<2x8x8xf32>
    %206 = arith.truncf %205 : vector<2x8x8xf32> to vector<2x8x8xbf16>
    %207 = vector.shape_cast %201 : vector<16x8xf32> to vector<2x8x8xf32>
    %208 = arith.truncf %207 : vector<2x8x8xf32> to vector<2x8x8xbf16>
    %209 = vector.shape_cast %204 : vector<16x8xf32> to vector<2x8x8xf32>
    %210 = arith.truncf %209 : vector<2x8x8xf32> to vector<2x8x8xbf16>
    "tpu.trace_start"() <{level = 10 : i32, message = "bqd,bkd->bqk"}> : () -> ()
    %cst_154 = arith.constant dense<0.000000e+00> : vector<2x8x8xf32>
    %211 = tpu.matmul %206, %208, %cst_154 {dimension_numbers = #tpu.dot_dimension_numbers<[2], [2], [1], [1], [0, 0, 0, 1, 1, 1], [0], [0]>} : vector<2x8x8xbf16>, vector<2x8x8xbf16>, vector<2x8x8xf32> -> vector<2x8x8xf32>
    "tpu.trace_stop"() : () -> ()
    %cst_155 = arith.constant 0.353553385 : f32
    %212 = vector.broadcast %cst_155 : f32 to vector<2x8x8xf32>
    %213 = arith.mulf %211, %212 : vector<2x8x8xf32>
    %214 = arith.addf %213, %5 : vector<2x8x8xf32>
    %cst_156 = arith.constant dense<0xFF800000> : vector<2x8xf32>
    %215 = vector.multi_reduction <maximumf>, %214, %cst_156 [2] : vector<2x8x8xf32> to vector<2x8xf32>
    %216 = vector.shape_cast %215 : vector<2x8xf32> to vector<2x8x1xf32>
    %217 = vector.broadcast %216 : vector<2x8x1xf32> to vector<2x8x8xf32>
    %218 = arith.subf %214, %217 : vector<2x8x8xf32>
    %219 = math.exp %218 : vector<2x8x8xf32>
    %cst_157 = arith.constant dense<0.000000e+00> : vector<2x8xf32>
    %220 = vector.multi_reduction <add>, %219, %cst_157 [2] : vector<2x8x8xf32> to vector<2x8xf32>
    %221 = vector.shape_cast %220 : vector<2x8xf32> to vector<2x8x1xf32>
    %222 = tpu.reciprocal %221 {approx = true} : vector<2x8x1xf32> -> vector<2x8x1xf32>
    %223 = vector.broadcast %222 : vector<2x8x1xf32> to vector<2x8x8xf32>
    %224 = arith.mulf %219, %223 : vector<2x8x8xf32>
    %225 = arith.truncf %224 : vector<2x8x8xf32> to vector<2x8x8xbf16>
    "tpu.trace_start"() <{level = 10 : i32, message = "bqk,bkd->bqd"}> : () -> ()
    %cst_158 = arith.constant dense<0.000000e+00> : vector<2x8x8xf32>
    %226 = tpu.matmul %225, %210, %cst_158 {dimension_numbers = #tpu.dot_dimension_numbers<[2], [1], [1], [2], [0, 0, 0, 1, 1, 2], [0], [0]>} : vector<2x8x8xbf16>, vector<2x8x8xbf16>, vector<2x8x8xf32> -> vector<2x8x8xf32>
    "tpu.trace_stop"() : () -> ()
    %227 = vector.shape_cast %226 : vector<2x8x8xf32> to vector<16x8xf32>
    %228 = arith.truncf %227 : vector<16x8xf32> to vector<16x8xbf16>
    %c0_159 = arith.constant 0 : index
    %c3_160 = arith.constant 3 : index
    %c0_161 = arith.constant 0 : index
    %c0_162 = arith.constant 0 : index
    %229 = vector.load %arg6[%c0_159, %c3_160, %c0_161, %c0_162] : memref<1x8x8x32xbf16, #tpu.memory_space<vmem>>, vector<1x1x8x32xbf16>
    %230 = vector.shape_cast %229 : vector<1x1x8x32xbf16> to vector<8x32xbf16>
    %cst_163 = arith.constant dense<0.000000e+00> : vector<16x32xf32>
    %231 = tpu.matmul %228, %230, %cst_163 {dimension_numbers = #tpu.dot_dimension_numbers<[1], [0], [0], [1], [0, 0, 1, 1], [], []>} : vector<16x8xbf16>, vector<8x32xbf16>, vector<16x32xf32> -> vector<16x32xf32>
    %232 = arith.addf %183, %231 : vector<16x32xf32>
    %233 = vector.broadcast %37 : vector<1x32xf32> to vector<16x32xf32>
    %234 = arith.addf %232, %233 : vector<16x32xf32>
    %235 = arith.addf %3, %234 : vector<16x32xf32>
    %c0_164 = arith.constant 0 : index
    %c2_165 = arith.constant 2 : index
    %c0_166 = arith.constant 0 : index
    %c0_167 = arith.constant 0 : index
    %236 = vector.load %arg9[%c0_164, %c2_165, %c0_166, %c0_167] : memref<1x6x1x32xf32, #tpu.memory_space<vmem>>, vector<1x1x1x32xf32>
    %237 = vector.shape_cast %236 : vector<1x1x1x32xf32> to vector<1x32xf32>
    %c0_168 = arith.constant 0 : index
    %c3_169 = arith.constant 3 : index
    %c0_170 = arith.constant 0 : index
    %c0_171 = arith.constant 0 : index
    %238 = vector.load %arg9[%c0_168, %c3_169, %c0_170, %c0_171] : memref<1x6x1x32xf32, #tpu.memory_space<vmem>>, vector<1x1x1x32xf32>
    %239 = vector.shape_cast %238 : vector<1x1x1x32xf32> to vector<1x32xf32>
    %cst_172 = arith.constant dense<0.000000e+00> : vector<16xf32>
    %240 = vector.multi_reduction <add>, %235, %cst_172 [1] : vector<16x32xf32> to vector<16xf32>
    %241 = vector.shape_cast %240 : vector<16xf32> to vector<16x1xf32>
    %cst_173 = arith.constant 3.200000e+01 : f32
    %242 = vector.broadcast %cst_173 : f32 to vector<16x1xf32>
    %243 = arith.divf %241, %242 : vector<16x1xf32>
    %244 = vector.broadcast %243 : vector<16x1xf32> to vector<16x32xf32>
    %245 = arith.subf %235, %244 : vector<16x32xf32>
    %246 = arith.mulf %245, %245 : vector<16x32xf32>
    %cst_174 = arith.constant dense<0.000000e+00> : vector<16xf32>
    %247 = vector.multi_reduction <add>, %246, %cst_174 [1] : vector<16x32xf32> to vector<16xf32>
    %248 = vector.shape_cast %247 : vector<16xf32> to vector<16x1xf32>
    %cst_175 = arith.constant 0.0322580636 : f32
    %249 = vector.broadcast %cst_175 : f32 to vector<16x1xf32>
    %250 = arith.mulf %248, %249 : vector<16x1xf32>
    %251 = math.sqrt %250 : vector<16x1xf32>
    %cst_176 = arith.constant 9.99999997E-7 : f32
    %252 = vector.broadcast %cst_176 : f32 to vector<16x1xf32>
    %253 = arith.addf %251, %252 : vector<16x1xf32>
    %cst_177 = arith.constant 1.000000e+00 : f32
    %254 = vector.broadcast %cst_177 : f32 to vector<16x1xf32>
    %255 = arith.divf %254, %253 : vector<16x1xf32>
    %256 = vector.broadcast %255 : vector<16x1xf32> to vector<16x32xf32>
    %257 = arith.mulf %245, %256 : vector<16x32xf32>
    %258 = vector.broadcast %237 : vector<1x32xf32> to vector<16x32xf32>
    %259 = arith.mulf %257, %258 : vector<16x32xf32>
    %260 = vector.broadcast %239 : vector<1x32xf32> to vector<16x32xf32>
    %261 = arith.addf %259, %260 : vector<16x32xf32>
    %262 = arith.truncf %261 : vector<16x32xf32> to vector<16x32xbf16>
    %c0_178 = arith.constant 0 : index
    %c1_179 = arith.constant 1 : index
    %c0_180 = arith.constant 0 : index
    %c0_181 = arith.constant 0 : index
    %263 = vector.load %arg11[%c0_178, %c1_179, %c0_180, %c0_181] : memref<1x3x1x32xf32, #tpu.memory_space<vmem>>, vector<1x1x1x32xf32>
    %264 = vector.shape_cast %263 : vector<1x1x1x32xf32> to vector<1x32xf32>
    %c0_182 = arith.constant 0 : index
    %c12 = arith.constant 12 : index
    %c0_183 = arith.constant 0 : index
    %c0_184 = arith.constant 0 : index
    %265 = vector.load %arg5[%c0_182, %c12, %c0_183, %c0_184] : memref<1x24x32x8xbf16, #tpu.memory_space<vmem>>, vector<1x1x32x8xbf16>
    %266 = vector.shape_cast %265 : vector<1x1x32x8xbf16> to vector<32x8xbf16>
    %c0_185 = arith.constant 0 : index
    %c16 = arith.constant 16 : index
    %c0_186 = arith.constant 0 : index
    %c0_187 = arith.constant 0 : index
    %267 = vector.load %arg5[%c0_185, %c16, %c0_186, %c0_187] : memref<1x24x32x8xbf16, #tpu.memory_space<vmem>>, vector<1x1x32x8xbf16>
    %268 = vector.shape_cast %267 : vector<1x1x32x8xbf16> to vector<32x8xbf16>
    %c0_188 = arith.constant 0 : index
    %c20 = arith.constant 20 : index
    %c0_189 = arith.constant 0 : index
    %c0_190 = arith.constant 0 : index
    %269 = vector.load %arg5[%c0_188, %c20, %c0_189, %c0_190] : memref<1x24x32x8xbf16, #tpu.memory_space<vmem>>, vector<1x1x32x8xbf16>
    %270 = vector.shape_cast %269 : vector<1x1x32x8xbf16> to vector<32x8xbf16>
    %c0_191 = arith.constant 0 : index
    %c12_192 = arith.constant 12 : index
    %c0_193 = arith.constant 0 : index
    %c0_194 = arith.constant 0 : index
    %271 = vector.load %arg10[%c0_191, %c12_192, %c0_193, %c0_194] : memref<1x24x1x8xf32, #tpu.memory_space<vmem>>, vector<1x1x1x8xf32>
    %272 = vector.shape_cast %271 : vector<1x1x1x8xf32> to vector<1x8xf32>
    %c0_195 = arith.constant 0 : index
    %c16_196 = arith.constant 16 : index
    %c0_197 = arith.constant 0 : index
    %c0_198 = arith.constant 0 : index
    %273 = vector.load %arg10[%c0_195, %c16_196, %c0_197, %c0_198] : memref<1x24x1x8xf32, #tpu.memory_space<vmem>>, vector<1x1x1x8xf32>
    %274 = vector.shape_cast %273 : vector<1x1x1x8xf32> to vector<1x8xf32>
    %c0_199 = arith.constant 0 : index
    %c20_200 = arith.constant 20 : index
    %c0_201 = arith.constant 0 : index
    %c0_202 = arith.constant 0 : index
    %275 = vector.load %arg10[%c0_199, %c20_200, %c0_201, %c0_202] : memref<1x24x1x8xf32, #tpu.memory_space<vmem>>, vector<1x1x1x8xf32>
    %276 = vector.shape_cast %275 : vector<1x1x1x8xf32> to vector<1x8xf32>
    %cst_203 = arith.constant dense<0.000000e+00> : vector<16x8xf32>
    %277 = tpu.matmul %262, %266, %cst_203 {dimension_numbers = #tpu.dot_dimension_numbers<[1], [0], [0], [1], [0, 0, 1, 1], [], []>} : vector<16x32xbf16>, vector<32x8xbf16>, vector<16x8xf32> -> vector<16x8xf32>
    %278 = vector.broadcast %272 : vector<1x8xf32> to vector<16x8xf32>
    %279 = arith.addf %277, %278 : vector<16x8xf32>
    %cst_204 = arith.constant dense<0.000000e+00> : vector<32x8xf32>
    %280 = tpu.matmul %4, %268, %cst_204 {dimension_numbers = #tpu.dot_dimension_numbers<[1], [0], [0], [1], [0, 0, 1, 1], [], []>} : vector<32x32xbf16>, vector<32x8xbf16>, vector<32x8xf32> -> vector<32x8xf32>
    %281 = vector.broadcast %274 : vector<1x8xf32> to vector<32x8xf32>
    %282 = arith.addf %280, %281 : vector<32x8xf32>
    %cst_205 = arith.constant dense<0.000000e+00> : vector<32x8xf32>
    %283 = tpu.matmul %4, %270, %cst_205 {dimension_numbers = #tpu.dot_dimension_numbers<[1], [0], [0], [1], [0, 0, 1, 1], [], []>} : vector<32x32xbf16>, vector<32x8xbf16>, vector<32x8xf32> -> vector<32x8xf32>
    %284 = vector.broadcast %276 : vector<1x8xf32> to vector<32x8xf32>
    %285 = arith.addf %283, %284 : vector<32x8xf32>
    %286 = vector.shape_cast %279 : vector<16x8xf32> to vector<2x8x8xf32>
    %287 = arith.truncf %286 : vector<2x8x8xf32> to vector<2x8x8xbf16>
    %288 = vector.shape_cast %282 : vector<32x8xf32> to vector<2x16x8xf32>
    %289 = arith.truncf %288 : vector<2x16x8xf32> to vector<2x16x8xbf16>
    %290 = vector.shape_cast %285 : vector<32x8xf32> to vector<2x16x8xf32>
    %291 = arith.truncf %290 : vector<2x16x8xf32> to vector<2x16x8xbf16>
    "tpu.trace_start"() <{level = 10 : i32, message = "bqd,bkd->bqk"}> : () -> ()
    %cst_206 = arith.constant dense<0.000000e+00> : vector<2x8x16xf32>
    %292 = tpu.matmul %287, %289, %cst_206 {dimension_numbers = #tpu.dot_dimension_numbers<[2], [2], [1], [1], [0, 0, 0, 1, 1, 1], [0], [0]>} : vector<2x8x8xbf16>, vector<2x16x8xbf16>, vector<2x8x16xf32> -> vector<2x8x16xf32>
    "tpu.trace_stop"() : () -> ()
    %cst_207 = arith.constant 0.353553385 : f32
    %293 = vector.broadcast %cst_207 : f32 to vector<2x8x16xf32>
    %294 = arith.mulf %292, %293 : vector<2x8x16xf32>
    %295 = arith.addf %294, %8 : vector<2x8x16xf32>
    %cst_208 = arith.constant dense<0xFF800000> : vector<2x8xf32>
    %296 = vector.multi_reduction <maximumf>, %295, %cst_208 [2] : vector<2x8x16xf32> to vector<2x8xf32>
    %297 = vector.shape_cast %296 : vector<2x8xf32> to vector<2x8x1xf32>
    %298 = vector.broadcast %297 : vector<2x8x1xf32> to vector<2x8x16xf32>
    %299 = arith.subf %295, %298 : vector<2x8x16xf32>
    %300 = math.exp %299 : vector<2x8x16xf32>
    %cst_209 = arith.constant dense<0.000000e+00> : vector<2x8xf32>
    %301 = vector.multi_reduction <add>, %300, %cst_209 [2] : vector<2x8x16xf32> to vector<2x8xf32>
    %302 = vector.shape_cast %301 : vector<2x8xf32> to vector<2x8x1xf32>
    %303 = tpu.reciprocal %302 {approx = true} : vector<2x8x1xf32> -> vector<2x8x1xf32>
    %304 = vector.broadcast %303 : vector<2x8x1xf32> to vector<2x8x16xf32>
    %305 = arith.mulf %300, %304 : vector<2x8x16xf32>
    %306 = arith.truncf %305 : vector<2x8x16xf32> to vector<2x8x16xbf16>
    "tpu.trace_start"() <{level = 10 : i32, message = "bqk,bkd->bqd"}> : () -> ()
    %cst_210 = arith.constant dense<0.000000e+00> : vector<2x8x8xf32>
    %307 = tpu.matmul %306, %291, %cst_210 {dimension_numbers = #tpu.dot_dimension_numbers<[2], [1], [1], [2], [0, 0, 0, 1, 1, 2], [0], [0]>} : vector<2x8x16xbf16>, vector<2x16x8xbf16>, vector<2x8x8xf32> -> vector<2x8x8xf32>
    "tpu.trace_stop"() : () -> ()
    %308 = vector.shape_cast %307 : vector<2x8x8xf32> to vector<16x8xf32>
    %309 = arith.truncf %308 : vector<16x8xf32> to vector<16x8xbf16>
    %c0_211 = arith.constant 0 : index
    %c4_212 = arith.constant 4 : index
    %c0_213 = arith.constant 0 : index
    %c0_214 = arith.constant 0 : index
    %310 = vector.load %arg6[%c0_211, %c4_212, %c0_213, %c0_214] : memref<1x8x8x32xbf16, #tpu.memory_space<vmem>>, vector<1x1x8x32xbf16>
    %311 = vector.shape_cast %310 : vector<1x1x8x32xbf16> to vector<8x32xbf16>
    %cst_215 = arith.constant dense<0.000000e+00> : vector<16x32xf32>
    %312 = tpu.matmul %309, %311, %cst_215 {dimension_numbers = #tpu.dot_dimension_numbers<[1], [0], [0], [1], [0, 0, 1, 1], [], []>} : vector<16x8xbf16>, vector<8x32xbf16>, vector<16x32xf32> -> vector<16x32xf32>
    %c0_216 = arith.constant 0 : index
    %c13 = arith.constant 13 : index
    %c0_217 = arith.constant 0 : index
    %c0_218 = arith.constant 0 : index
    %313 = vector.load %arg5[%c0_216, %c13, %c0_217, %c0_218] : memref<1x24x32x8xbf16, #tpu.memory_space<vmem>>, vector<1x1x32x8xbf16>
    %314 = vector.shape_cast %313 : vector<1x1x32x8xbf16> to vector<32x8xbf16>
    %c0_219 = arith.constant 0 : index
    %c17 = arith.constant 17 : index
    %c0_220 = arith.constant 0 : index
    %c0_221 = arith.constant 0 : index
    %315 = vector.load %arg5[%c0_219, %c17, %c0_220, %c0_221] : memref<1x24x32x8xbf16, #tpu.memory_space<vmem>>, vector<1x1x32x8xbf16>
    %316 = vector.shape_cast %315 : vector<1x1x32x8xbf16> to vector<32x8xbf16>
    %c0_222 = arith.constant 0 : index
    %c21 = arith.constant 21 : index
    %c0_223 = arith.constant 0 : index
    %c0_224 = arith.constant 0 : index
    %317 = vector.load %arg5[%c0_222, %c21, %c0_223, %c0_224] : memref<1x24x32x8xbf16, #tpu.memory_space<vmem>>, vector<1x1x32x8xbf16>
    %318 = vector.shape_cast %317 : vector<1x1x32x8xbf16> to vector<32x8xbf16>
    %c0_225 = arith.constant 0 : index
    %c13_226 = arith.constant 13 : index
    %c0_227 = arith.constant 0 : index
    %c0_228 = arith.constant 0 : index
    %319 = vector.load %arg10[%c0_225, %c13_226, %c0_227, %c0_228] : memref<1x24x1x8xf32, #tpu.memory_space<vmem>>, vector<1x1x1x8xf32>
    %320 = vector.shape_cast %319 : vector<1x1x1x8xf32> to vector<1x8xf32>
    %c0_229 = arith.constant 0 : index
    %c17_230 = arith.constant 17 : index
    %c0_231 = arith.constant 0 : index
    %c0_232 = arith.constant 0 : index
    %321 = vector.load %arg10[%c0_229, %c17_230, %c0_231, %c0_232] : memref<1x24x1x8xf32, #tpu.memory_space<vmem>>, vector<1x1x1x8xf32>
    %322 = vector.shape_cast %321 : vector<1x1x1x8xf32> to vector<1x8xf32>
    %c0_233 = arith.constant 0 : index
    %c21_234 = arith.constant 21 : index
    %c0_235 = arith.constant 0 : index
    %c0_236 = arith.constant 0 : index
    %323 = vector.load %arg10[%c0_233, %c21_234, %c0_235, %c0_236] : memref<1x24x1x8xf32, #tpu.memory_space<vmem>>, vector<1x1x1x8xf32>
    %324 = vector.shape_cast %323 : vector<1x1x1x8xf32> to vector<1x8xf32>
    %cst_237 = arith.constant dense<0.000000e+00> : vector<16x8xf32>
    %325 = tpu.matmul %262, %314, %cst_237 {dimension_numbers = #tpu.dot_dimension_numbers<[1], [0], [0], [1], [0, 0, 1, 1], [], []>} : vector<16x32xbf16>, vector<32x8xbf16>, vector<16x8xf32> -> vector<16x8xf32>
    %326 = vector.broadcast %320 : vector<1x8xf32> to vector<16x8xf32>
    %327 = arith.addf %325, %326 : vector<16x8xf32>
    %cst_238 = arith.constant dense<0.000000e+00> : vector<32x8xf32>
    %328 = tpu.matmul %4, %316, %cst_238 {dimension_numbers = #tpu.dot_dimension_numbers<[1], [0], [0], [1], [0, 0, 1, 1], [], []>} : vector<32x32xbf16>, vector<32x8xbf16>, vector<32x8xf32> -> vector<32x8xf32>
    %329 = vector.broadcast %322 : vector<1x8xf32> to vector<32x8xf32>
    %330 = arith.addf %328, %329 : vector<32x8xf32>
    %cst_239 = arith.constant dense<0.000000e+00> : vector<32x8xf32>
    %331 = tpu.matmul %4, %318, %cst_239 {dimension_numbers = #tpu.dot_dimension_numbers<[1], [0], [0], [1], [0, 0, 1, 1], [], []>} : vector<32x32xbf16>, vector<32x8xbf16>, vector<32x8xf32> -> vector<32x8xf32>
    %332 = vector.broadcast %324 : vector<1x8xf32> to vector<32x8xf32>
    %333 = arith.addf %331, %332 : vector<32x8xf32>
    %334 = vector.shape_cast %327 : vector<16x8xf32> to vector<2x8x8xf32>
    %335 = arith.truncf %334 : vector<2x8x8xf32> to vector<2x8x8xbf16>
    %336 = vector.shape_cast %330 : vector<32x8xf32> to vector<2x16x8xf32>
    %337 = arith.truncf %336 : vector<2x16x8xf32> to vector<2x16x8xbf16>
    %338 = vector.shape_cast %333 : vector<32x8xf32> to vector<2x16x8xf32>
    %339 = arith.truncf %338 : vector<2x16x8xf32> to vector<2x16x8xbf16>
    "tpu.trace_start"() <{level = 10 : i32, message = "bqd,bkd->bqk"}> : () -> ()
    %cst_240 = arith.constant dense<0.000000e+00> : vector<2x8x16xf32>
    %340 = tpu.matmul %335, %337, %cst_240 {dimension_numbers = #tpu.dot_dimension_numbers<[2], [2], [1], [1], [0, 0, 0, 1, 1, 1], [0], [0]>} : vector<2x8x8xbf16>, vector<2x16x8xbf16>, vector<2x8x16xf32> -> vector<2x8x16xf32>
    "tpu.trace_stop"() : () -> ()
    %cst_241 = arith.constant 0.353553385 : f32
    %341 = vector.broadcast %cst_241 : f32 to vector<2x8x16xf32>
    %342 = arith.mulf %340, %341 : vector<2x8x16xf32>
    %343 = arith.addf %342, %8 : vector<2x8x16xf32>
    %cst_242 = arith.constant dense<0xFF800000> : vector<2x8xf32>
    %344 = vector.multi_reduction <maximumf>, %343, %cst_242 [2] : vector<2x8x16xf32> to vector<2x8xf32>
    %345 = vector.shape_cast %344 : vector<2x8xf32> to vector<2x8x1xf32>
    %346 = vector.broadcast %345 : vector<2x8x1xf32> to vector<2x8x16xf32>
    %347 = arith.subf %343, %346 : vector<2x8x16xf32>
    %348 = math.exp %347 : vector<2x8x16xf32>
    %cst_243 = arith.constant dense<0.000000e+00> : vector<2x8xf32>
    %349 = vector.multi_reduction <add>, %348, %cst_243 [2] : vector<2x8x16xf32> to vector<2x8xf32>
    %350 = vector.shape_cast %349 : vector<2x8xf32> to vector<2x8x1xf32>
    %351 = tpu.reciprocal %350 {approx = true} : vector<2x8x1xf32> -> vector<2x8x1xf32>
    %352 = vector.broadcast %351 : vector<2x8x1xf32> to vector<2x8x16xf32>
    %353 = arith.mulf %348, %352 : vector<2x8x16xf32>
    %354 = arith.truncf %353 : vector<2x8x16xf32> to vector<2x8x16xbf16>
    "tpu.trace_start"() <{level = 10 : i32, message = "bqk,bkd->bqd"}> : () -> ()
    %cst_244 = arith.constant dense<0.000000e+00> : vector<2x8x8xf32>
    %355 = tpu.matmul %354, %339, %cst_244 {dimension_numbers = #tpu.dot_dimension_numbers<[2], [1], [1], [2], [0, 0, 0, 1, 1, 2], [0], [0]>} : vector<2x8x16xbf16>, vector<2x16x8xbf16>, vector<2x8x8xf32> -> vector<2x8x8xf32>
    "tpu.trace_stop"() : () -> ()
    %356 = vector.shape_cast %355 : vector<2x8x8xf32> to vector<16x8xf32>
    %357 = arith.truncf %356 : vector<16x8xf32> to vector<16x8xbf16>
    %c0_245 = arith.constant 0 : index
    %c5_246 = arith.constant 5 : index
    %c0_247 = arith.constant 0 : index
    %c0_248 = arith.constant 0 : index
    %358 = vector.load %arg6[%c0_245, %c5_246, %c0_247, %c0_248] : memref<1x8x8x32xbf16, #tpu.memory_space<vmem>>, vector<1x1x8x32xbf16>
    %359 = vector.shape_cast %358 : vector<1x1x8x32xbf16> to vector<8x32xbf16>
    %cst_249 = arith.constant dense<0.000000e+00> : vector<16x32xf32>
    %360 = tpu.matmul %357, %359, %cst_249 {dimension_numbers = #tpu.dot_dimension_numbers<[1], [0], [0], [1], [0, 0, 1, 1], [], []>} : vector<16x8xbf16>, vector<8x32xbf16>, vector<16x32xf32> -> vector<16x32xf32>
    %361 = arith.addf %312, %360 : vector<16x32xf32>
    %c0_250 = arith.constant 0 : index
    %c14 = arith.constant 14 : index
    %c0_251 = arith.constant 0 : index
    %c0_252 = arith.constant 0 : index
    %362 = vector.load %arg5[%c0_250, %c14, %c0_251, %c0_252] : memref<1x24x32x8xbf16, #tpu.memory_space<vmem>>, vector<1x1x32x8xbf16>
    %363 = vector.shape_cast %362 : vector<1x1x32x8xbf16> to vector<32x8xbf16>
    %c0_253 = arith.constant 0 : index
    %c18 = arith.constant 18 : index
    %c0_254 = arith.constant 0 : index
    %c0_255 = arith.constant 0 : index
    %364 = vector.load %arg5[%c0_253, %c18, %c0_254, %c0_255] : memref<1x24x32x8xbf16, #tpu.memory_space<vmem>>, vector<1x1x32x8xbf16>
    %365 = vector.shape_cast %364 : vector<1x1x32x8xbf16> to vector<32x8xbf16>
    %c0_256 = arith.constant 0 : index
    %c22 = arith.constant 22 : index
    %c0_257 = arith.constant 0 : index
    %c0_258 = arith.constant 0 : index
    %366 = vector.load %arg5[%c0_256, %c22, %c0_257, %c0_258] : memref<1x24x32x8xbf16, #tpu.memory_space<vmem>>, vector<1x1x32x8xbf16>
    %367 = vector.shape_cast %366 : vector<1x1x32x8xbf16> to vector<32x8xbf16>
    %c0_259 = arith.constant 0 : index
    %c14_260 = arith.constant 14 : index
    %c0_261 = arith.constant 0 : index
    %c0_262 = arith.constant 0 : index
    %368 = vector.load %arg10[%c0_259, %c14_260, %c0_261, %c0_262] : memref<1x24x1x8xf32, #tpu.memory_space<vmem>>, vector<1x1x1x8xf32>
    %369 = vector.shape_cast %368 : vector<1x1x1x8xf32> to vector<1x8xf32>
    %c0_263 = arith.constant 0 : index
    %c18_264 = arith.constant 18 : index
    %c0_265 = arith.constant 0 : index
    %c0_266 = arith.constant 0 : index
    %370 = vector.load %arg10[%c0_263, %c18_264, %c0_265, %c0_266] : memref<1x24x1x8xf32, #tpu.memory_space<vmem>>, vector<1x1x1x8xf32>
    %371 = vector.shape_cast %370 : vector<1x1x1x8xf32> to vector<1x8xf32>
    %c0_267 = arith.constant 0 : index
    %c22_268 = arith.constant 22 : index
    %c0_269 = arith.constant 0 : index
    %c0_270 = arith.constant 0 : index
    %372 = vector.load %arg10[%c0_267, %c22_268, %c0_269, %c0_270] : memref<1x24x1x8xf32, #tpu.memory_space<vmem>>, vector<1x1x1x8xf32>
    %373 = vector.shape_cast %372 : vector<1x1x1x8xf32> to vector<1x8xf32>
    %cst_271 = arith.constant dense<0.000000e+00> : vector<16x8xf32>
    %374 = tpu.matmul %262, %363, %cst_271 {dimension_numbers = #tpu.dot_dimension_numbers<[1], [0], [0], [1], [0, 0, 1, 1], [], []>} : vector<16x32xbf16>, vector<32x8xbf16>, vector<16x8xf32> -> vector<16x8xf32>
    %375 = vector.broadcast %369 : vector<1x8xf32> to vector<16x8xf32>
    %376 = arith.addf %374, %375 : vector<16x8xf32>
    %cst_272 = arith.constant dense<0.000000e+00> : vector<32x8xf32>
    %377 = tpu.matmul %4, %365, %cst_272 {dimension_numbers = #tpu.dot_dimension_numbers<[1], [0], [0], [1], [0, 0, 1, 1], [], []>} : vector<32x32xbf16>, vector<32x8xbf16>, vector<32x8xf32> -> vector<32x8xf32>
    %378 = vector.broadcast %371 : vector<1x8xf32> to vector<32x8xf32>
    %379 = arith.addf %377, %378 : vector<32x8xf32>
    %cst_273 = arith.constant dense<0.000000e+00> : vector<32x8xf32>
    %380 = tpu.matmul %4, %367, %cst_273 {dimension_numbers = #tpu.dot_dimension_numbers<[1], [0], [0], [1], [0, 0, 1, 1], [], []>} : vector<32x32xbf16>, vector<32x8xbf16>, vector<32x8xf32> -> vector<32x8xf32>
    %381 = vector.broadcast %373 : vector<1x8xf32> to vector<32x8xf32>
    %382 = arith.addf %380, %381 : vector<32x8xf32>
    %383 = vector.shape_cast %376 : vector<16x8xf32> to vector<2x8x8xf32>
    %384 = arith.truncf %383 : vector<2x8x8xf32> to vector<2x8x8xbf16>
    %385 = vector.shape_cast %379 : vector<32x8xf32> to vector<2x16x8xf32>
    %386 = arith.truncf %385 : vector<2x16x8xf32> to vector<2x16x8xbf16>
    %387 = vector.shape_cast %382 : vector<32x8xf32> to vector<2x16x8xf32>
    %388 = arith.truncf %387 : vector<2x16x8xf32> to vector<2x16x8xbf16>
    "tpu.trace_start"() <{level = 10 : i32, message = "bqd,bkd->bqk"}> : () -> ()
    %cst_274 = arith.constant dense<0.000000e+00> : vector<2x8x16xf32>
    %389 = tpu.matmul %384, %386, %cst_274 {dimension_numbers = #tpu.dot_dimension_numbers<[2], [2], [1], [1], [0, 0, 0, 1, 1, 1], [0], [0]>} : vector<2x8x8xbf16>, vector<2x16x8xbf16>, vector<2x8x16xf32> -> vector<2x8x16xf32>
    "tpu.trace_stop"() : () -> ()
    %cst_275 = arith.constant 0.353553385 : f32
    %390 = vector.broadcast %cst_275 : f32 to vector<2x8x16xf32>
    %391 = arith.mulf %389, %390 : vector<2x8x16xf32>
    %392 = arith.addf %391, %8 : vector<2x8x16xf32>
    %cst_276 = arith.constant dense<0xFF800000> : vector<2x8xf32>
    %393 = vector.multi_reduction <maximumf>, %392, %cst_276 [2] : vector<2x8x16xf32> to vector<2x8xf32>
    %394 = vector.shape_cast %393 : vector<2x8xf32> to vector<2x8x1xf32>
    %395 = vector.broadcast %394 : vector<2x8x1xf32> to vector<2x8x16xf32>
    %396 = arith.subf %392, %395 : vector<2x8x16xf32>
    %397 = math.exp %396 : vector<2x8x16xf32>
    %cst_277 = arith.constant dense<0.000000e+00> : vector<2x8xf32>
    %398 = vector.multi_reduction <add>, %397, %cst_277 [2] : vector<2x8x16xf32> to vector<2x8xf32>
    %399 = vector.shape_cast %398 : vector<2x8xf32> to vector<2x8x1xf32>
    %400 = tpu.reciprocal %399 {approx = true} : vector<2x8x1xf32> -> vector<2x8x1xf32>
    %401 = vector.broadcast %400 : vector<2x8x1xf32> to vector<2x8x16xf32>
    %402 = arith.mulf %397, %401 : vector<2x8x16xf32>
    %403 = arith.truncf %402 : vector<2x8x16xf32> to vector<2x8x16xbf16>
    "tpu.trace_start"() <{level = 10 : i32, message = "bqk,bkd->bqd"}> : () -> ()
    %cst_278 = arith.constant dense<0.000000e+00> : vector<2x8x8xf32>
    %404 = tpu.matmul %403, %388, %cst_278 {dimension_numbers = #tpu.dot_dimension_numbers<[2], [1], [1], [2], [0, 0, 0, 1, 1, 2], [0], [0]>} : vector<2x8x16xbf16>, vector<2x16x8xbf16>, vector<2x8x8xf32> -> vector<2x8x8xf32>
    "tpu.trace_stop"() : () -> ()
    %405 = vector.shape_cast %404 : vector<2x8x8xf32> to vector<16x8xf32>
    %406 = arith.truncf %405 : vector<16x8xf32> to vector<16x8xbf16>
    %c0_279 = arith.constant 0 : index
    %c6_280 = arith.constant 6 : index
    %c0_281 = arith.constant 0 : index
    %c0_282 = arith.constant 0 : index
    %407 = vector.load %arg6[%c0_279, %c6_280, %c0_281, %c0_282] : memref<1x8x8x32xbf16, #tpu.memory_space<vmem>>, vector<1x1x8x32xbf16>
    %408 = vector.shape_cast %407 : vector<1x1x8x32xbf16> to vector<8x32xbf16>
    %cst_283 = arith.constant dense<0.000000e+00> : vector<16x32xf32>
    %409 = tpu.matmul %406, %408, %cst_283 {dimension_numbers = #tpu.dot_dimension_numbers<[1], [0], [0], [1], [0, 0, 1, 1], [], []>} : vector<16x8xbf16>, vector<8x32xbf16>, vector<16x32xf32> -> vector<16x32xf32>
    %410 = arith.addf %361, %409 : vector<16x32xf32>
    %c0_284 = arith.constant 0 : index
    %c15 = arith.constant 15 : index
    %c0_285 = arith.constant 0 : index
    %c0_286 = arith.constant 0 : index
    %411 = vector.load %arg5[%c0_284, %c15, %c0_285, %c0_286] : memref<1x24x32x8xbf16, #tpu.memory_space<vmem>>, vector<1x1x32x8xbf16>
    %412 = vector.shape_cast %411 : vector<1x1x32x8xbf16> to vector<32x8xbf16>
    %c0_287 = arith.constant 0 : index
    %c19 = arith.constant 19 : index
    %c0_288 = arith.constant 0 : index
    %c0_289 = arith.constant 0 : index
    %413 = vector.load %arg5[%c0_287, %c19, %c0_288, %c0_289] : memref<1x24x32x8xbf16, #tpu.memory_space<vmem>>, vector<1x1x32x8xbf16>
    %414 = vector.shape_cast %413 : vector<1x1x32x8xbf16> to vector<32x8xbf16>
    %c0_290 = arith.constant 0 : index
    %c23 = arith.constant 23 : index
    %c0_291 = arith.constant 0 : index
    %c0_292 = arith.constant 0 : index
    %415 = vector.load %arg5[%c0_290, %c23, %c0_291, %c0_292] : memref<1x24x32x8xbf16, #tpu.memory_space<vmem>>, vector<1x1x32x8xbf16>
    %416 = vector.shape_cast %415 : vector<1x1x32x8xbf16> to vector<32x8xbf16>
    %c0_293 = arith.constant 0 : index
    %c15_294 = arith.constant 15 : index
    %c0_295 = arith.constant 0 : index
    %c0_296 = arith.constant 0 : index
    %417 = vector.load %arg10[%c0_293, %c15_294, %c0_295, %c0_296] : memref<1x24x1x8xf32, #tpu.memory_space<vmem>>, vector<1x1x1x8xf32>
    %418 = vector.shape_cast %417 : vector<1x1x1x8xf32> to vector<1x8xf32>
    %c0_297 = arith.constant 0 : index
    %c19_298 = arith.constant 19 : index
    %c0_299 = arith.constant 0 : index
    %c0_300 = arith.constant 0 : index
    %419 = vector.load %arg10[%c0_297, %c19_298, %c0_299, %c0_300] : memref<1x24x1x8xf32, #tpu.memory_space<vmem>>, vector<1x1x1x8xf32>
    %420 = vector.shape_cast %419 : vector<1x1x1x8xf32> to vector<1x8xf32>
    %c0_301 = arith.constant 0 : index
    %c23_302 = arith.constant 23 : index
    %c0_303 = arith.constant 0 : index
    %c0_304 = arith.constant 0 : index
    %421 = vector.load %arg10[%c0_301, %c23_302, %c0_303, %c0_304] : memref<1x24x1x8xf32, #tpu.memory_space<vmem>>, vector<1x1x1x8xf32>
    %422 = vector.shape_cast %421 : vector<1x1x1x8xf32> to vector<1x8xf32>
    %cst_305 = arith.constant dense<0.000000e+00> : vector<16x8xf32>
    %423 = tpu.matmul %262, %412, %cst_305 {dimension_numbers = #tpu.dot_dimension_numbers<[1], [0], [0], [1], [0, 0, 1, 1], [], []>} : vector<16x32xbf16>, vector<32x8xbf16>, vector<16x8xf32> -> vector<16x8xf32>
    %424 = vector.broadcast %418 : vector<1x8xf32> to vector<16x8xf32>
    %425 = arith.addf %423, %424 : vector<16x8xf32>
    %cst_306 = arith.constant dense<0.000000e+00> : vector<32x8xf32>
    %426 = tpu.matmul %4, %414, %cst_306 {dimension_numbers = #tpu.dot_dimension_numbers<[1], [0], [0], [1], [0, 0, 1, 1], [], []>} : vector<32x32xbf16>, vector<32x8xbf16>, vector<32x8xf32> -> vector<32x8xf32>
    %427 = vector.broadcast %420 : vector<1x8xf32> to vector<32x8xf32>
    %428 = arith.addf %426, %427 : vector<32x8xf32>
    %cst_307 = arith.constant dense<0.000000e+00> : vector<32x8xf32>
    %429 = tpu.matmul %4, %416, %cst_307 {dimension_numbers = #tpu.dot_dimension_numbers<[1], [0], [0], [1], [0, 0, 1, 1], [], []>} : vector<32x32xbf16>, vector<32x8xbf16>, vector<32x8xf32> -> vector<32x8xf32>
    %430 = vector.broadcast %422 : vector<1x8xf32> to vector<32x8xf32>
    %431 = arith.addf %429, %430 : vector<32x8xf32>
    %432 = vector.shape_cast %425 : vector<16x8xf32> to vector<2x8x8xf32>
    %433 = arith.truncf %432 : vector<2x8x8xf32> to vector<2x8x8xbf16>
    %434 = vector.shape_cast %428 : vector<32x8xf32> to vector<2x16x8xf32>
    %435 = arith.truncf %434 : vector<2x16x8xf32> to vector<2x16x8xbf16>
    %436 = vector.shape_cast %431 : vector<32x8xf32> to vector<2x16x8xf32>
    %437 = arith.truncf %436 : vector<2x16x8xf32> to vector<2x16x8xbf16>
    "tpu.trace_start"() <{level = 10 : i32, message = "bqd,bkd->bqk"}> : () -> ()
    %cst_308 = arith.constant dense<0.000000e+00> : vector<2x8x16xf32>
    %438 = tpu.matmul %433, %435, %cst_308 {dimension_numbers = #tpu.dot_dimension_numbers<[2], [2], [1], [1], [0, 0, 0, 1, 1, 1], [0], [0]>} : vector<2x8x8xbf16>, vector<2x16x8xbf16>, vector<2x8x16xf32> -> vector<2x8x16xf32>
    "tpu.trace_stop"() : () -> ()
    %cst_309 = arith.constant 0.353553385 : f32
    %439 = vector.broadcast %cst_309 : f32 to vector<2x8x16xf32>
    %440 = arith.mulf %438, %439 : vector<2x8x16xf32>
    %441 = arith.addf %440, %8 : vector<2x8x16xf32>
    %cst_310 = arith.constant dense<0xFF800000> : vector<2x8xf32>
    %442 = vector.multi_reduction <maximumf>, %441, %cst_310 [2] : vector<2x8x16xf32> to vector<2x8xf32>
    %443 = vector.shape_cast %442 : vector<2x8xf32> to vector<2x8x1xf32>
    %444 = vector.broadcast %443 : vector<2x8x1xf32> to vector<2x8x16xf32>
    %445 = arith.subf %441, %444 : vector<2x8x16xf32>
    %446 = math.exp %445 : vector<2x8x16xf32>
    %cst_311 = arith.constant dense<0.000000e+00> : vector<2x8xf32>
    %447 = vector.multi_reduction <add>, %446, %cst_311 [2] : vector<2x8x16xf32> to vector<2x8xf32>
    %448 = vector.shape_cast %447 : vector<2x8xf32> to vector<2x8x1xf32>
    %449 = tpu.reciprocal %448 {approx = true} : vector<2x8x1xf32> -> vector<2x8x1xf32>
    %450 = vector.broadcast %449 : vector<2x8x1xf32> to vector<2x8x16xf32>
    %451 = arith.mulf %446, %450 : vector<2x8x16xf32>
    %452 = arith.truncf %451 : vector<2x8x16xf32> to vector<2x8x16xbf16>
    "tpu.trace_start"() <{level = 10 : i32, message = "bqk,bkd->bqd"}> : () -> ()
    %cst_312 = arith.constant dense<0.000000e+00> : vector<2x8x8xf32>
    %453 = tpu.matmul %452, %437, %cst_312 {dimension_numbers = #tpu.dot_dimension_numbers<[2], [1], [1], [2], [0, 0, 0, 1, 1, 2], [0], [0]>} : vector<2x8x16xbf16>, vector<2x16x8xbf16>, vector<2x8x8xf32> -> vector<2x8x8xf32>
    "tpu.trace_stop"() : () -> ()
    %454 = vector.shape_cast %453 : vector<2x8x8xf32> to vector<16x8xf32>
    %455 = arith.truncf %454 : vector<16x8xf32> to vector<16x8xbf16>
    %c0_313 = arith.constant 0 : index
    %c7_314 = arith.constant 7 : index
    %c0_315 = arith.constant 0 : index
    %c0_316 = arith.constant 0 : index
    %456 = vector.load %arg6[%c0_313, %c7_314, %c0_315, %c0_316] : memref<1x8x8x32xbf16, #tpu.memory_space<vmem>>, vector<1x1x8x32xbf16>
    %457 = vector.shape_cast %456 : vector<1x1x8x32xbf16> to vector<8x32xbf16>
    %cst_317 = arith.constant dense<0.000000e+00> : vector<16x32xf32>
    %458 = tpu.matmul %455, %457, %cst_317 {dimension_numbers = #tpu.dot_dimension_numbers<[1], [0], [0], [1], [0, 0, 1, 1], [], []>} : vector<16x8xbf16>, vector<8x32xbf16>, vector<16x32xf32> -> vector<16x32xf32>
    %459 = arith.addf %410, %458 : vector<16x32xf32>
    %460 = vector.broadcast %264 : vector<1x32xf32> to vector<16x32xf32>
    %461 = arith.addf %459, %460 : vector<16x32xf32>
    %462 = arith.addf %235, %461 : vector<16x32xf32>
    %c0_318 = arith.constant 0 : index
    %c4_319 = arith.constant 4 : index
    %c0_320 = arith.constant 0 : index
    %c0_321 = arith.constant 0 : index
    %463 = vector.load %arg9[%c0_318, %c4_319, %c0_320, %c0_321] : memref<1x6x1x32xf32, #tpu.memory_space<vmem>>, vector<1x1x1x32xf32>
    %464 = vector.shape_cast %463 : vector<1x1x1x32xf32> to vector<1x32xf32>
    %c0_322 = arith.constant 0 : index
    %c5_323 = arith.constant 5 : index
    %c0_324 = arith.constant 0 : index
    %c0_325 = arith.constant 0 : index
    %465 = vector.load %arg9[%c0_322, %c5_323, %c0_324, %c0_325] : memref<1x6x1x32xf32, #tpu.memory_space<vmem>>, vector<1x1x1x32xf32>
    %466 = vector.shape_cast %465 : vector<1x1x1x32xf32> to vector<1x32xf32>
    %cst_326 = arith.constant dense<0.000000e+00> : vector<16xf32>
    %467 = vector.multi_reduction <add>, %462, %cst_326 [1] : vector<16x32xf32> to vector<16xf32>
    %468 = vector.shape_cast %467 : vector<16xf32> to vector<16x1xf32>
    %cst_327 = arith.constant 3.200000e+01 : f32
    %469 = vector.broadcast %cst_327 : f32 to vector<16x1xf32>
    %470 = arith.divf %468, %469 : vector<16x1xf32>
    %471 = vector.broadcast %470 : vector<16x1xf32> to vector<16x32xf32>
    %472 = arith.subf %462, %471 : vector<16x32xf32>
    %473 = arith.mulf %472, %472 : vector<16x32xf32>
    %cst_328 = arith.constant dense<0.000000e+00> : vector<16xf32>
    %474 = vector.multi_reduction <add>, %473, %cst_328 [1] : vector<16x32xf32> to vector<16xf32>
    %475 = vector.shape_cast %474 : vector<16xf32> to vector<16x1xf32>
    %cst_329 = arith.constant 0.0322580636 : f32
    %476 = vector.broadcast %cst_329 : f32 to vector<16x1xf32>
    %477 = arith.mulf %475, %476 : vector<16x1xf32>
    %478 = math.sqrt %477 : vector<16x1xf32>
    %cst_330 = arith.constant 9.99999997E-7 : f32
    %479 = vector.broadcast %cst_330 : f32 to vector<16x1xf32>
    %480 = arith.addf %478, %479 : vector<16x1xf32>
    %cst_331 = arith.constant 1.000000e+00 : f32
    %481 = vector.broadcast %cst_331 : f32 to vector<16x1xf32>
    %482 = arith.divf %481, %480 : vector<16x1xf32>
    %483 = vector.broadcast %482 : vector<16x1xf32> to vector<16x32xf32>
    %484 = arith.mulf %472, %483 : vector<16x32xf32>
    %485 = vector.broadcast %464 : vector<1x32xf32> to vector<16x32xf32>
    %486 = arith.mulf %484, %485 : vector<16x32xf32>
    %487 = vector.broadcast %466 : vector<1x32xf32> to vector<16x32xf32>
    %488 = arith.addf %486, %487 : vector<16x32xf32>
    %489 = arith.truncf %488 : vector<16x32xf32> to vector<16x32xbf16>
    %c0_332 = arith.constant 0 : index
    %c0_333 = arith.constant 0 : index
    %c0_334 = arith.constant 0 : index
    %490 = vector.load %arg7[%c0_332, %c0_333, %c0_334] : memref<1x32x128xbf16, #tpu.memory_space<vmem>>, vector<1x32x128xbf16>
    %491 = vector.shape_cast %490 : vector<1x32x128xbf16> to vector<32x128xbf16>
    %cst_335 = arith.constant dense<0.000000e+00> : vector<16x128xf32>
    %492 = tpu.matmul %489, %491, %cst_335 {dimension_numbers = #tpu.dot_dimension_numbers<[1], [0], [0], [1], [0, 0, 1, 1], [], []>} : vector<16x32xbf16>, vector<32x128xbf16>, vector<16x128xf32> -> vector<16x128xf32>
    %c0_336 = arith.constant 0 : index
    %c0_337 = arith.constant 0 : index
    %c0_338 = arith.constant 0 : index
    %493 = vector.load %arg12[%c0_336, %c0_337, %c0_338] : memref<1x1x128xf32, #tpu.memory_space<vmem>>, vector<1x1x128xf32>
    %494 = vector.shape_cast %493 : vector<1x1x128xf32> to vector<1x128xf32>
    %495 = vector.broadcast %494 : vector<1x128xf32> to vector<16x128xf32>
    %496 = arith.addf %492, %495 : vector<16x128xf32>
    %cst_339 = arith.constant 0.000000e+00 : f32
    %497 = vector.broadcast %cst_339 : f32 to vector<16x128xf32>
    %498 = arith.maximumf %496, %497 : vector<16x128xf32>
    %499 = arith.truncf %498 : vector<16x128xf32> to vector<16x128xbf16>
    %c0_340 = arith.constant 0 : index
    %c0_341 = arith.constant 0 : index
    %c0_342 = arith.constant 0 : index
    %500 = vector.load %arg8[%c0_340, %c0_341, %c0_342] : memref<1x128x32xbf16, #tpu.memory_space<vmem>>, vector<1x128x32xbf16>
    %501 = vector.shape_cast %500 : vector<1x128x32xbf16> to vector<128x32xbf16>
    %cst_343 = arith.constant dense<0.000000e+00> : vector<16x32xf32>
    %502 = tpu.matmul %499, %501, %cst_343 {dimension_numbers = #tpu.dot_dimension_numbers<[1], [0], [0], [1], [0, 0, 1, 1], [], []>} : vector<16x128xbf16>, vector<128x32xbf16>, vector<16x32xf32> -> vector<16x32xf32>
    %503 = arith.addf %462, %502 : vector<16x32xf32>
    %c0_344 = arith.constant 0 : index
    %c2_345 = arith.constant 2 : index
    %c0_346 = arith.constant 0 : index
    %c0_347 = arith.constant 0 : index
    %504 = vector.load %arg11[%c0_344, %c2_345, %c0_346, %c0_347] : memref<1x3x1x32xf32, #tpu.memory_space<vmem>>, vector<1x1x1x32xf32>
    %505 = vector.shape_cast %504 : vector<1x1x1x32xf32> to vector<1x32xf32>
    %506 = vector.broadcast %505 : vector<1x32xf32> to vector<16x32xf32>
    %507 = arith.addf %503, %506 : vector<16x32xf32>
    %c0_348 = arith.constant 0 : index
    %c0_349 = arith.constant 0 : index
    %508 = vector.load %arg15[%c0_348, %c0_349] : memref<16x32xf32, #tpu.memory_space<vmem>>, vector<16x32xf32>
    tpu.vector_store %arg15[%c0_348, %c0_349], %507 {strides = array<i32>} : memref<16x32xf32, #tpu.memory_space<vmem>>, vector<16x32xf32>,
    %c1_i32 = arith.constant 1 : i32
    %509 = arith.cmpi eq, %arg0, %c1_i32 : i32
    %510 = arith.extui %509 : i1 to i32
    %c0_i32_350 = arith.constant 0 : i32
    %511 = arith.cmpi ne, %510, %c0_i32_350 : i32
    scf.if %511 {
      %c0_351 = arith.constant 0 : index
      %c0_352 = arith.constant 0 : index
      %c0_353 = arith.constant 0 : index
      %512 = vector.load %arg13[%c0_351, %c0_352, %c0_353] : memref<2x1x32xf32, #tpu.memory_space<vmem>>, vector<1x1x32xf32>
      %513 = vector.shape_cast %512 : vector<1x1x32xf32> to vector<1x32xf32>
      %c1_354 = arith.constant 1 : index
      %c0_355 = arith.constant 0 : index
      %c0_356 = arith.constant 0 : index
      %514 = vector.load %arg13[%c1_354, %c0_355, %c0_356] : memref<2x1x32xf32, #tpu.memory_space<vmem>>, vector<1x1x32xf32>
      %515 = vector.shape_cast %514 : vector<1x1x32xf32> to vector<1x32xf32>
      %cst_357 = arith.constant dense<0.000000e+00> : vector<16xf32>
      %516 = vector.multi_reduction <add>, %507, %cst_357 [1] : vector<16x32xf32> to vector<16xf32>
      %517 = vector.shape_cast %516 : vector<16xf32> to vector<16x1xf32>
      %cst_358 = arith.constant 3.200000e+01 : f32
      %518 = vector.broadcast %cst_358 : f32 to vector<16x1xf32>
      %519 = arith.divf %517, %518 : vector<16x1xf32>
      %520 = vector.broadcast %519 : vector<16x1xf32> to vector<16x32xf32>
      %521 = arith.subf %507, %520 : vector<16x32xf32>
      %522 = arith.mulf %521, %521 : vector<16x32xf32>
      %cst_359 = arith.constant dense<0.000000e+00> : vector<16xf32>
      %523 = vector.multi_reduction <add>, %522, %cst_359 [1] : vector<16x32xf32> to vector<16xf32>
      %524 = vector.shape_cast %523 : vector<16xf32> to vector<16x1xf32>
      %cst_360 = arith.constant 0.0322580636 : f32
      %525 = vector.broadcast %cst_360 : f32 to vector<16x1xf32>
      %526 = arith.mulf %524, %525 : vector<16x1xf32>
      %527 = math.sqrt %526 : vector<16x1xf32>
      %cst_361 = arith.constant 9.99999997E-7 : f32
      %528 = vector.broadcast %cst_361 : f32 to vector<16x1xf32>
      %529 = arith.addf %527, %528 : vector<16x1xf32>
      %cst_362 = arith.constant 1.000000e+00 : f32
      %530 = vector.broadcast %cst_362 : f32 to vector<16x1xf32>
      %531 = arith.divf %530, %529 : vector<16x1xf32>
      %532 = vector.broadcast %531 : vector<16x1xf32> to vector<16x32xf32>
      %533 = arith.mulf %521, %532 : vector<16x32xf32>
      %534 = vector.broadcast %513 : vector<1x32xf32> to vector<16x32xf32>
      %535 = arith.mulf %533, %534 : vector<16x32xf32>
      %536 = vector.broadcast %515 : vector<1x32xf32> to vector<16x32xf32>
      %537 = arith.addf %535, %536 : vector<16x32xf32>
      %c0_363 = arith.constant 0 : index
      %c0_364 = arith.constant 0 : index
      %538 = vector.load %arg14[%c0_363, %c0_364] : memref<16x32xf32, #tpu.memory_space<vmem>>, vector<16x32xf32>
      tpu.vector_store %arg14[%c0_363, %c0_364], %537 {strides = array<i32>} : memref<16x32xf32, #tpu.memory_space<vmem>>, vector<16x32xf32>,
    } else {
    }
    return
  }
  func.func @transform_0(%arg0: i32) -> (i32, i32) {
    %c0_i32 = arith.constant 0 : i32
    %c0_i32_0 = arith.constant 0 : i32
    %c0_i32_1 = arith.constant 0 : i32
    return %c0_i32, %c0_i32_0 : i32, i32
  }
  func.func @transform_1(%arg0: i32) -> (i32, i32) {
    %c0_i32 = arith.constant 0 : i32
    %c0_i32_0 = arith.constant 0 : i32
    %c0_i32_1 = arith.constant 0 : i32
    return %c0_i32, %c0_i32_0 : i32, i32
  }
  func.func @transform_2(%arg0: i32) -> (i32, i32, i32) {
    %c0_i32 = arith.constant 0 : i32
    %c0_i32_0 = arith.constant 0 : i32
    %c0_i32_1 = arith.constant 0 : i32
    %c0_i32_2 = arith.constant 0 : i32
    return %c0_i32, %c0_i32_0, %c0_i32_1 : i32, i32, i32
  }
  func.func @transform_3(%arg0: i32) -> (i32, i32, i32) {
    %c0_i32 = arith.constant 0 : i32
    %c0_i32_0 = arith.constant 0 : i32
    %c0_i32_1 = arith.constant 0 : i32
    %c0_i32_2 = arith.constant 0 : i32
    return %c0_i32, %c0_i32_0, %c0_i32_1 : i32, i32, i32
  }
  func.func @transform_4(%arg0: i32) -> (i32, i32, i32, i32) {
    %c0_i32 = arith.constant 0 : i32
    %c0_i32_0 = arith.constant 0 : i32
    %c0_i32_1 = arith.constant 0 : i32
    %c0_i32_2 = arith.constant 0 : i32
    return %arg0, %c0_i32, %c0_i32_0, %c0_i32_1 : i32, i32, i32, i32
  }
  func.func @transform_5(%arg0: i32) -> (i32, i32, i32, i32) {
    %c0_i32 = arith.constant 0 : i32
    %c0_i32_0 = arith.constant 0 : i32
    %c0_i32_1 = arith.constant 0 : i32
    %c0_i32_2 = arith.constant 0 : i32
    return %arg0, %c0_i32, %c0_i32_0, %c0_i32_1 : i32, i32, i32, i32
  }
  func.func @transform_6(%arg0: i32) -> (i32, i32, i32) {
    %c0_i32 = arith.constant 0 : i32
    %c0_i32_0 = arith.constant 0 : i32
    %c0_i32_1 = arith.constant 0 : i32
    return %arg0, %c0_i32, %c0_i32_0 : i32, i32, i32
  }
  func.func @transform_7(%arg0: i32) -> (i32, i32, i32) {
    %c0_i32 = arith.constant 0 : i32
    %c0_i32_0 = arith.constant 0 : i32
    %c0_i32_1 = arith.constant 0 : i32
    return %arg0, %c0_i32, %c0_i32_0 : i32, i32, i32
  }
  func.func @transform_8(%arg0: i32) -> (i32, i32, i32, i32) {
    %c0_i32 = arith.constant 0 : i32
    %c0_i32_0 = arith.constant 0 : i32
    %c0_i32_1 = arith.constant 0 : i32
    %c0_i32_2 = arith.constant 0 : i32
    return %arg0, %c0_i32, %c0_i32_0, %c0_i32_1 : i32, i32, i32, i32
  }
  func.func @transform_9(%arg0: i32) -> (i32, i32, i32, i32) {
    %c0_i32 = arith.constant 0 : i32
    %c0_i32_0 = arith.constant 0 : i32
    %c0_i32_1 = arith.constant 0 : i32
    %c0_i32_2 = arith.constant 0 : i32
    return %arg0, %c0_i32, %c0_i32_0, %c0_i32_1 : i32, i32, i32, i32
  }
  func.func @transform_10(%arg0: i32) -> (i32, i32, i32, i32) {
    %c0_i32 = arith.constant 0 : i32
    %c0_i32_0 = arith.constant 0 : i32
    %c0_i32_1 = arith.constant 0 : i32
    %c0_i32_2 = arith.constant 0 : i32
    return %arg0, %c0_i32, %c0_i32_0, %c0_i32_1 : i32, i32, i32, i32
  }
  func.func @transform_11(%arg0: i32) -> (i32, i32, i32) {
    %c0_i32 = arith.constant 0 : i32
    %c0_i32_0 = arith.constant 0 : i32
    %c0_i32_1 = arith.constant 0 : i32
    return %arg0, %c0_i32, %c0_i32_0 : i32, i32, i32
  }
  func.func @transform_12(%arg0: i32) -> (i32, i32, i32) {
    %c0_i32 = arith.constant 0 : i32
    %c0_i32_0 = arith.constant 0 : i32
    %c0_i32_1 = arith.constant 0 : i32
    %c0_i32_2 = arith.constant 0 : i32
    return %c0_i32, %c0_i32_0, %c0_i32_1 : i32, i32, i32
  }
  func.func @transform_13(%arg0: i32) -> (i32, i32) {
    %c0_i32 = arith.constant 0 : i32
    %c0_i32_0 = arith.constant 0 : i32
    %c0_i32_1 = arith.constant 0 : i32
    return %c0_i32, %c0_i32_0 : i32, i32
  }
}

</mosaic_0001>

<bundles_post_ra>
// kernel: decoder_forward.1
= control target key start
LH: loop header
LB: loop body
LE: loop exit
PB: predicated region body
PF: predicated region fallthrough
CT: control target
= control target key end

     0   :  { %s6930_s0 = inlined_call_operand.vmem [shape: f32[16,32], index: 0, kind: input, shape index: {}]   ;;  %s6931_s1 = inlined_call_operand.vmem [shape: bf16[32,32], index: 1, kind: input, shape index: {}]   ;;  %s6932_s2 = inlined_call_operand.vmem [shape: f32[2,8,8], index: 2, kind: input, shape index: {}]   ;;  %s6933_s3 = inlined_call_operand.vmem [shape: f32[2,1,16], index: 3, kind: input, shape index: {}]   ;;  %s6934_s4 = inlined_call_operand.vmem [shape: bf16[2,24,32,8], index: 4, kind: input, shape index: {}]   ;;  %s6935_s5 = inlined_call_operand.vmem [shape: bf16[2,8,8,32], index: 5, kind: input, shape index: {}]   ;;  %s6936_s6 = inlined_call_operand.vmem [shape: bf16[2,32,128], index: 6, kind: input, shape index: {}]   ;;  %s6937_s7 = inlined_call_operand.vmem [shape: bf16[2,128,32], index: 7, kind: input, shape index: {}]   ;;  %s6938_s8 = inlined_call_operand.vmem [shape: f32[2,6,1,32], index: 8, kind: input, shape index: {}]   ;;  %s6939_s9 = inlined_call_operand.vmem [shape: f32[2,24,1,8], index: 9, kind: input, shape index: {}]   ;;  %s6940_s10 = inlined_call_operand.vmem [shape: f32[2,3,1,32], index: 10, kind: input, shape index: {}]   ;;  %s6941_s11 = inlined_call_operand.vmem [shape: f32[2,1,128], index: 11, kind: input, shape index: {}]   ;;  %s6942_s12 = inlined_call_operand.vmem [shape: f32[2,1,32], index: 12, kind: input, shape index: {}]   ;;  %s6943_s13 = inlined_call_operand.hbm [shape: f32[16,32], index: 13, kind: output, shape index: {}]  }
   0x1   :  { %6947 = sst [smem:[#allocation7_spill]] %s6934_s4 }
   0x2   :  { %6948 = sst [smem:[#allocation8_spill]] %s6935_s5 }
   0x3   :  { %6949 = sst [smem:[#allocation9_spill]] %s6936_s6 }
   0x4   :  { %6950 = sst [smem:[#allocation10_spill]] %s6942_s12 }
   0x5   :  { %6951 = sst [smem:[#allocation11_spill]] %s6943_s13 }
   0x6   :  { %18 = vsyncpa [#allocation4], 0  ;;  %s6227_s25 = smov 0  }
   0x7 LB: > { %6952 = sst [smem:[#allocation6_spill]] %s6150_s25  ;;  %s6233_s26 = sadd.s32 4294967295, %s6150_s25   ;;  %s6150_s25 = sphi %s6227_s25, %s24_s25  }
   0x8   : > { %p4983_p0 = scmp.ge.s32.totalorder %s6150_s25, 1  ;;  %p448_p1 = scmp.lt.s32.totalorder %s6150_s25, 3 }
   0xa   : > { %p449_p2 = pnand %p4983_p0, %p448_p1 }
   0xb   : > { %p517_p3 = scmp.lt.s32.totalorder (!%p449_p2), %s6233_s26, 1  ;;  %s6953_s5 = sld [smem:[#allocation8_spill]] (!%p449_p2) }
   0xc   : > { %452 = sbr.rel (%p449_p2) target bundleno = 9653 (0x25b5), region = 72  ;;  %s6954_s4 = sld [smem:[#allocation7_spill]] (!%p449_p2) }
   0xd   : > { %s6955_s6 = sld [smem:[#allocation9_spill]] (!%p449_p2)  ;;  %p4991_p4 = scmp.ne.s32.totalorder (!%p449_p2), %s6233_s26, 0 }
  0x13   : > { %s6239_s27 = scalar_select %p517_p3, %s6233_s26, 1 }
  0x14   : > { %v557_v0 = vld [vmem:[%s6930_s0] sm:$0xff] (!%p4991_p4)  ;;  %vm559_vm0 = vcmask (!%p4991_p4), 261120   ;;  %v558_v1 = vld [vmem:[%s6930_s0 + $0x8] sm:$0xff] (!%p4991_p4) }
  0x15   : > { %s5933_s28 = smul.u32 384, %s6239_s27  ;;  %s5298_s29 = sshll.u32 %s6239_s27, 5  ;;  %560 = vst.msk [vmem:[#allocation2] sm:$0xff] (!%p4991_p4), %vm559_vm0, %v557_v0  ;;  %561 = vst.msk [vmem:[#allocation2 + $0x8] sm:$0xff] (!%p4991_p4), %vm559_vm0, %v558_v1 }
  0x16   : > { %s6246_s15 = scalar_lea.vmem %s6953_s5, %s5298_s29  ;;  %s5299_s16 = sshll.u32 %s6239_s27, 4 }
  0x17   : > { %s6252_s19 = scalar_lea.vmem %s6954_s4, %s5933_s28  ;;  %s6257_s22 = scalar_lea.vmem %s6955_s6, %s5299_s16 }
  0x18   : > { %s5300_s23 = sshll.u32 %s6239_s27, 6  ;;  %s5934_s24 = smul.u32 6, %s6239_s27 }
  0x19   : > { %s6264_s12 = scalar_lea.vmem %s6937_s7, %s5300_s23  ;;  %s5935_s29 = smul.u32 24, %s6239_s27 }
  0x1a   : > { %s6270_s5 = scalar_lea.vmem %s6938_s8, %s5934_s24  ;;  %s5936_s28 = smul.u32 3, %s6239_s27 }
  0x1b   : > { %s6276_s20 = scalar_lea.vmem %s6939_s9, %s5935_s29  ;;  %s551_s4 = scalar_lea.vmem %s6941_s11, %s6239_s27 }
  0x1c   : > { %s6285_s25 = scalar_lea.vmem %s6940_s10, %s5936_s28  ;;  %556 = sbr.rel (%p4991_p4) target bundleno = 35 (0x23), region = 76 }
  0x23 PF: > { %v562_v2 = vld [vmem:[#allocation2] sm:$0xff]  ;;  %vm587_vm1 = vcmask 261120   ;;  %v563_v3 = vld [vmem:[#allocation2 + $0x8] sm:$0xff]  ;;  %v6152_v17 = vmov 0.0   ;;  %vm6153_vm2 = vmmov 0   ;;  %vm854_vm7 = vcmask 64512  }
  0x24   : > { %v588_v4 = vsel %vm587_vm1, %v562_v2, 0.0  ;;  %v591_v5 = vsel %vm587_vm1, %v563_v3, 0.0  ;;  %v5956_v16 = vld [vmem:[%s6252_s19] sm:$0xff]   ;;  %5473 = vmatprep.subr.bf16.mxu0 %v6152_v17  ;;  %5497 = vmatprep.subr.bf16.mxu1 %v6152_v17  ;;  %v5957_v18 = vld [vmem:[%s6252_s19 + $0x8] sm:$0xff]   ;;  %vm978_vm8 = vcmask 1043456   ;;  %vm2929_vm13 = vcmask 130048  }
  0x25   : > { %589 = vadd.xlane.f32.xlu0 %v588_v4  ;;  %5474 = vmatpush3.bf16.msra.mxu0 %v5956_v16  ;;  %v4995_v37 = vld [vmem:[%s6270_s5] ss:$0 sm:$0xff]  ;;  %v4996_v41 = vld [vmem:[%s6270_s5 + $0x1] ss:$0 sm:$0xff]  ;;  %v5959_v47 = vld [vmem:[%s6252_s19 + $0x48] sm:$0xff]   ;;  %p5290_p5 = scmp.ne.s32.totalorder %s6233_s26, 1 }
  0x26   : > { %5475 = vmatprep.subr.bf16.mxu0 %v6152_v17  ;;  %5477 = vmatprep.mubr.msk.bf16.mxu0 %vm6153_vm2, %v6152_v17  ;;  %v5958_v45 = vld [vmem:[%s6252_s19 + $0x40] sm:$0xff]   ;;  %v5961_v49 = vld [vmem:[%s6252_s19 + $0x88] sm:$0xff]  }
  0x27   : > { %5499 = vmatprep.mubr.msk.bf16.mxu1 %vm6153_vm2, %v6152_v17  ;;  %v5960_v48 = vld [vmem:[%s6252_s19 + $0x80] sm:$0xff]   ;;  %v5015_v1 = vld [vmem:[%s6276_s20 + $0x8] ss:$0 sm:$0xff] }
  0x28   : > { %v5011_v54 = vld [vmem:[%s6276_s20 + $0x4] ss:$0 sm:$0xff]  ;;  %v5007_v62 = vld [vmem:[%s6276_s20] ss:$0 sm:$0xff] }
  0x29   : > { %592 = vadd.xlane.f32.xlu0 %v591_v5  ;;  %5476 = vmatpush3.bf16.msra.mxu0 %v5957_v18 }
  0x2a   : > { %5481 = vmatprep.subr.bf16.mxu0 %v6152_v17 }
  0xb2   : > { %v590_v6 = vpop.xlane.xlu0 %589 }
  0xb3   : > { %v595_v7 = vmul.f32 0.03125, %v590_v6 }
  0xb5   : > { %v597_v8 = vsub.f32 %v562_v2, %v595_v7 }
  0xb6   : > { %v593_v9 = vpop.xlane.xlu0 %592 }
  0xb7   : > { %v596_v10 = vmul.f32 0.03125, %v593_v9  ;;  %v599_v11 = vmul.f32 %v597_v8, %v597_v8 }
  0xb9   : > { %v598_v12 = vsub.f32 %v563_v3, %v596_v10  ;;  %v601_v13 = vsel %vm587_vm1, %v599_v11, 0.0 }
  0xba   : > { %602 = vadd.xlane.f32.xlu1 %v601_v13 }
  0xbb   : > { %v600_v14 = vmul.f32 %v598_v12, %v598_v12 }
  0xbd   : > { %v604_v15 = vsel %vm587_vm1, %v600_v14, 0.0 }
  0xbe   : > { %605 = vadd.xlane.f32.xlu1 %v604_v15 }
 0x147   : > { %v603_v19 = vpop.xlane.xlu1 %602 }
 0x148   : > { %v607_v20 = vmul.f32 0.032258064, %v603_v19  ;;  %v6352_v19 = vld [vmem:[%s6932_s2] sm:$0xff] }
 0x14a   : > { %6016 = vrsqrt.f32 %v607_v20  ;;  %vm611_vm3 = vcmp.eq.f32.partialorder %v607_v20, inf  ;;  %v614_v25 = vand.u32 2147483648, %v607_v20  ;;  %vm613_vm4 = vcmp.eq.f32.partialorder %v607_v20, 0.0 }
 0x14b   : > { %v606_v21 = vpop.xlane.xlu1 %605 }
 0x14c   : > { %v608_v22 = vmul.f32 0.032258064, %v606_v21 }
 0x14e   : > { %6018 = vrsqrt.f32 %v608_v22  ;;  %vm618_vm5 = vcmp.eq.f32.partialorder %v608_v22, inf  ;;  %v621_v31 = vand.u32 2147483648, %v608_v22  ;;  %vm620_vm6 = vcmp.eq.f32.partialorder %v608_v22, 0.0 }
 0x154   : > { %v6017_v23 = vpop.eup %6016 }
 0x155   : > { %v610_v24 = vmul.f32 %v6017_v23, %v607_v20 }
 0x157   : > { %v612_v26 = vsel %vm611_vm3, %v607_v20, %v610_v24  ;;  %v6357_v24 = vld [vmem:[%s6932_s2 + $0x8] sm:$0xff] }
 0x158   : > { %v6019_v27 = vpop.eup %6018  ;;  %v615_v28 = vsel %vm613_vm4, %v614_v25, %v612_v26 }
 0x159   : > { %v623_v29 = vadd.f32 1e-06, %v615_v28  ;;  %v617_v30 = vmul.f32 %v6019_v27, %v608_v22 }
 0x15b   : > { %6020 = vrcp.f32 %v623_v29  ;;  %v619_v32 = vsel %vm618_vm5, %v608_v22, %v617_v30 }
 0x15c   : > { %v622_v33 = vsel %vm620_vm6, %v621_v31, %v619_v32 }
 0x15d   : > { %v624_v34 = vadd.f32 1e-06, %v622_v33 }
 0x15f   : > { %6022 = vrcp.f32 %v624_v34 }
 0x165   : > { %v6021_v35 = vpop.eup %6020 }
 0x166   : > { %v629_v36 = vmul.f32 %v6021_v35, %v597_v8 }
 0x168   : > { %v637_v39 = vmul.f32 %v4995_v37, %v629_v36 }
 0x169   : > { %v6023_v38 = vpop.eup %6022 }
 0x16a   : > { %v630_v40 = vmul.f32 %v6023_v38, %v598_v12  ;;  %v645_v43 = vadd.f32 %v4996_v41, %v637_v39 }
 0x16c   : > { %v638_v42 = vmul.f32 %v4995_v37, %v630_v40 }
 0x16e   : > { %v646_v44 = vadd.f32 %v4996_v41, %v638_v42 }
 0x170   : > { %v6311_v46 = vpack.c.bf16 %v646_v44, %v645_v43 }
 0x172   : > { %5478 = vmatmul.mubr.msk.bf16.vlgmr.msra.gmra.mrb[0].mxu0 %vm587_vm1, %v6311_v46 }
 0x173   : > { %5482 = vmatpush3.bf16.msra.mxu0 %v5958_v45  ;;  %5485 = vmatprep.mubr.msk.bf16.mxu0 %vm6153_vm2, %v6152_v17 }
 0x174   : > { %5483 = vmatprep.subr.bf16.mxu0 %v6152_v17 }
 0x177   : > { %5484 = vmatpush3.bf16.msra.mxu0 %v5959_v47 }
 0x178   : > { %5489 = vmatprep.subr.bf16.mxu0 %v6152_v17 }
 0x17a   : > { %5486 = vmatmul.mubr.msk.bf16.vlgmr.msra.gmra.mrb[4].mxu0 %vm587_vm1, %v6311_v46 }
 0x17b   : > { %5490 = vmatpush3.bf16.msra.mxu0 %v5960_v48  ;;  %5493 = vmatprep.mubr.msk.bf16.mxu0 %vm6153_vm2, %v6152_v17 }
 0x17c   : > { %5491 = vmatprep.subr.bf16.mxu0 %v6152_v17 }
 0x17f   : > { %5492 = vmatpush3.bf16.msra.mxu0 %v5961_v49 }
 0x180   : > { %5503 = vmatprep.subr.bf16.mxu0 %v6152_v17 }
 0x182   : > { %5494 = vmatmul.mubr.msk.bf16.vlgmr.msra.gmra.mrb[8].mxu0 %vm587_vm1, %v6311_v46 }
 0x183   : > { %5505 = vmatprep.mubr.msk.bf16.mxu0 %vm6153_vm2, %v6152_v17 }
 0x245   : > { %v723_v50 = vpop.f32.mrb[0].mxu0 }
 0x246   : > { %v5479_v51 = vpop.f32.mrb[1].mxu0  ;;  %v724_v2 = vadd.f32 %v5007_v62, %v723_v50  ;;  %v5962_v50 = vld [vmem:[%s6252_s19 + $0x10] sm:$0xff]  }
 0x247   : > { %v726_v52 = vpop.f32.mrb[2].mxu0 }
 0x248   : > { %v5480_v53 = vpop.f32.mrb[3].mxu0  ;;  %v727_v5 = vadd.f32 %v5007_v62, %v726_v52  ;;  %v848_v9 = vpack.c.bf16 %v724_v2, %v724_v2 }
 0x249   : > { %v5963_v53 = vld [vmem:[%s6252_s19 + $0x50] sm:$0xff]  }
 0x24a   : > { %v849_v13 = vpack.c.bf16 %v727_v5, %v727_v5  ;;  %v5042_v5 = vld [vmem:[%s6276_s20 + $0x5] ss:$0 sm:$0xff] }
 0x24d   : > { %v782_v55 = vpop.f32.mrb[4].mxu0 }
 0x24e   : > { %v783_v56 = vadd.f32 %v5011_v54, %v782_v55  ;;  %v5487_v57 = vpop.f32.mrb[5].mxu0  ;;  %v5964_v55 = vld [vmem:[%s6252_s19 + $0x18] sm:$0xff]  }
 0x24f   : > { %v785_v58 = vpop.f32.mrb[6].mxu0  ;;  %v5966_v57 = vld [vmem:[%s6252_s19 + $0x90] sm:$0xff]  }
 0x250   : > { %v850_v59 = vpack.c.bf16 %v783_v56, %v783_v56  ;;  %v786_v60 = vadd.f32 %v5011_v54, %v785_v58  ;;  %v5488_v61 = vpop.f32.mrb[7].mxu0  ;;  %v5965_v56 = vld [vmem:[%s6252_s19 + $0x58] sm:$0xff]  }
 0x251   : > { %v5967_v58 = vld [vmem:[%s6252_s19 + $0x98] sm:$0xff]  }
 0x252   : > { %v851_v63 = vpack.c.bf16 %v786_v60, %v786_v60  ;;  %v859_v0 = vsel %vm854_vm7, %v850_v59, 0 }
 0x253   : > { %5498 = vmatpush3.bf16.xpose.msra.mxu1 %v859_v0 }
 0x254   : > { %v905_v3 = vsel %vm854_vm7, %v851_v63, 0  ;;  %5509 = vmatprep.subr.bf16.mxu1 %v6152_v17 }
 0x255   : > { %v841_v4 = vpop.f32.mrb[8].mxu0  ;;  %5504 = vmatpush3.bf16.xpose.msra.mxu0 %v905_v3 }
 0x256   : > { %v842_v6 = vadd.f32 %v5015_v1, %v841_v4  ;;  %v5495_v7 = vpop.f32.mrb[9].mxu0  ;;  %5515 = vmatprep.subr.bf16.mxu0 %v6152_v17 }
 0x257   : > { %v844_v8 = vpop.f32.mrb[10].mxu0 }
 0x258   : > { %v852_v10 = vpack.c.bf16 %v842_v6, %v842_v6  ;;  %v845_v11 = vadd.f32 %v5015_v1, %v844_v8  ;;  %v5496_v12 = vpop.f32.mrb[11].mxu0 }
 0x25a   : > { %v980_v14 = vsel %vm978_vm8, %v852_v10, 0  ;;  %v853_v15 = vpack.c.bf16 %v845_v11, %v845_v11  ;;  %5500 = vmatmul.mubr.msk.bf16.vlgmr.msra.gmra.mrb[0].mxu1 %vm854_vm7, %v848_v9 }
 0x25b   : > { %5510 = vmatpush3.bf16.msra.mxu1 %v980_v14  ;;  %5511 = vmatprep.mubr.msk.bf16.mxu1 %vm6153_vm2, %v6152_v17 }
 0x25c   : > { %v1026_v16 = vsel %vm978_vm8, %v853_v15, 0  ;;  %5506 = vmatmul.mubr.msk.bf16.vlgmr.msra.gmra.mrb[12].mxu0 %vm854_vm7, %v849_v13  ;;  %5521 = vmatprep.subr.bf16.mxu1 %v6152_v17 }
 0x25d   : > { %5516 = vmatpush3.bf16.msra.mxu0 %v1026_v16  ;;  %5517 = vmatprep.mubr.msk.bf16.mxu0 %vm6153_vm2, %v6152_v17  ;;  %v5038_v16 = vld [vmem:[%s6276_s20 + $0x1] ss:$0 sm:$0xff] }
 0x25e   : > { %5529 = vmatprep.subr.bf16.mxu0 %v6152_v17 }
 0x32d   : > { %v895_v18 = vpop.f32.mrb[0].mxu1 }
 0x32e   : > { %v947_v20 = vmul.f32 0.35355338, %v895_v18  ;;  %v5501_v21 = vpop.f32.mrb[1].mxu1  ;;  %v5046_v18 = vld [vmem:[%s6276_s20 + $0x9] ss:$0 sm:$0xff] }
 0x32f   : > { %v898_v22 = vpop.f32.mrb[2].mxu1  ;;  %v941_v23 = vpop.f32.mrb[12].mxu0 }
 0x330   : > { %v948_v25 = vmul.f32 0.35355338, %v941_v23  ;;  %v5502_v26 = vpop.f32.mrb[3].mxu1  ;;  %v5507_v27 = vpop.f32.mrb[13].mxu0  ;;  %v949_v28 = vadd.f32 %v947_v20, %v6352_v19 }
 0x331   : > { %v944_v29 = vpop.f32.mrb[14].mxu0 }
 0x332   : > { %v5508_v30 = vpop.f32.mrb[15].mxu0  ;;  %v951_v31 = vsel %vm854_vm7, %v949_v28, -inf  ;;  %v950_v32 = vadd.f32 %v948_v25, %v6357_v24 }
 0x333   : > { %952 = vmax.xlane.f32.xlu1 %v951_v31 }
 0x334   : > { %v954_v33 = vsel %vm854_vm7, %v950_v32, -inf }
 0x335   : > { %955 = vmax.xlane.f32.xlu0 %v954_v33 }
 0x3c0   : > { %v953_v34 = vpop.xlane.xlu1 %952 }
 0x3c1   : > { %v957_v35 = vsub.f32 %v949_v28, %v953_v34 }
 0x3c2   : > { %v956_v36 = vpop.xlane.xlu0 %955 }
 0x3c3   : > { %v959_v37 = vmul.f32 1.442695, %v957_v35  ;;  %v958_v38 = vsub.f32 %v950_v32, %v956_v36 }
 0x3c5   : > { %6024 = vpow2.f32 %v959_v37  ;;  %v961_v39 = vmul.f32 1.442695, %v958_v38 }
 0x3c7   : > { %6026 = vpow2.f32 %v961_v39 }
 0x3cf   : > { %v6025_v40 = vpop.eup %6024 }
 0x3d0   : > { %v963_v41 = vsel %vm854_vm7, %v6025_v40, 0.0 }
 0x3d1   : > { %v6027_v42 = vpop.eup %6026  ;;  %964 = vadd.xlane.f32.xlu1 %v963_v41 }
 0x3d2   : > { %v966_v43 = vsel %vm854_vm7, %v6027_v42, 0.0 }
 0x3d3   : > { %967 = vadd.xlane.f32.xlu0 %v966_v43 }
 0x45e   : > { %v965_v44 = vpop.xlane.xlu1 %964 }
 0x45f   : > { %6028 = vrcp.f32 %v965_v44 }
 0x460   : > { %v968_v45 = vpop.xlane.xlu0 %967 }
 0x461   : > { %6030 = vrcp.f32 %v968_v45 }
 0x469   : > { %v6029_v47 = vpop.eup %6028 }
 0x46a   : > { %v971_v48 = vmul.f32 %v6029_v47, %v6025_v40 }
 0x46b   : > { %v6031_v49 = vpop.eup %6030 }
 0x46c   : > { %v972_v51 = vmul.f32 %v6031_v49, %v6027_v42  ;;  %v973_v52 = vpack.c.bf16 %v971_v48, %v971_v48 }
 0x46e   : > { %5512 = vmatmul.mubr.msk.bf16.vlgmr.msra.gmra.mrb[4].mxu1 %vm854_vm7, %v973_v52  ;;  %v974_v54 = vpack.c.bf16 %v972_v51, %v972_v51 }
 0x46f   : > { %5522 = vmatpush3.bf16.msra.mxu1 %v5962_v50  ;;  %5525 = vmatprep.mubr.msk.bf16.mxu1 %vm6153_vm2, %v6152_v17 }
 0x470   : > { %5518 = vmatmul.mubr.msk.bf16.vlgmr.msra.gmra.mrb[16].mxu0 %vm854_vm7, %v974_v54  ;;  %5523 = vmatprep.subr.bf16.mxu1 %v6152_v17 }
 0x471   : > { %5530 = vmatpush3.bf16.msra.mxu0 %v5963_v53  ;;  %5533 = vmatprep.mubr.msk.bf16.mxu0 %vm6153_vm2, %v6152_v17 }
 0x472   : > { %5531 = vmatprep.subr.bf16.mxu0 %v6152_v17 }
 0x473   : > { %5524 = vmatpush3.bf16.msra.mxu1 %v5964_v55 }
 0x474   : > { %5537 = vmatprep.subr.bf16.mxu1 %v6152_v17 }
 0x475   : > { %5532 = vmatpush3.bf16.msra.mxu0 %v5965_v56 }
 0x476   : > { %5526 = vmatmul.mubr.msk.bf16.vlgmr.msra.gmra.mrb[8].mxu1 %vm587_vm1, %v6311_v46  ;;  %5545 = vmatprep.subr.bf16.mxu0 %v6152_v17 }
 0x477   : > { %5538 = vmatpush3.bf16.msra.mxu1 %v5966_v57  ;;  %5541 = vmatprep.mubr.msk.bf16.mxu1 %vm6153_vm2, %v6152_v17 }
 0x478   : > { %5534 = vmatmul.mubr.msk.bf16.vlgmr.msra.gmra.mrb[20].mxu0 %vm587_vm1, %v6311_v46  ;;  %5539 = vmatprep.subr.bf16.mxu1 %v6152_v17 }
 0x479   : > { %5547 = vmatprep.mubr.msk.bf16.mxu0 %vm6153_vm2, %v6152_v17 }
 0x47b   : > { %5540 = vmatpush3.bf16.msra.mxu1 %v5967_v58 }
 0x47c   : > { %5551 = vmatprep.subr.bf16.mxu1 %v6152_v17 }
 0x47e   : > { %5542 = vmatmul.mubr.msk.bf16.vlgmr.msra.gmra.mrb[12].mxu1 %vm587_vm1, %v6311_v46 }
 0x47f   : > { %5553 = vmatprep.mubr.msk.bf16.mxu1 %vm6153_vm2, %v6152_v17 }
 0x541   : > { %v6395_v59 = vpop.f32.mrb[4].mxu1 }
 0x542   : > { %v5513_v60 = vpop.f32.mrb[5].mxu1 }
 0x543   : > { %v1019_v61 = vpop.f32.mrb[6].mxu1  ;;  %v6397_v62 = vpop.f32.mrb[16].mxu0 }
 0x544   : > { %v1068_v63 = vpack.c.bf16 %v6397_v62, %v6395_v59  ;;  %v5514_v0 = vpop.f32.mrb[7].mxu1  ;;  %v5519_v1 = vpop.f32.mrb[17].mxu0 }
 0x545   : > { %v1065_v2 = vpop.f32.mrb[18].mxu0 }
 0x546   : > { %v5520_v3 = vpop.f32.mrb[19].mxu0 }
 0x549   : > { %v1143_v4 = vpop.f32.mrb[8].mxu1 }
 0x54a   : > { %v5527_v6 = vpop.f32.mrb[9].mxu1  ;;  %v1144_v23 = vadd.f32 %v5038_v16, %v1143_v4 }
 0x54b   : > { %v1146_v7 = vpop.f32.mrb[10].mxu1  ;;  %v1202_v8 = vpop.f32.mrb[20].mxu0 }
 0x54c   : > { %v1203_v9 = vadd.f32 %v5042_v5, %v1202_v8  ;;  %v5528_v10 = vpop.f32.mrb[11].mxu1  ;;  %v5535_v11 = vpop.f32.mrb[21].mxu0  ;;  %v1147_v29 = vadd.f32 %v5038_v16, %v1146_v7  ;;  %v1268_v33 = vpack.c.bf16 %v1144_v23, %v1144_v23  ;;  %v1069_v8 = vld [vmem:[%s6246_s15] sm:$0xf] }
 0x54d   : > { %v1205_v12 = vpop.f32.mrb[22].mxu0 }
 0x54e   : > { %v1270_v13 = vpack.c.bf16 %v1203_v9, %v1203_v9  ;;  %v1206_v14 = vadd.f32 %v5042_v5, %v1205_v12  ;;  %v5536_v15 = vpop.f32.mrb[23].mxu0  ;;  %v1269_v35 = vpack.c.bf16 %v1147_v29, %v1147_v29  ;;  %v5054_v5 = vld [vmem:[%s6246_s15 + $0x4] sm:$0xf] }
 0x54f   : > { %v1493_v11 = vsel %vm978_vm8, %v5054_v5, 0  ;;  %v5969_v15 = vld [vmem:[%s6252_s19 + $0x68] sm:$0xff]  }
 0x550   : > { %v1278_v20 = vsel %vm854_vm7, %v1270_v13, 0  ;;  %v1271_v21 = vpack.c.bf16 %v1206_v14, %v1206_v14  ;;  %v1540_v13 = vsel %vm978_vm8, %v1069_v8, 0  ;;  %v5968_v14 = vld [vmem:[%s6252_s19 + $0x60] sm:$0xff]  }
 0x551   : > { %v1261_v22 = vpop.f32.mrb[12].mxu1  ;;  %5546 = vmatpush3.bf16.xpose.msra.mxu0 %v1278_v20 }
 0x552   : > { %v1324_v25 = vsel %vm854_vm7, %v1271_v21, 0  ;;  %v1262_v26 = vadd.f32 %v5046_v18, %v1261_v22  ;;  %v5543_v27 = vpop.f32.mrb[13].mxu1  ;;  %5557 = vmatprep.subr.bf16.mxu0 %v6152_v17 }
 0x553   : > { %v1264_v28 = vpop.f32.mrb[14].mxu1  ;;  %5552 = vmatpush3.bf16.xpose.msra.mxu1 %v1324_v25 }
 0x554   : > { %v1272_v30 = vpack.c.bf16 %v1262_v26, %v1262_v26  ;;  %v1265_v31 = vadd.f32 %v5046_v18, %v1264_v28  ;;  %v5544_v32 = vpop.f32.mrb[15].mxu1  ;;  %5563 = vmatprep.subr.bf16.mxu1 %v6152_v17  ;;  %v5970_v18 = vld [vmem:[%s6252_s19 + $0x20] sm:$0xff]   ;;  %v5971_v26 = vld [vmem:[%s6252_s19 + $0x28] sm:$0xff]  }
 0x555   : > { %v5972_v28 = vld [vmem:[%s6252_s19 + $0xa0] sm:$0xff]   ;;  %v5973_v32 = vld [vmem:[%s6252_s19 + $0xa8] sm:$0xff]  }
 0x556   : > { %v1273_v34 = vpack.c.bf16 %v1265_v31, %v1265_v31  ;;  %v1398_v36 = vsel %vm978_vm8, %v1272_v30, 0 }
 0x558   : > { %5548 = vmatmul.mubr.msk.bf16.vlgmr.msra.gmra.mrb[24].mxu0 %vm854_vm7, %v1268_v33  ;;  %v1444_v37 = vsel %vm978_vm8, %v1273_v34, 0  ;;  %v5076_v33 = vld [vmem:[%s6276_s20 + $0x6] ss:$0 sm:$0xff] }
 0x559   : > { %5558 = vmatpush3.bf16.msra.mxu0 %v1398_v36  ;;  %5559 = vmatprep.mubr.msk.bf16.mxu0 %vm6153_vm2, %v6152_v17 }
 0x55a   : > { %5554 = vmatmul.mubr.msk.bf16.vlgmr.msra.gmra.mrb[16].mxu1 %vm854_vm7, %v1269_v35  ;;  %5569 = vmatprep.subr.bf16.mxu0 %v6152_v17 }
 0x55b   : > { %5564 = vmatpush3.bf16.msra.mxu1 %v1444_v37  ;;  %5565 = vmatprep.mubr.msk.bf16.mxu1 %vm6153_vm2, %v6152_v17 }
 0x55c   : > { %5575 = vmatprep.subr.bf16.mxu1 %v6152_v17 }
 0x62b   : > { %v1314_v38 = vpop.f32.mrb[24].mxu0 }
 0x62c   : > { %v1366_v39 = vmul.f32 0.35355338, %v1314_v38  ;;  %v5549_v40 = vpop.f32.mrb[25].mxu0 }
 0x62d   : > { %v1317_v41 = vpop.f32.mrb[26].mxu0  ;;  %v1360_v42 = vpop.f32.mrb[16].mxu1 }
 0x62e   : > { %v1367_v43 = vmul.f32 0.35355338, %v1360_v42  ;;  %v5550_v44 = vpop.f32.mrb[27].mxu0  ;;  %v5555_v45 = vpop.f32.mrb[17].mxu1  ;;  %v1368_v47 = vadd.f32 %v1366_v39, %v6352_v19 }
 0x62f   : > { %v1363_v48 = vpop.f32.mrb[18].mxu1 }
 0x630   : > { %v5556_v49 = vpop.f32.mrb[19].mxu1  ;;  %v1370_v50 = vsel %vm854_vm7, %v1368_v47, -inf  ;;  %v1369_v51 = vadd.f32 %v1367_v43, %v6357_v24 }
 0x631   : > { %1371 = vmax.xlane.f32.xlu0 %v1370_v50 }
 0x632   : > { %v1373_v52 = vsel %vm854_vm7, %v1369_v51, -inf }
 0x633   : > { %1374 = vmax.xlane.f32.xlu1 %v1373_v52 }
 0x6be   : > { %v1372_v53 = vpop.xlane.xlu0 %1371 }
 0x6bf   : > { %v1376_v54 = vsub.f32 %v1368_v47, %v1372_v53 }
 0x6c0   : > { %v1375_v55 = vpop.xlane.xlu1 %1374 }
 0x6c1   : > { %v1378_v56 = vmul.f32 1.442695, %v1376_v54  ;;  %v1377_v57 = vsub.f32 %v1369_v51, %v1375_v55  ;;  %v5072_v51 = vld [vmem:[%s6276_s20 + $0x2] ss:$0 sm:$0xff] }
 0x6c3   : > { %6032 = vpow2.f32 %v1378_v56  ;;  %v1380_v58 = vmul.f32 1.442695, %v1377_v57 }
 0x6c5   : > { %6034 = vpow2.f32 %v1380_v58 }
 0x6cd   : > { %v6033_v60 = vpop.eup %6032 }
 0x6ce   : > { %v1382_v61 = vsel %vm854_vm7, %v6033_v60, 0.0 }
 0x6cf   : > { %v6035_v0 = vpop.eup %6034  ;;  %1383 = vadd.xlane.f32.xlu0 %v1382_v61  ;;  %v5080_v61 = vld [vmem:[%s6276_s20 + $0xa] ss:$0 sm:$0xff] }
 0x6d0   : > { %v1385_v1 = vsel %vm854_vm7, %v6035_v0, 0.0 }
 0x6d1   : > { %1386 = vadd.xlane.f32.xlu1 %v1385_v1 }
 0x75c   : > { %v1384_v2 = vpop.xlane.xlu0 %1383 }
 0x75d   : > { %6036 = vrcp.f32 %v1384_v2 }
 0x75e   : > { %v1387_v3 = vpop.xlane.xlu1 %1386 }
 0x75f   : > { %6038 = vrcp.f32 %v1387_v3 }
 0x767   : > { %v6037_v4 = vpop.eup %6036 }
 0x768   : > { %v1390_v6 = vmul.f32 %v6037_v4, %v6033_v60 }
 0x769   : > { %v6039_v7 = vpop.eup %6038 }
 0x76a   : > { %v1391_v9 = vmul.f32 %v6039_v7, %v6035_v0  ;;  %v1392_v10 = vpack.c.bf16 %v1390_v6, %v1390_v6 }
 0x76c   : > { %5560 = vmatmul.mubr.msk.bf16.vlgmr.msra.gmra.mrb[28].mxu0 %vm854_vm7, %v1392_v10  ;;  %v1393_v12 = vpack.c.bf16 %v1391_v9, %v1391_v9 }
 0x76d   : > { %5570 = vmatpush3.bf16.msra.mxu0 %v1493_v11  ;;  %5571 = vmatprep.mubr.msk.bf16.mxu0 %vm6153_vm2, %v6152_v17 }
 0x76e   : > { %5566 = vmatmul.mubr.msk.bf16.vlgmr.msra.gmra.mrb[20].mxu1 %vm854_vm7, %v1393_v12  ;;  %5581 = vmatprep.subr.bf16.mxu0 %v6152_v17 }
 0x76f   : > { %5576 = vmatpush3.bf16.msra.mxu1 %v1540_v13  ;;  %5577 = vmatprep.mubr.msk.bf16.mxu1 %vm6153_vm2, %v6152_v17 }
 0x770   : > { %5589 = vmatprep.subr.bf16.mxu1 %v6152_v17 }
 0x776   : > { %5578 = vmatmul.mubr.msk.bf16.vlgmr.msra.gmra.mrb[24].mxu1 %vm854_vm7, %v1068_v63 }
 0x777   : > { %5590 = vmatpush3.bf16.msra.mxu1 %v5968_v14  ;;  %5593 = vmatprep.mubr.msk.bf16.mxu1 %vm6153_vm2, %v6152_v17 }
 0x778   : > { %5591 = vmatprep.subr.bf16.mxu1 %v6152_v17 }
 0x77b   : > { %5592 = vmatpush3.bf16.msra.mxu1 %v5969_v15 }
 0x77c   : > { %5605 = vmatprep.subr.bf16.mxu1 %v6152_v17 }
 0x77e   : > { %5594 = vmatmul.mubr.msk.bf16.vlgmr.msra.gmra.mrb[28].mxu1 %vm587_vm1, %v6311_v46 }
 0x77f   : > { %5607 = vmatprep.mubr.msk.bf16.mxu1 %vm6153_vm2, %v6152_v17 }
 0x83f   : > { %v1434_v59 = vpop.f32.mrb[28].mxu0 }
 0x840   : > { %v5561_v62 = vpop.f32.mrb[29].mxu0 }
 0x841   : > { %v1437_v63 = vpop.f32.mrb[30].mxu0  ;;  %v1480_v16 = vpop.f32.mrb[20].mxu1 }
 0x842   : > { %v1486_v20 = vpack.c.bf16 %v1480_v16, %v1434_v59  ;;  %v5562_v21 = vpop.f32.mrb[31].mxu0  ;;  %v5567_v22 = vpop.f32.mrb[21].mxu1 }
 0x843   : > { %v1483_v23 = vpop.f32.mrb[22].mxu1 }
 0x844   : > { %v5568_v25 = vpop.f32.mrb[23].mxu1  ;;  %5572 = vmatmul.mubr.msk.bf16.vlgmr.msra.gmra.mrb[32].mxu0 %vm854_vm7, %v1486_v20 }
 0x845   : > { %5582 = vmatpush3.bf16.msra.mxu0 %v5970_v18  ;;  %5585 = vmatprep.mubr.msk.bf16.mxu0 %vm6153_vm2, %v6152_v17 }
 0x846   : > { %5583 = vmatprep.subr.bf16.mxu0 %v6152_v17 }
 0x849   : > { %5584 = vmatpush3.bf16.msra.mxu0 %v5971_v26  ;;  %v1576_v27 = vpop.f32.mrb[24].mxu1 }
 0x84a   : > { %v5579_v29 = vpop.f32.mrb[25].mxu1  ;;  %5597 = vmatprep.subr.bf16.mxu0 %v6152_v17 }
 0x84b   : > { %v1579_v30 = vpop.f32.mrb[26].mxu1 }
 0x84c   : > { %v5580_v31 = vpop.f32.mrb[27].mxu1  ;;  %5586 = vmatmul.mubr.msk.bf16.vlgmr.msra.gmra.mrb[36].mxu0 %vm587_vm1, %v6311_v46 }
 0x84d   : > { %5598 = vmatpush3.bf16.msra.mxu0 %v5972_v28  ;;  %5601 = vmatprep.mubr.msk.bf16.mxu0 %vm6153_vm2, %v6152_v17 }
 0x84e   : > { %5599 = vmatprep.subr.bf16.mxu0 %v6152_v17 }
 0x851   : > { %5600 = vmatpush3.bf16.msra.mxu0 %v5973_v32  ;;  %v1715_v34 = vpop.f32.mrb[28].mxu1 }
 0x852   : > { %v1716_v35 = vadd.f32 %v5076_v33, %v1715_v34  ;;  %v5595_v36 = vpop.f32.mrb[29].mxu1  ;;  %5611 = vmatprep.subr.bf16.mxu0 %v6152_v17 }
 0x853   : > { %v1718_v37 = vpop.f32.mrb[30].mxu1 }
 0x854   : > { %v1783_v38 = vpack.c.bf16 %v1716_v35, %v1716_v35  ;;  %v1719_v39 = vadd.f32 %v5076_v33, %v1718_v37  ;;  %v5596_v40 = vpop.f32.mrb[31].mxu1  ;;  %5602 = vmatmul.mubr.msk.bf16.vlgmr.msra.gmra.mrb[40].mxu0 %vm587_vm1, %v6311_v46  ;;  %v5088_v37 = vld [vmem:[%s6246_s15 + $0x8] sm:$0xf] }
 0x855   : > { %5613 = vmatprep.mubr.msk.bf16.mxu0 %vm6153_vm2, %v6152_v17 }
 0x856   : > { %v1791_v41 = vsel %vm854_vm7, %v1783_v38, 0  ;;  %v1784_v42 = vpack.c.bf16 %v1719_v39, %v1719_v39 }
 0x857   : > { %5606 = vmatpush3.bf16.xpose.msra.mxu1 %v1791_v41 }
 0x858   : > { %v1837_v43 = vsel %vm854_vm7, %v1784_v42, 0  ;;  %5617 = vmatprep.subr.bf16.mxu1 %v6152_v17  ;;  %v2006_v42 = vsel %vm978_vm8, %v5088_v37, 0 }
 0x85a   : > { %5612 = vmatpush3.bf16.xpose.msra.mxu0 %v1837_v43  ;;  %v5974_v43 = vld [vmem:[%s6252_s19 + $0x30] sm:$0xff]  }
 0x85b   : > { %5623 = vmatprep.subr.bf16.mxu0 %v6152_v17 }
 0x917   : > { %v1529_v44 = vpop.f32.mrb[32].mxu0 }
 0x918   : > { %v6474_v45 = vadd.f32 %v1576_v27, %v1529_v44  ;;  %v5573_v47 = vpop.f32.mrb[33].mxu0 }
 0x919   : > { %v1532_v48 = vpop.f32.mrb[34].mxu0  ;;  %v5975_v47 = vld [vmem:[%s6252_s19 + $0x38] sm:$0xff]  }
 0x91a   : > { %v6476_v49 = vadd.f32 %v1579_v30, %v1532_v48  ;;  %v5574_v50 = vpop.f32.mrb[35].mxu0  ;;  %v5976_v48 = vld [vmem:[%s6252_s19 + $0xb0] sm:$0xff]  }
 0x91b   : > { %v5977_v50 = vld [vmem:[%s6252_s19 + $0xb8] sm:$0xff]  }
 0x91f   : > { %v1656_v52 = vpop.f32.mrb[36].mxu0 }
 0x920   : > { %v1657_v53 = vadd.f32 %v5072_v51, %v1656_v52  ;;  %v5587_v54 = vpop.f32.mrb[37].mxu0 }
 0x921   : > { %v1659_v55 = vpop.f32.mrb[38].mxu0 }
 0x922   : > { %v1781_v56 = vpack.c.bf16 %v1657_v53, %v1657_v53  ;;  %v1660_v57 = vadd.f32 %v5072_v51, %v1659_v55  ;;  %v5588_v58 = vpop.f32.mrb[39].mxu0  ;;  %v5978_v55 = vld [vmem:[%s6252_s19 + $0x70] sm:$0xff]  }
 0x924   : > { %v1782_v60 = vpack.c.bf16 %v1660_v57, %v1660_v57  ;;  %5608 = vmatmul.mubr.msk.bf16.vlgmr.msra.gmra.mrb[32].mxu1 %vm854_vm7, %v1781_v56 }
 0x925   : > { %5619 = vmatprep.mubr.msk.bf16.mxu1 %vm6153_vm2, %v6152_v17 }
 0x926   : > { %5614 = vmatmul.mubr.msk.bf16.vlgmr.msra.gmra.mrb[44].mxu0 %vm854_vm7, %v1782_v60 }
 0x927   : > { %v1774_v0 = vpop.f32.mrb[40].mxu0  ;;  %5625 = vmatprep.mubr.msk.bf16.mxu0 %vm6153_vm2, %v6152_v17 }
 0x928   : > { %v1775_v1 = vadd.f32 %v5080_v61, %v1774_v0  ;;  %v5603_v2 = vpop.f32.mrb[41].mxu0  ;;  %v5979_v0 = vld [vmem:[%s6252_s19 + $0x78] sm:$0xff]  }
 0x929   : > { %v1777_v3 = vpop.f32.mrb[42].mxu0 }
 0x92a   : > { %v1785_v4 = vpack.c.bf16 %v1775_v1, %v1775_v1  ;;  %v1778_v5 = vadd.f32 %v5080_v61, %v1777_v3  ;;  %v5604_v6 = vpop.f32.mrb[43].mxu0 }
 0x92c   : > { %v1911_v7 = vsel %vm978_vm8, %v1785_v4, 0  ;;  %v1786_v8 = vpack.c.bf16 %v1778_v5, %v1778_v5 }
 0x92d   : > { %5618 = vmatpush3.bf16.msra.mxu1 %v1911_v7 }
 0x92e   : > { %v1957_v9 = vsel %vm978_vm8, %v1786_v8, 0  ;;  %5629 = vmatprep.subr.bf16.mxu1 %v6152_v17 }
 0x92f   : > { %5624 = vmatpush3.bf16.msra.mxu0 %v1957_v9 }
 0x930   : > { %5635 = vmatprep.subr.bf16.mxu0 %v6152_v17 }
 0x9f7   : > { %v1827_v10 = vpop.f32.mrb[32].mxu1 }
 0x9f8   : > { %v1879_v11 = vmul.f32 0.35355338, %v1827_v10  ;;  %v5609_v12 = vpop.f32.mrb[33].mxu1 }
 0x9f9   : > { %v1830_v13 = vpop.f32.mrb[34].mxu1  ;;  %v1873_v14 = vpop.f32.mrb[44].mxu0 }
 0x9fa   : > { %v1880_v15 = vmul.f32 0.35355338, %v1873_v14  ;;  %v5610_v59 = vpop.f32.mrb[35].mxu1  ;;  %v5615_v62 = vpop.f32.mrb[45].mxu0  ;;  %v1881_v63 = vadd.f32 %v1879_v11, %v6352_v19 }
 0x9fb   : > { %v1876_v16 = vpop.f32.mrb[46].mxu0 }
 0x9fc   : > { %v5616_v18 = vpop.f32.mrb[47].mxu0  ;;  %v1883_v20 = vsel %vm854_vm7, %v1881_v63, -inf  ;;  %v1882_v21 = vadd.f32 %v1880_v15, %v6357_v24 }
 0x9fd   : > { %1884 = vmax.xlane.f32.xlu0 %v1883_v20 }
 0x9fe   : > { %v1886_v22 = vsel %vm854_vm7, %v1882_v21, -inf }
 0x9ff   : > { %1887 = vmax.xlane.f32.xlu1 %v1886_v22  ;;  %v5105_v22 = vld [vmem:[%s6276_s20 + $0x3] ss:$0 sm:$0xff] }
 0xa8a   : > { %v1885_v23 = vpop.xlane.xlu0 %1884 }
 0xa8b   : > { %v1889_v25 = vsub.f32 %v1881_v63, %v1885_v23  ;;  %v5113_v63 = vld [vmem:[%s6276_s20 + $0xb] ss:$0 sm:$0xff] }
 0xa8c   : > { %v1888_v26 = vpop.xlane.xlu1 %1887 }
 0xa8d   : > { %v1891_v27 = vmul.f32 1.442695, %v1889_v25  ;;  %v1890_v28 = vsub.f32 %v1882_v21, %v1888_v26 }
 0xa8f   : > { %6040 = vpow2.f32 %v1891_v27  ;;  %v1893_v29 = vmul.f32 1.442695, %v1890_v28 }
 0xa91   : > { %6042 = vpow2.f32 %v1893_v29 }
 0xa99   : > { %v6041_v30 = vpop.eup %6040 }
 0xa9a   : > { %v1895_v31 = vsel %vm854_vm7, %v6041_v30, 0.0 }
 0xa9b   : > { %v6043_v32 = vpop.eup %6042  ;;  %1896 = vadd.xlane.f32.xlu0 %v1895_v31 }
 0xa9c   : > { %v1898_v33 = vsel %vm854_vm7, %v6043_v32, 0.0 }
 0xa9d   : > { %1899 = vadd.xlane.f32.xlu1 %v1898_v33 }
 0xb28   : > { %v1897_v34 = vpop.xlane.xlu0 %1896 }
 0xb29   : > { %6044 = vrcp.f32 %v1897_v34 }
 0xb2a   : > { %v1900_v35 = vpop.xlane.xlu1 %1899 }
 0xb2b   : > { %6046 = vrcp.f32 %v1900_v35 }
 0xb33   : > { %v6045_v36 = vpop.eup %6044 }
 0xb34   : > { %v1903_v38 = vmul.f32 %v6045_v36, %v6041_v30 }
 0xb35   : > { %v6047_v39 = vpop.eup %6046 }
 0xb36   : > { %v1904_v40 = vmul.f32 %v6047_v39, %v6043_v32  ;;  %v1905_v41 = vpack.c.bf16 %v1903_v38, %v1903_v38 }
 0xb38   : > { %5620 = vmatmul.mubr.msk.bf16.vlgmr.msra.gmra.mrb[36].mxu1 %vm854_vm7, %v1905_v41  ;;  %v1906_v44 = vpack.c.bf16 %v1904_v40, %v1904_v40 }
 0xb39   : > { %5630 = vmatpush3.bf16.msra.mxu1 %v2006_v42  ;;  %5631 = vmatprep.mubr.msk.bf16.mxu1 %vm6153_vm2, %v6152_v17 }
 0xb3a   : > { %5626 = vmatmul.mubr.msk.bf16.vlgmr.msra.gmra.mrb[48].mxu0 %vm854_vm7, %v1906_v44  ;;  %5643 = vmatprep.subr.bf16.mxu1 %v6152_v17 }
 0xb3b   : > { %5636 = vmatpush3.bf16.msra.mxu0 %v5974_v43  ;;  %5639 = vmatprep.mubr.msk.bf16.mxu0 %vm6153_vm2, %v6152_v17 }
 0xb3c   : > { %5637 = vmatprep.subr.bf16.mxu0 %v6152_v17 }
 0xb3f   : > { %5638 = vmatpush3.bf16.msra.mxu0 %v5975_v47 }
 0xb40   : > { %5651 = vmatprep.subr.bf16.mxu0 %v6152_v17 }
 0xb42   : > { %5640 = vmatmul.mubr.msk.bf16.vlgmr.msra.gmra.mrb[52].mxu0 %vm587_vm1, %v6311_v46 }
 0xb43   : > { %5652 = vmatpush3.bf16.msra.mxu0 %v5976_v48  ;;  %5655 = vmatprep.mubr.msk.bf16.mxu0 %vm6153_vm2, %v6152_v17 }
 0xb44   : > { %5653 = vmatprep.subr.bf16.mxu0 %v6152_v17 }
 0xb47   : > { %5654 = vmatpush3.bf16.msra.mxu0 %v5977_v50 }
 0xb48   : > { %5665 = vmatprep.subr.bf16.mxu0 %v6152_v17 }
 0xb4a   : > { %5656 = vmatmul.mubr.msk.bf16.vlgmr.msra.gmra.mrb[56].mxu0 %vm587_vm1, %v6311_v46 }
 0xb4b   : > { %5667 = vmatprep.mubr.msk.bf16.mxu0 %vm6153_vm2, %v6152_v17 }
 0xc0b   : > { %v1947_v51 = vpop.f32.mrb[36].mxu1 }
 0xc0c   : > { %v5621_v52 = vpop.f32.mrb[37].mxu1 }
 0xc0d   : > { %v1950_v53 = vpop.f32.mrb[38].mxu1  ;;  %v1993_v54 = vpop.f32.mrb[48].mxu0 }
 0xc0e   : > { %v1999_v56 = vpack.c.bf16 %v1993_v54, %v1947_v51  ;;  %v5622_v57 = vpop.f32.mrb[39].mxu1  ;;  %v5627_v58 = vpop.f32.mrb[49].mxu0 }
 0xc0f   : > { %v1996_v60 = vpop.f32.mrb[50].mxu0 }
 0xc10   : > { %v5628_v61 = vpop.f32.mrb[51].mxu0  ;;  %5632 = vmatmul.mubr.msk.bf16.vlgmr.msra.gmra.mrb[40].mxu1 %vm854_vm7, %v1999_v56 }
 0xc11   : > { %5644 = vmatpush3.bf16.msra.mxu1 %v5978_v55  ;;  %5647 = vmatprep.mubr.msk.bf16.mxu1 %vm6153_vm2, %v6152_v17 }
 0xc12   : > { %5645 = vmatprep.subr.bf16.mxu1 %v6152_v17 }
 0xc15   : > { %v2124_v1 = vpop.f32.mrb[52].mxu0  ;;  %5646 = vmatpush3.bf16.msra.mxu1 %v5979_v0 }
 0xc16   : > { %v5641_v2 = vpop.f32.mrb[53].mxu0  ;;  %5659 = vmatprep.subr.bf16.mxu1 %v6152_v17  ;;  %v2125_v26 = vadd.f32 %v5105_v22, %v2124_v1 }
 0xc17   : > { %v2127_v3 = vpop.f32.mrb[54].mxu0  ;;  %v5121_v2 = vld [vmem:[%s6246_s15 + $0xc] sm:$0xf] }
 0xc18   : > { %v5642_v4 = vpop.f32.mrb[55].mxu0  ;;  %5648 = vmatmul.mubr.msk.bf16.vlgmr.msra.gmra.mrb[44].mxu1 %vm587_vm1, %v6311_v46  ;;  %v5109_v46 = vld [vmem:[%s6276_s20 + $0x7] ss:$0 sm:$0xff]  ;;  %v2128_v28 = vadd.f32 %v5105_v22, %v2127_v3  ;;  %v2249_v30 = vpack.c.bf16 %v2125_v26, %v2125_v26 }
 0xc19   : > { %5661 = vmatprep.mubr.msk.bf16.mxu1 %vm6153_vm2, %v6152_v17  ;;  %v6104_v26 = vld [vmem:[#allocation2] sm:$0xff] }
 0xc1a   : > { %v2250_v32 = vpack.c.bf16 %v2128_v28, %v2128_v28  ;;  %v6105_v28 = vld [vmem:[#allocation2 + $0x8] sm:$0xff] }
 0xc1d   : > { %v2242_v5 = vpop.f32.mrb[56].mxu0 }
 0xc1e   : > { %v5657_v6 = vpop.f32.mrb[57].mxu0  ;;  %v2243_v23 = vadd.f32 %v5113_v63, %v2242_v5 }
 0xc1f   : > { %v2245_v7 = vpop.f32.mrb[58].mxu0 }
 0xc20   : > { %v5658_v8 = vpop.f32.mrb[59].mxu0  ;;  %v2246_v27 = vadd.f32 %v5113_v63, %v2245_v7  ;;  %v2253_v29 = vpack.c.bf16 %v2243_v23, %v2243_v23  ;;  %v2474_v7 = vsel %vm978_vm8, %v5121_v2, 0 }
 0xc22   : > { %v2254_v31 = vpack.c.bf16 %v2246_v27, %v2246_v27  ;;  %v2379_v33 = vsel %vm978_vm8, %v2253_v29, 0 }
 0xc24   : > { %v2425_v34 = vsel %vm978_vm8, %v2254_v31, 0 }
 0xce3   : > { %v2042_v9 = vpop.f32.mrb[40].mxu1 }
 0xce4   : > { %v6533_v10 = vadd.f32 %v2042_v9, %v6474_v45  ;;  %v5633_v11 = vpop.f32.mrb[41].mxu1 }
 0xce5   : > { %v2045_v12 = vpop.f32.mrb[42].mxu1 }
 0xce6   : > { %v6536_v13 = vadd.f32 %v2045_v12, %v6476_v49  ;;  %v5634_v14 = vpop.f32.mrb[43].mxu1 }
 0xceb   : > { %v2183_v15 = vpop.f32.mrb[44].mxu1 }
 0xcec   : > { %v2184_v59 = vadd.f32 %v5109_v46, %v2183_v15  ;;  %v5649_v62 = vpop.f32.mrb[45].mxu1 }
 0xced   : > { %v2186_v16 = vpop.f32.mrb[46].mxu1 }
 0xcee   : > { %v2251_v18 = vpack.c.bf16 %v2184_v59, %v2184_v59  ;;  %v2187_v20 = vadd.f32 %v5109_v46, %v2186_v16  ;;  %v5650_v21 = vpop.f32.mrb[47].mxu1  ;;  %v5123_v16 = vld [vmem:[%s6285_s25] ss:$0 sm:$0xff] }
 0xcf0   : > { %v2259_v45 = vsel %vm854_vm7, %v2251_v18, 0  ;;  %v2252_v25 = vpack.c.bf16 %v2187_v20, %v2187_v20 }
 0xcf1   : > { %5660 = vmatpush3.bf16.xpose.msra.mxu1 %v2259_v45 }
 0xcf2   : > { %v2305_v49 = vsel %vm854_vm7, %v2252_v25, 0  ;;  %5671 = vmatprep.subr.bf16.mxu1 %v6152_v17 }
 0xcf3   : > { %5666 = vmatpush3.bf16.xpose.msra.mxu0 %v2305_v49 }
 0xcf4   : > { %5677 = vmatprep.subr.bf16.mxu0 %v6152_v17 }
 0xcf8   : > { %5662 = vmatmul.mubr.msk.bf16.vlgmr.msra.gmra.mrb[48].mxu1 %vm854_vm7, %v2249_v30 }
 0xcf9   : > { %5672 = vmatpush3.bf16.msra.mxu1 %v2379_v33  ;;  %5673 = vmatprep.mubr.msk.bf16.mxu1 %vm6153_vm2, %v6152_v17 }
 0xcfa   : > { %5668 = vmatmul.mubr.msk.bf16.vlgmr.msra.gmra.mrb[60].mxu0 %vm854_vm7, %v2250_v32  ;;  %5683 = vmatprep.subr.bf16.mxu1 %v6152_v17 }
 0xcfb   : > { %5678 = vmatpush3.bf16.msra.mxu0 %v2425_v34  ;;  %5679 = vmatprep.mubr.msk.bf16.mxu0 %vm6153_vm2, %v6152_v17 }
 0xcfc   : > { %5689 = vmatprep.subr.bf16.mxu0 %v6152_v17 }
 0xdcb   : > { %v2295_v35 = vpop.f32.mrb[48].mxu1 }
 0xdcc   : > { %v2347_v36 = vmul.f32 0.35355338, %v2295_v35  ;;  %v5663_v37 = vpop.f32.mrb[49].mxu1 }
 0xdcd   : > { %v2298_v38 = vpop.f32.mrb[50].mxu1  ;;  %v2341_v39 = vpop.f32.mrb[60].mxu0 }
 0xdce   : > { %v2348_v40 = vmul.f32 0.35355338, %v2341_v39  ;;  %v5664_v41 = vpop.f32.mrb[51].mxu1  ;;  %v5669_v42 = vpop.f32.mrb[61].mxu0  ;;  %v2349_v43 = vadd.f32 %v2347_v36, %v6352_v19 }
 0xdcf   : > { %v2344_v44 = vpop.f32.mrb[62].mxu0  ;;  %v5981_v41 = vld [vmem:[%s6252_s19 + $0x108] sm:$0xff]   ;;  %v6590_v42 = vld [vmem:[%s6931_s1] sm:$0xff]  }
 0xdd0   : > { %v5670_v47 = vpop.f32.mrb[63].mxu0  ;;  %v2351_v48 = vsel %vm854_vm7, %v2349_v43, -inf  ;;  %v2350_v50 = vadd.f32 %v2348_v40, %v6357_v24  ;;  %v5980_v40 = vld [vmem:[%s6252_s19 + $0x100] sm:$0xff]   ;;  %v5985_v44 = vld [vmem:[%s6252_s19 + $0xc8] sm:$0xff]  }
 0xdd1   : > { %2352 = vmax.xlane.f32.xlu0 %v2351_v48  ;;  %v6599_v47 = vld [vmem:[%s6931_s1 + $0x8] sm:$0xff]   ;;  %v5986_v48 = vld [vmem:[%s6252_s19 + $0x140] sm:$0xff]  }
 0xdd2   : > { %v2354_v51 = vsel %vm854_vm7, %v2350_v50, -inf }
 0xdd3   : > { %2355 = vmax.xlane.f32.xlu1 %v2354_v51 }
 0xe5e   : > { %v2353_v52 = vpop.xlane.xlu0 %2352 }
 0xe5f   : > { %v2357_v53 = vsub.f32 %v2349_v43, %v2353_v52  ;;  %v5984_v43 = vld [vmem:[%s6252_s19 + $0xc0] sm:$0xff]  }
 0xe60   : > { %v2356_v54 = vpop.xlane.xlu1 %2355 }
 0xe61   : > { %v2359_v55 = vmul.f32 1.442695, %v2357_v53  ;;  %v2358_v56 = vsub.f32 %v2350_v50, %v2356_v54 }
 0xe63   : > { %6048 = vpow2.f32 %v2359_v55  ;;  %v2361_v57 = vmul.f32 1.442695, %v2358_v56 }
 0xe65   : > { %6050 = vpow2.f32 %v2361_v57 }
 0xe6d   : > { %v6049_v19 = vpop.eup %6048 }
 0xe6e   : > { %v2363_v58 = vsel %vm854_vm7, %v6049_v19, 0.0 }
 0xe6f   : > { %v6051_v60 = vpop.eup %6050  ;;  %2364 = vadd.xlane.f32.xlu0 %v2363_v58 }
 0xe70   : > { %v2366_v24 = vsel %vm854_vm7, %v6051_v60, 0.0 }
 0xe71   : > { %2367 = vadd.xlane.f32.xlu1 %v2366_v24 }
 0xefc   : > { %v2365_v61 = vpop.xlane.xlu0 %2364 }
 0xefd   : > { %6052 = vrcp.f32 %v2365_v61 }
 0xefe   : > { %v2368_v0 = vpop.xlane.xlu1 %2367 }
 0xeff   : > { %6054 = vrcp.f32 %v2368_v0 }
 0xf07   : > { %v6053_v1 = vpop.eup %6052 }
 0xf08   : > { %v2371_v3 = vmul.f32 %v6053_v1, %v6049_v19 }
 0xf09   : > { %v6055_v4 = vpop.eup %6054 }
 0xf0a   : > { %v2372_v5 = vmul.f32 %v6055_v4, %v6051_v60  ;;  %v2373_v6 = vpack.c.bf16 %v2371_v3, %v2371_v3  ;;  %v5126_v4 = vld [vmem:[%s6270_s5 + $0x2] ss:$0 sm:$0xff] }
 0xf0c   : > { %5674 = vmatmul.mubr.msk.bf16.vlgmr.msra.gmra.mrb[52].mxu1 %vm854_vm7, %v2373_v6  ;;  %v2374_v8 = vpack.c.bf16 %v2372_v5, %v2372_v5 }
 0xf0d   : > { %5684 = vmatpush3.bf16.msra.mxu1 %v2474_v7  ;;  %5685 = vmatprep.mubr.msk.bf16.mxu1 %vm6153_vm2, %v6152_v17 }
 0xf0e   : > { %5680 = vmatmul.mubr.msk.bf16.vlgmr.msra.gmra.mrb[64].mxu0 %vm854_vm7, %v2374_v8  ;;  %5697 = vmatprep.subr.bf16.mxu1 %v5980_v40 }
 0xf0f   : > { %5693 = vmatprep.mubr.msk.bf16.mxu0 %vm6153_vm2, %v6152_v17  ;;  %5690 = vmatpush3.bf16.msra.mxu0 %v5984_v43 }
 0xf10   : > { %5691 = vmatprep.subr.bf16.mxu0 %v6152_v17 }
 0xf13   : > { %5692 = vmatpush3.bf16.msra.mxu0 %v5985_v44 }
 0xf14   : > { %5705 = vmatprep.subr.bf16.mxu0 %v5986_v48 }
 0xfdf   : > { %v2415_v9 = vpop.f32.mrb[52].mxu1 }
 0xfe0   : > { %v5675_v11 = vpop.f32.mrb[53].mxu1 }
 0xfe1   : > { %v2418_v12 = vpop.f32.mrb[54].mxu1  ;;  %v2461_v14 = vpop.f32.mrb[64].mxu0 }
 0xfe2   : > { %v2467_v46 = vpack.c.bf16 %v2461_v14, %v2415_v9  ;;  %v5676_v15 = vpop.f32.mrb[55].mxu1  ;;  %v5681_v59 = vpop.f32.mrb[65].mxu0  ;;  %v5127_v9 = vld [vmem:[%s6270_s5 + $0x3] ss:$0 sm:$0xff] }
 0xfe3   : > { %v2464_v62 = vpop.f32.mrb[66].mxu0  ;;  %v5987_v15 = vld [vmem:[%s6252_s19 + $0x148] sm:$0xff]   ;;  %v5148_v59 = vld [vmem:[%s6276_s20 + $0x10] ss:$0 sm:$0xff] }
 0xfe4   : > { %v5682_v63 = vpop.f32.mrb[67].mxu0  ;;  %5686 = vmatmul.mubr.msk.bf16.vlgmr.msra.gmra.mrb[56].mxu1 %vm854_vm7, %v2467_v46 }
 0xfe5   : > { %5698 = vmatpush3.bf16.msra.mxu1 %v5980_v40  ;;  %5701 = vmatprep.mubr.msk.bf16.mxu1 %vm587_vm1, %v6590_v42 }
 0xfe6   : > { %5699 = vmatprep.subr.bf16.mxu1 %v5981_v41 }
 0xfe9   : > { %5700 = vmatpush3.bf16.msra.mxu1 %v5981_v41 }
 0xfea   : > { %5713 = vmatprep.subr.bf16.mxu1 %v6152_v17 }
 0xfec   : > { %5702 = vmatmul.mubr.msk.bf16.vlgmr.msra.gmra.mrb[60].mxu1 %vm587_vm1, %v6599_v47 }
 0xfed   : > { %5715 = vmatprep.mubr.msk.bf16.mxu1 %vm6153_vm2, %v6152_v17 }
0x10b7   : > { %v2510_v18 = vpop.f32.mrb[56].mxu1 }
0x10b8   : > { %v2517_v20 = vadd.f32 %v2510_v18, %v6533_v10  ;;  %v5687_v21 = vpop.f32.mrb[57].mxu1 }
0x10b9   : > { %v2513_v22 = vpop.f32.mrb[58].mxu1 }
0x10ba   : > { %v2525_v23 = vadd.f32 %v5123_v16, %v2517_v20  ;;  %v2518_v45 = vadd.f32 %v2513_v22, %v6536_v13  ;;  %v5688_v25 = vpop.f32.mrb[59].mxu1 }
0x10bc   : > { %v6573_v27 = vadd.f32 %v6104_v26, %v2525_v23  ;;  %v2526_v49 = vadd.f32 %v5123_v16, %v2518_v45 }
0x10be   : > { %v6575_v29 = vadd.f32 %v6105_v28, %v2526_v49  ;;  %v2533_v30 = vsel %vm587_vm1, %v6573_v27, 0.0  ;;  %v5144_v28 = vld [vmem:[%s6276_s20 + $0xc] ss:$0 sm:$0xff] }
0x10bf   : > { %2534 = vadd.xlane.f32.xlu0 %v2533_v30  ;;  %v5703_v62 = vpop.f32.mrb[60].mxu1 }
0x10c0   : > { %v2536_v10 = vsel %vm587_vm1, %v6575_v29, 0.0  ;;  %v2754_v63 = vadd.f32 %v5703_v62, %v5148_v59  ;;  %v2745_v16 = vpop.f32.mrb[61].mxu1  ;;  %v5989_v62 = vld [vmem:[%s6252_s19 + $0x110] sm:$0xff]  }
0x10c1   : > { %2537 = vadd.xlane.f32.xlu1 %v2536_v10  ;;  %v2746_v18 = vadd.f32 %v5148_v59, %v2745_v16  ;;  %v5704_v20 = vpop.f32.mrb[62].mxu1 }
0x10c2   : > { %v2757_v21 = vadd.f32 %v5704_v20, %v5148_v59  ;;  %v2748_v22 = vpop.f32.mrb[63].mxu1 }
0x10c3   : > { %v2749_v23 = vadd.f32 %v5148_v59, %v2748_v22  ;;  %v5988_v22 = vld [vmem:[%s6252_s19 + $0xd0] sm:$0xff]  }
0x10c4   : > { %v2830_v45 = vpack.c.bf16 %v2757_v21, %v2754_v63 }
0x10c5   : > { %v2829_v25 = vpack.c.bf16 %v2749_v23, %v2746_v18 }
0x10c6   : > { %v2883_v26 = vsel %vm854_vm7, %v2830_v45, 0 }
0x10c7   : > { %v2837_v49 = vsel %vm854_vm7, %v2829_v25, 0 }
0x10c8   : > { %5714 = vmatpush3.bf16.xpose.msra.mxu1 %v2837_v49  ;;  %v5990_v49 = vld [vmem:[%s6252_s19 + $0xd8] sm:$0xff]  }
0x10c9   : > { %5725 = vmatprep.subr.bf16.mxu1 %v6152_v17 }
0x114c   : > { %v2535_v31 = vpop.xlane.xlu0 %2534 }
0x114d   : > { %v2539_v13 = vmul.f32 0.03125, %v2535_v31 }
0x114e   : > { %v2538_v32 = vpop.xlane.xlu1 %2537 }
0x114f   : > { %v2541_v33 = vsub.f32 %v6573_v27, %v2539_v13  ;;  %v2540_v34 = vmul.f32 0.03125, %v2538_v32 }
0x1151   : > { %v2542_v35 = vsub.f32 %v6575_v29, %v2540_v34  ;;  %v2543_v36 = vmul.f32 %v2541_v33, %v2541_v33 }
0x1153   : > { %v2545_v37 = vsel %vm587_vm1, %v2543_v36, 0.0  ;;  %v2544_v38 = vmul.f32 %v2542_v35, %v2542_v35  ;;  %v5155_v36 = vld [vmem:[%s6276_s20 + $0x14] ss:$0 sm:$0xff] }
0x1154   : > { %2546 = vadd.xlane.f32.xlu0 %v2545_v37 }
0x1155   : > { %v2548_v39 = vsel %vm587_vm1, %v2544_v38, 0.0 }
0x1156   : > { %2549 = vadd.xlane.f32.xlu1 %v2548_v39 }
0x11e1   : > { %v2547_v50 = vpop.xlane.xlu0 %2546 }
0x11e2   : > { %v2551_v51 = vmul.f32 0.032258064, %v2547_v50 }
0x11e3   : > { %v2550_v52 = vpop.xlane.xlu1 %2549 }
0x11e4   : > { %6056 = vrsqrt.f32 %v2551_v51  ;;  %v2552_v53 = vmul.f32 0.032258064, %v2550_v52  ;;  %vm2555_vm9 = vcmp.eq.f32.partialorder %v2551_v51, inf  ;;  %v2558_v56 = vand.u32 2147483648, %v2551_v51 }
0x11e5   : > { %vm2557_vm10 = vcmp.eq.f32.partialorder %v2551_v51, 0.0 }
0x11e6   : > { %6058 = vrsqrt.f32 %v2552_v53  ;;  %vm2562_vm11 = vcmp.eq.f32.partialorder %v2552_v53, inf  ;;  %v2565_v61 = vand.u32 2147483648, %v2552_v53  ;;  %vm2564_vm12 = vcmp.eq.f32.partialorder %v2552_v53, 0.0 }
0x11ee   : > { %v6057_v54 = vpop.eup %6056 }
0x11ef   : > { %v2554_v55 = vmul.f32 %v6057_v54, %v2551_v51 }
0x11f0   : > { %v6059_v57 = vpop.eup %6058 }
0x11f1   : > { %v2556_v19 = vsel %vm2555_vm9, %v2551_v51, %v2554_v55  ;;  %v2561_v60 = vmul.f32 %v6059_v57, %v2552_v53 }
0x11f2   : > { %v2559_v58 = vsel %vm2557_vm10, %v2558_v56, %v2556_v19  ;;  %v6644_v19 = vld [vmem:[%s6933_s3 + $0x1] ss:$0 sm:$0xff] }
0x11f3   : > { %v2567_v24 = vadd.f32 1e-06, %v2559_v58  ;;  %v2563_v0 = vsel %vm2562_vm11, %v2552_v53, %v2561_v60  ;;  %v6639_v53 = vld [vmem:[%s6933_s3] ss:$0 sm:$0xff] }
0x11f4   : > { %v2566_v1 = vsel %vm2564_vm12, %v2565_v61, %v2563_v0 }
0x11f5   : > { %6060 = vrcp.f32 %v2567_v24  ;;  %v2568_v2 = vadd.f32 1e-06, %v2566_v1 }
0x11f7   : > { %6062 = vrcp.f32 %v2568_v2 }
0x11ff   : > { %v6061_v3 = vpop.eup %6060 }
0x1200   : > { %v2573_v5 = vmul.f32 %v6061_v3, %v2541_v33 }
0x1201   : > { %v6063_v6 = vpop.eup %6062 }
0x1202   : > { %v2574_v7 = vmul.f32 %v6063_v6, %v2542_v35  ;;  %v2581_v8 = vmul.f32 %v5126_v4, %v2573_v5 }
0x1204   : > { %v2582_v11 = vmul.f32 %v5126_v4, %v2574_v7  ;;  %v2589_v12 = vadd.f32 %v5127_v9, %v2581_v8 }
0x1206   : > { %v2590_v14 = vadd.f32 %v5127_v9, %v2582_v11 }
0x1208   : > { %v6610_v46 = vpack.c.bf16 %v2590_v14, %v2589_v12 }
0x120a   : > { %5694 = vmatmul.mubr.msk.bf16.vlgmr.msra.gmra.mrb[68].mxu0 %vm587_vm1, %v6610_v46 }
0x120b   : > { %5706 = vmatpush3.bf16.msra.mxu0 %v5986_v48  ;;  %5709 = vmatprep.mubr.msk.bf16.mxu0 %vm587_vm1, %v6590_v42 }
0x120c   : > { %5707 = vmatprep.subr.bf16.mxu0 %v5987_v15 }
0x120f   : > { %5708 = vmatpush3.bf16.msra.mxu0 %v5987_v15 }
0x1210   : > { %5719 = vmatprep.subr.bf16.mxu0 %v6152_v17 }
0x1212   : > { %5710 = vmatmul.mubr.msk.bf16.vlgmr.msra.gmra.mrb[72].mxu0 %vm587_vm1, %v6599_v47 }
0x1213   : > { %5721 = vmatprep.mubr.msk.bf16.mxu0 %vm6153_vm2, %v6152_v17 }
0x1218   : > { %5720 = vmatpush3.bf16.xpose.msra.mxu0 %v2883_v26  ;;  %v5991_v26 = vld [vmem:[%s6252_s19 + $0x118] sm:$0xff]  }
0x1219   : > { %5731 = vmatprep.subr.bf16.mxu0 %v6152_v17 }
0x12dd   : > { %v2670_v30 = vpop.f32.mrb[68].mxu0 }
0x12de   : > { %v2671_v10 = vadd.f32 %v5144_v28, %v2670_v30  ;;  %v5695_v31 = vpop.f32.mrb[69].mxu0  ;;  %v5993_v30 = vld [vmem:[%s6252_s19 + $0x158] sm:$0xff]  }
0x12df   : > { %v2673_v13 = vpop.f32.mrb[70].mxu0 }
0x12e0   : > { %v2827_v32 = vpack.c.bf16 %v2671_v10, %v2671_v10  ;;  %v2674_v33 = vadd.f32 %v5144_v28, %v2673_v13  ;;  %v5696_v34 = vpop.f32.mrb[71].mxu0  ;;  %v5992_v28 = vld [vmem:[%s6252_s19 + $0x150] sm:$0xff]  }
0x12e2   : > { %v2828_v35 = vpack.c.bf16 %v2674_v33, %v2674_v33  ;;  %5716 = vmatmul.mubr.msk.bf16.vlgmr.msra.gmra.mrb[64].mxu1 %vm854_vm7, %v2827_v32 }
0x12e3   : > { %5727 = vmatprep.mubr.msk.bf16.mxu1 %vm6153_vm2, %v6152_v17 }
0x12e4   : > { %5722 = vmatmul.mubr.msk.bf16.vlgmr.msra.gmra.mrb[76].mxu0 %vm854_vm7, %v2828_v35 }
0x12e5   : > { %v5711_v37 = vpop.f32.mrb[72].mxu0  ;;  %5733 = vmatprep.mubr.msk.bf16.mxu0 %vm6153_vm2, %v6152_v17 }
0x12e6   : > { %v2821_v38 = vadd.f32 %v5711_v37, %v5155_v36  ;;  %v2812_v39 = vpop.f32.mrb[73].mxu0 }
0x12e7   : > { %v2813_v40 = vadd.f32 %v5155_v36, %v2812_v39  ;;  %v5712_v41 = vpop.f32.mrb[74].mxu0 }
0x12e8   : > { %v2824_v43 = vadd.f32 %v5712_v41, %v5155_v36  ;;  %v2815_v44 = vpop.f32.mrb[75].mxu0 }
0x12e9   : > { %v2816_v48 = vadd.f32 %v5155_v36, %v2815_v44 }
0x12ea   : > { %v2832_v50 = vpack.c.bf16 %v2824_v43, %v2821_v38  ;;  %v5184_v43 = vld [vmem:[%s6276_s20 + $0x11] ss:$0 sm:$0xff] }
0x12eb   : > { %v2831_v51 = vpack.c.bf16 %v2816_v48, %v2813_v40 }
0x12ec   : > { %5732 = vmatpush3.bf16.msra.mxu0 %v2832_v50 }
0x12ed   : > { %5726 = vmatpush3.bf16.msra.mxu1 %v2831_v51  ;;  %5745 = vmatprep.subr.bf16.mxu0 %v5989_v62 }
0x12ee   : > { %5737 = vmatprep.subr.bf16.mxu1 %v6152_v17 }
0x13b5   : > { %v2873_v52 = vpop.f32.mrb[64].mxu1 }
0x13b6   : > { %v2925_v54 = vmul.f32 0.35355338, %v2873_v52  ;;  %v5717_v55 = vpop.f32.mrb[65].mxu1 }
0x13b7   : > { %v2876_v56 = vpop.f32.mrb[66].mxu1  ;;  %v2919_v57 = vpop.f32.mrb[76].mxu0 }
0x13b8   : > { %v2926_v58 = vmul.f32 0.35355338, %v2919_v57  ;;  %v5718_v60 = vpop.f32.mrb[67].mxu1  ;;  %v5723_v24 = vpop.f32.mrb[77].mxu0  ;;  %v2927_v61 = vadd.f32 %v6639_v53, %v2925_v54 }
0x13b9   : > { %v2922_v0 = vpop.f32.mrb[78].mxu0  ;;  %v5180_v60 = vld [vmem:[%s6276_s20 + $0xd] ss:$0 sm:$0xff] }
0x13ba   : > { %v5724_v1 = vpop.f32.mrb[79].mxu0  ;;  %v2930_v2 = vsel %vm2929_vm13, %v2927_v61, -inf  ;;  %v2928_v3 = vadd.f32 %v6644_v19, %v2926_v58 }
0x13bb   : > { %2931 = vmax.xlane.f32.xlu1 %v2930_v2 }
0x13bc   : > { %v2933_v4 = vsel %vm2929_vm13, %v2928_v3, -inf }
0x13bd   : > { %2934 = vmax.xlane.f32.xlu0 %v2933_v4  ;;  %v5189_v4 = vld [vmem:[%s6276_s20 + $0x15] ss:$0 sm:$0xff] }
0x1448   : > { %v2932_v5 = vpop.xlane.xlu1 %2931 }
0x1449   : > { %v2936_v6 = vsub.f32 %v2927_v61, %v2932_v5 }
0x144a   : > { %v2935_v7 = vpop.xlane.xlu0 %2934 }
0x144b   : > { %v2938_v8 = vmul.f32 1.442695, %v2936_v6  ;;  %v2937_v9 = vsub.f32 %v2928_v3, %v2935_v7 }
0x144d   : > { %6064 = vpow2.f32 %v2938_v8  ;;  %v2940_v11 = vmul.f32 1.442695, %v2937_v9 }
0x144f   : > { %6066 = vpow2.f32 %v2940_v11 }
0x1457   : > { %v6065_v12 = vpop.eup %6064 }
0x1458   : > { %v2942_v14 = vsel %vm2929_vm13, %v6065_v12, 0.0 }
0x1459   : > { %v6067_v15 = vpop.eup %6066  ;;  %2943 = vadd.xlane.f32.xlu1 %v2942_v14 }
0x145a   : > { %v2945_v59 = vsel %vm2929_vm13, %v6067_v15, 0.0 }
0x145b   : > { %2946 = vadd.xlane.f32.xlu0 %v2945_v59 }
0x14e6   : > { %v2944_v63 = vpop.xlane.xlu1 %2943 }
0x14e7   : > { %6068 = vrcp.f32 %v2944_v63 }
0x14e8   : > { %v2947_v16 = vpop.xlane.xlu0 %2946 }
0x14e9   : > { %6070 = vrcp.f32 %v2947_v16 }
0x14f1   : > { %v6069_v18 = vpop.eup %6068 }
0x14f2   : > { %v2950_v20 = vmul.f32 %v6069_v18, %v6065_v12 }
0x14f3   : > { %v6071_v21 = vpop.eup %6070 }
0x14f4   : > { %v2951_v23 = vmul.f32 %v6071_v21, %v6067_v15  ;;  %v2952_v45 = vpack.c.bf16 %v2950_v20, %v2950_v20 }
0x14f6   : > { %5728 = vmatmul.mubr.msk.bf16.vlgmr.msra.gmra.mrb[68].mxu1 %vm2929_vm13, %v2952_v45  ;;  %v2953_v25 = vpack.c.bf16 %v2951_v23, %v2951_v23 }
0x14f7   : > { %5738 = vmatpush3.bf16.msra.mxu1 %v5988_v22  ;;  %5741 = vmatprep.mubr.msk.bf16.mxu1 %vm6153_vm2, %v6152_v17 }
0x14f8   : > { %5734 = vmatmul.mubr.msk.bf16.vlgmr.msra.gmra.mrb[80].mxu0 %vm2929_vm13, %v2953_v25  ;;  %5739 = vmatprep.subr.bf16.mxu1 %v6152_v17 }
0x14f9   : > { %5746 = vmatpush3.bf16.msra.mxu0 %v5989_v62  ;;  %5749 = vmatprep.mubr.msk.bf16.mxu0 %vm587_vm1, %v6590_v42 }
0x14fa   : > { %5747 = vmatprep.subr.bf16.mxu0 %v5991_v26 }
0x14fb   : > { %5740 = vmatpush3.bf16.msra.mxu1 %v5990_v49 }
0x14fc   : > { %5753 = vmatprep.subr.bf16.mxu1 %v5992_v28 }
0x14fd   : > { %5748 = vmatpush3.bf16.msra.mxu0 %v5991_v26 }
0x14fe   : > { %5742 = vmatmul.mubr.msk.bf16.vlgmr.msra.gmra.mrb[72].mxu1 %vm587_vm1, %v6610_v46  ;;  %5761 = vmatprep.subr.bf16.mxu0 %v6152_v17 }
0x14ff   : > { %5757 = vmatprep.mubr.msk.bf16.mxu1 %vm587_vm1, %v6590_v42  ;;  %5754 = vmatpush3.bf16.msra.mxu1 %v5992_v28 }
0x1500   : > { %5750 = vmatmul.mubr.msk.bf16.vlgmr.msra.gmra.mrb[84].mxu0 %vm587_vm1, %v6599_v47  ;;  %5755 = vmatprep.subr.bf16.mxu1 %v5993_v30 }
0x1501   : > { %5763 = vmatprep.mubr.msk.bf16.mxu0 %vm6153_vm2, %v6152_v17 }
0x1503   : > { %5756 = vmatpush3.bf16.msra.mxu1 %v5993_v30 }
0x1504   : > { %5767 = vmatprep.subr.bf16.mxu1 %v6152_v17 }
0x1506   : > { %5758 = vmatmul.mubr.msk.bf16.vlgmr.msra.gmra.mrb[76].mxu1 %vm587_vm1, %v6599_v47 }
0x1507   : > { %5769 = vmatprep.mubr.msk.bf16.mxu1 %vm6153_vm2, %v6152_v17 }
0x15c9   : > { %v6679_v10 = vpop.f32.mrb[68].mxu1 }
0x15ca   : > { %v5729_v31 = vpop.f32.mrb[69].mxu1 }
0x15cb   : > { %v2994_v13 = vpop.f32.mrb[70].mxu1  ;;  %v6681_v32 = vpop.f32.mrb[80].mxu0 }
0x15cc   : > { %v3040_v33 = vpack.c.bf16 %v6681_v32, %v6679_v10  ;;  %v5730_v34 = vpop.f32.mrb[71].mxu1  ;;  %v5735_v35 = vpop.f32.mrb[81].mxu0 }
0x15cd   : > { %v3037_v36 = vpop.f32.mrb[82].mxu0 }
0x15ce   : > { %v5736_v37 = vpop.f32.mrb[83].mxu0 }
0x15d1   : > { %v3116_v38 = vpop.f32.mrb[72].mxu1 }
0x15d2   : > { %v5743_v39 = vpop.f32.mrb[73].mxu1  ;;  %v3117_v1 = vadd.f32 %v5180_v60, %v3116_v38 }
0x15d3   : > { %v3119_v40 = vpop.f32.mrb[74].mxu1  ;;  %v5751_v41 = vpop.f32.mrb[84].mxu0 }
0x15d4   : > { %v5744_v44 = vpop.f32.mrb[75].mxu1  ;;  %v3175_v48 = vpop.f32.mrb[85].mxu0  ;;  %v3184_v51 = vadd.f32 %v5751_v41, %v5184_v43  ;;  %v3120_v0 = vadd.f32 %v5180_v60, %v3119_v40  ;;  %v3257_v3 = vpack.c.bf16 %v3117_v1, %v3117_v1 }
0x15d5   : > { %v5752_v50 = vpop.f32.mrb[86].mxu0  ;;  %v3176_v55 = vadd.f32 %v5184_v43, %v3175_v48 }
0x15d6   : > { %v3187_v52 = vadd.f32 %v5752_v50, %v5184_v43  ;;  %v3178_v54 = vpop.f32.mrb[87].mxu0  ;;  %v3258_v2 = vpack.c.bf16 %v3120_v0, %v3120_v0  ;;  %v5164_v50 = vld [vmem:[%s6246_s15 + $0x10] sm:$0xf] }
0x15d7   : > { %v3179_v56 = vadd.f32 %v5184_v43, %v3178_v54 }
0x15d8   : > { %v3260_v57 = vpack.c.bf16 %v3187_v52, %v3184_v51 }
0x15d9   : > { %v3259_v58 = vpack.c.bf16 %v3179_v56, %v3176_v55  ;;  %v5759_v5 = vpop.f32.mrb[76].mxu1  ;;  %v5198_v55 = vld [vmem:[%s6246_s15 + $0x14] sm:$0xf] }
0x15da   : > { %v3313_v24 = vsel %vm854_vm7, %v3260_v57, 0  ;;  %v3251_v6 = vadd.f32 %v5759_v5, %v5189_v4  ;;  %v3242_v7 = vpop.f32.mrb[77].mxu1  ;;  %v3523_v57 = vsel %vm978_vm8, %v5164_v50, 0  ;;  %v5225_v50 = vld [vmem:[%s6276_s20 + $0x16] ss:$0 sm:$0xff] }
0x15db   : > { %5768 = vmatpush3.bf16.xpose.msra.mxu1 %v3313_v24  ;;  %v3267_v61 = vsel %vm854_vm7, %v3259_v58, 0  ;;  %v3243_v8 = vadd.f32 %v5189_v4, %v3242_v7  ;;  %v5760_v9 = vpop.f32.mrb[78].mxu1  ;;  %v5994_v58 = vld [vmem:[%s6252_s19 + $0x120] sm:$0xff]   ;;  %v3476_v24 = vsel %vm978_vm8, %v5198_v55, 0  ;;  %v5997_v7 = vld [vmem:[%s6252_s19 + $0xe8] sm:$0xff]  }
0x15dc   : > { %5762 = vmatpush3.bf16.xpose.msra.mxu0 %v3267_v61  ;;  %5779 = vmatprep.subr.bf16.mxu1 %v6152_v17  ;;  %v3254_v11 = vadd.f32 %v5760_v9, %v5189_v4  ;;  %v3245_v12 = vpop.f32.mrb[79].mxu1  ;;  %v5995_v61 = vld [vmem:[%s6252_s19 + $0x128] sm:$0xff]  }
0x15dd   : > { %5773 = vmatprep.subr.bf16.mxu0 %v6152_v17  ;;  %v3246_v14 = vadd.f32 %v5189_v4, %v3245_v12 }
0x15de   : > { %v3262_v15 = vpack.c.bf16 %v3254_v11, %v3251_v6 }
0x15df   : > { %v3261_v59 = vpack.c.bf16 %v3246_v14, %v3243_v8  ;;  %v5998_v8 = vld [vmem:[%s6252_s19 + $0x160] sm:$0xff]   ;;  %v5999_v14 = vld [vmem:[%s6252_s19 + $0x168] sm:$0xff]  }
0x15e2   : > { %5770 = vmatmul.mubr.msk.bf16.vlgmr.msra.gmra.mrb[80].mxu1 %vm854_vm7, %v3258_v2 }
0x15e3   : > { %5764 = vmatmul.mubr.msk.bf16.vlgmr.msra.gmra.mrb[88].mxu0 %vm854_vm7, %v3257_v3  ;;  %5781 = vmatprep.mubr.msk.bf16.mxu1 %vm6153_vm2, %v6152_v17 }
0x15e4   : > { %5775 = vmatprep.mubr.msk.bf16.mxu0 %vm6153_vm2, %v6152_v17  ;;  %5780 = vmatpush3.bf16.msra.mxu1 %v3262_v15 }
0x15e5   : > { %5774 = vmatpush3.bf16.msra.mxu0 %v3261_v59  ;;  %5791 = vmatprep.subr.bf16.mxu1 %v6152_v17  ;;  %v5220_v59 = vld [vmem:[%s6276_s20 + $0x12] ss:$0 sm:$0xff] }
0x15e6   : > { %5785 = vmatprep.subr.bf16.mxu0 %v6152_v17 }
0x16b5   : > { %v3349_v62 = vpop.f32.mrb[80].mxu1 }
0x16b6   : > { %v3356_v63 = vmul.f32 0.35355338, %v3349_v62  ;;  %v3303_v16 = vpop.f32.mrb[88].mxu0  ;;  %v5771_v18 = vpop.f32.mrb[81].mxu1 }
0x16b7   : > { %v3355_v20 = vmul.f32 0.35355338, %v3303_v16  ;;  %v5765_v21 = vpop.f32.mrb[89].mxu0  ;;  %v3352_v22 = vpop.f32.mrb[82].mxu1 }
0x16b8   : > { %v3306_v23 = vpop.f32.mrb[90].mxu0  ;;  %v5772_v45 = vpop.f32.mrb[83].mxu1  ;;  %v3358_v25 = vadd.f32 %v6644_v19, %v3356_v63 }
0x16b9   : > { %v5766_v26 = vpop.f32.mrb[91].mxu0  ;;  %v3357_v49 = vadd.f32 %v6639_v53, %v3355_v20 }
0x16ba   : > { %v3362_v28 = vsel %vm2929_vm13, %v3358_v25, -inf }
0x16bb   : > { %3363 = vmax.xlane.f32.xlu1 %v3362_v28  ;;  %v3359_v30 = vsel %vm2929_vm13, %v3357_v49, -inf }
0x16bc   : > { %3360 = vmax.xlane.f32.xlu0 %v3359_v30 }
0x1748   : > { %v3364_v31 = vpop.xlane.xlu1 %3363 }
0x1749   : > { %v3366_v13 = vsub.f32 %v3358_v25, %v3364_v31  ;;  %v3361_v34 = vpop.xlane.xlu0 %3360 }
0x174a   : > { %v3365_v35 = vsub.f32 %v3357_v49, %v3361_v34 }
0x174b   : > { %v3369_v36 = vmul.f32 1.442695, %v3366_v13 }
0x174c   : > { %v3367_v37 = vmul.f32 1.442695, %v3365_v35 }
0x174d   : > { %6072 = vpow2.f32 %v3369_v36  ;;  %v5216_v36 = vld [vmem:[%s6276_s20 + $0xe] ss:$0 sm:$0xff] }
0x174e   : > { %6074 = vpow2.f32 %v3367_v37 }
0x1757   : > { %v6073_v38 = vpop.eup %6072 }
0x1758   : > { %v6075_v39 = vpop.eup %6074  ;;  %v3374_v40 = vsel %vm2929_vm13, %v6073_v38, 0.0 }
0x1759   : > { %3375 = vadd.xlane.f32.xlu1 %v3374_v40  ;;  %v3371_v41 = vsel %vm2929_vm13, %v6075_v39, 0.0 }
0x175a   : > { %3372 = vadd.xlane.f32.xlu0 %v3371_v41 }
0x17e6   : > { %v3376_v43 = vpop.xlane.xlu1 %3375 }
0x17e7   : > { %6076 = vrcp.f32 %v3376_v43  ;;  %v3373_v44 = vpop.xlane.xlu0 %3372 }
0x17e8   : > { %6078 = vrcp.f32 %v3373_v44 }
0x17f1   : > { %v6077_v48 = vpop.eup %6076 }
0x17f2   : > { %v6079_v51 = vpop.eup %6078  ;;  %v3380_v52 = vmul.f32 %v6077_v48, %v6073_v38 }
0x17f3   : > { %v3379_v54 = vmul.f32 %v6079_v51, %v6075_v39 }
0x17f4   : > { %v3382_v56 = vpack.c.bf16 %v3380_v52, %v3380_v52 }
0x17f5   : > { %v3381_v60 = vpack.c.bf16 %v3379_v54, %v3379_v54 }
0x17f6   : > { %5782 = vmatmul.mubr.msk.bf16.vlgmr.msra.gmra.mrb[84].mxu1 %vm2929_vm13, %v3382_v56 }
0x17f7   : > { %5776 = vmatmul.mubr.msk.bf16.vlgmr.msra.gmra.mrb[92].mxu0 %vm2929_vm13, %v3381_v60  ;;  %5792 = vmatpush3.bf16.msra.mxu1 %v3523_v57 }
0x17f8   : > { %5793 = vmatprep.mubr.msk.bf16.mxu1 %vm6153_vm2, %v6152_v17  ;;  %5805 = vmatprep.subr.bf16.mxu1 %v5994_v58 }
0x17f9   : > { %5786 = vmatpush3.bf16.msra.mxu0 %v3476_v24  ;;  %5787 = vmatprep.mubr.msk.bf16.mxu0 %vm6153_vm2, %v6152_v17 }
0x17fa   : > { %5797 = vmatprep.subr.bf16.mxu0 %v6152_v17 }
0x17fe   : > { %5794 = vmatmul.mubr.msk.bf16.vlgmr.msra.gmra.mrb[88].mxu1 %vm854_vm7, %v3040_v33  ;;  %v5996_v33 = vld [vmem:[%s6252_s19 + $0xe0] sm:$0xff]  }
0x17ff   : > { %5806 = vmatpush3.bf16.msra.mxu1 %v5994_v58  ;;  %5809 = vmatprep.mubr.msk.bf16.mxu1 %vm587_vm1, %v6590_v42 }
0x1800   : > { %5807 = vmatprep.subr.bf16.mxu1 %v5995_v61 }
0x1803   : > { %5808 = vmatpush3.bf16.msra.mxu1 %v5995_v61 }
0x1804   : > { %5821 = vmatprep.subr.bf16.mxu1 %v6152_v17 }
0x1806   : > { %5810 = vmatmul.mubr.msk.bf16.vlgmr.msra.gmra.mrb[92].mxu1 %vm587_vm1, %v6599_v47 }
0x1807   : > { %5823 = vmatprep.mubr.msk.bf16.mxu1 %vm6153_vm2, %v6152_v17 }
0x18c9   : > { %v3463_v0 = vpop.f32.mrb[84].mxu1 }
0x18ca   : > { %v3420_v10 = vpop.f32.mrb[92].mxu0  ;;  %v5783_v32 = vpop.f32.mrb[85].mxu1 }
0x18cb   : > { %v3469_v1 = vpack.c.bf16 %v3463_v0, %v3420_v10  ;;  %v5777_v2 = vpop.f32.mrb[93].mxu0  ;;  %v3466_v3 = vpop.f32.mrb[86].mxu1 }
0x18cc   : > { %v3423_v4 = vpop.f32.mrb[94].mxu0  ;;  %v5784_v5 = vpop.f32.mrb[87].mxu1 }
0x18cd   : > { %v5778_v6 = vpop.f32.mrb[95].mxu0  ;;  %5788 = vmatmul.mubr.msk.bf16.vlgmr.msra.gmra.mrb[96].mxu0 %vm854_vm7, %v3469_v1 }
0x18ce   : > { %5798 = vmatpush3.bf16.msra.mxu0 %v5996_v33  ;;  %5801 = vmatprep.mubr.msk.bf16.mxu0 %vm6153_vm2, %v6152_v17 }
0x18cf   : > { %5799 = vmatprep.subr.bf16.mxu0 %v6152_v17 }
0x18d1   : > { %v3559_v9 = vpop.f32.mrb[88].mxu1 }
0x18d2   : > { %v5795_v11 = vpop.f32.mrb[89].mxu1  ;;  %5800 = vmatpush3.bf16.msra.mxu0 %v5997_v7 }
0x18d3   : > { %v3562_v12 = vpop.f32.mrb[90].mxu1  ;;  %5813 = vmatprep.subr.bf16.mxu0 %v5998_v8 }
0x18d4   : > { %v5796_v15 = vpop.f32.mrb[91].mxu1 }
0x18d5   : > { %5802 = vmatmul.mubr.msk.bf16.vlgmr.msra.gmra.mrb[100].mxu0 %vm587_vm1, %v6610_v46 }
0x18d6   : > { %5814 = vmatpush3.bf16.msra.mxu0 %v5998_v8  ;;  %5817 = vmatprep.mubr.msk.bf16.mxu0 %vm587_vm1, %v6590_v42 }
0x18d7   : > { %5815 = vmatprep.subr.bf16.mxu0 %v5999_v14 }
0x18d9   : > { %v5811_v62 = vpop.f32.mrb[92].mxu1 }
0x18da   : > { %v3707_v63 = vadd.f32 %v5811_v62, %v5220_v59  ;;  %5816 = vmatpush3.bf16.msra.mxu0 %v5999_v14  ;;  %v3698_v16 = vpop.f32.mrb[93].mxu1 }
0x18db   : > { %v3699_v18 = vadd.f32 %v5220_v59, %v3698_v16  ;;  %v5812_v20 = vpop.f32.mrb[94].mxu1  ;;  %5827 = vmatprep.subr.bf16.mxu0 %v6152_v17 }
0x18dc   : > { %v3710_v21 = vadd.f32 %v5812_v20, %v5220_v59  ;;  %v3701_v22 = vpop.f32.mrb[95].mxu1 }
0x18dd   : > { %v3702_v23 = vadd.f32 %v5220_v59, %v3701_v22  ;;  %5818 = vmatmul.mubr.msk.bf16.vlgmr.msra.gmra.mrb[104].mxu0 %vm587_vm1, %v6599_v47 }
0x18de   : > { %v3783_v45 = vpack.c.bf16 %v3710_v21, %v3707_v63  ;;  %5829 = vmatprep.mubr.msk.bf16.mxu0 %vm6153_vm2, %v6152_v17 }
0x18df   : > { %v3782_v25 = vpack.c.bf16 %v3702_v23, %v3699_v18 }
0x18e0   : > { %v3836_v49 = vsel %vm854_vm7, %v3783_v45, 0 }
0x18e1   : > { %v3790_v26 = vsel %vm854_vm7, %v3782_v25, 0  ;;  %v5234_v25 = vld [vmem:[%s6246_s15 + $0x18] sm:$0xf] }
0x18e2   : > { %5822 = vmatpush3.bf16.xpose.msra.mxu1 %v3790_v26 }
0x18e3   : > { %5828 = vmatpush3.bf16.xpose.msra.mxu0 %v3836_v49  ;;  %5833 = vmatprep.subr.bf16.mxu1 %v6152_v17 }
0x18e4   : > { %5839 = vmatprep.subr.bf16.mxu0 %v6152_v17 }
0x19a0   : > { %v3512_v28 = vpop.f32.mrb[96].mxu0 }
0x19a1   : > { %v6752_v30 = vadd.f32 %v3559_v9, %v3512_v28  ;;  %v5789_v31 = vpop.f32.mrb[97].mxu0 }
0x19a2   : > { %v3515_v13 = vpop.f32.mrb[98].mxu0 }
0x19a3   : > { %v6754_v34 = vadd.f32 %v3562_v12, %v3515_v13  ;;  %v5790_v35 = vpop.f32.mrb[99].mxu0  ;;  %v3999_v13 = vsel %vm978_vm8, %v5234_v25, 0 }
0x19a4   : > { %v6000_v35 = vld [vmem:[%s6252_s19 + $0xf0] sm:$0xff]  }
0x19a8   : > { %v3639_v37 = vpop.f32.mrb[100].mxu0 }
0x19a9   : > { %v3640_v38 = vadd.f32 %v5216_v36, %v3639_v37  ;;  %v5803_v39 = vpop.f32.mrb[101].mxu0  ;;  %v6001_v37 = vld [vmem:[%s6252_s19 + $0xf8] sm:$0xff]  }
0x19aa   : > { %v3642_v40 = vpop.f32.mrb[102].mxu0 }
0x19ab   : > { %v3780_v41 = vpack.c.bf16 %v3640_v38, %v3640_v38  ;;  %v3643_v43 = vadd.f32 %v5216_v36, %v3642_v40  ;;  %v5804_v44 = vpop.f32.mrb[103].mxu0  ;;  %v6002_v38 = vld [vmem:[%s6252_s19 + $0x130] sm:$0xff]  }
0x19ad   : > { %v3781_v48 = vpack.c.bf16 %v3643_v43, %v3643_v43  ;;  %5824 = vmatmul.mubr.msk.bf16.vlgmr.msra.gmra.mrb[96].mxu1 %vm854_vm7, %v3780_v41 }
0x19ae   : > { %5835 = vmatprep.mubr.msk.bf16.mxu1 %vm6153_vm2, %v6152_v17 }
0x19af   : > { %5830 = vmatmul.mubr.msk.bf16.vlgmr.msra.gmra.mrb[108].mxu0 %vm854_vm7, %v3781_v48 }
0x19b0   : > { %v5819_v51 = vpop.f32.mrb[104].mxu0  ;;  %5841 = vmatprep.mubr.msk.bf16.mxu0 %vm6153_vm2, %v6152_v17 }
0x19b1   : > { %v3774_v52 = vadd.f32 %v5819_v51, %v5225_v50  ;;  %v3765_v54 = vpop.f32.mrb[105].mxu0  ;;  %v6003_v51 = vld [vmem:[%s6252_s19 + $0x138] sm:$0xff]  }
0x19b2   : > { %v3766_v55 = vadd.f32 %v5225_v50, %v3765_v54  ;;  %v5820_v56 = vpop.f32.mrb[106].mxu0 }
0x19b3   : > { %v3777_v57 = vadd.f32 %v5820_v56, %v5225_v50  ;;  %v3768_v58 = vpop.f32.mrb[107].mxu0 }
0x19b4   : > { %v3769_v60 = vadd.f32 %v5225_v50, %v3768_v58  ;;  %v6004_v58 = vld [vmem:[%s6252_s19 + $0x170] sm:$0xff]  }
0x19b5   : > { %v3785_v24 = vpack.c.bf16 %v3777_v57, %v3774_v52 }
0x19b6   : > { %v3784_v61 = vpack.c.bf16 %v3769_v60, %v3766_v55  ;;  %v6005_v60 = vld [vmem:[%s6252_s19 + $0x178] sm:$0xff]  }
0x19b7   : > { %5840 = vmatpush3.bf16.msra.mxu0 %v3785_v24 }
0x19b8   : > { %5834 = vmatpush3.bf16.msra.mxu1 %v3784_v61  ;;  %5851 = vmatprep.subr.bf16.mxu0 %v6152_v17 }
0x19b9   : > { %5845 = vmatprep.subr.bf16.mxu1 %v6152_v17 }
0x1a80   : > { %v3826_v0 = vpop.f32.mrb[96].mxu1 }
0x1a81   : > { %v3878_v10 = vmul.f32 0.35355338, %v3826_v0  ;;  %v5825_v32 = vpop.f32.mrb[97].mxu1 }
0x1a82   : > { %v3829_v33 = vpop.f32.mrb[98].mxu1  ;;  %v3872_v1 = vpop.f32.mrb[108].mxu0 }
0x1a83   : > { %v3879_v2 = vmul.f32 0.35355338, %v3872_v1  ;;  %v5826_v3 = vpop.f32.mrb[99].mxu1  ;;  %v5831_v4 = vpop.f32.mrb[109].mxu0  ;;  %v3880_v5 = vadd.f32 %v6639_v53, %v3878_v10  ;;  %v5255_v1 = vld [vmem:[%s6276_s20 + $0x13] ss:$0 sm:$0xff] }
0x1a84   : > { %v3875_v6 = vpop.f32.mrb[110].mxu0 }
0x1a85   : > { %v5832_v7 = vpop.f32.mrb[111].mxu0  ;;  %v3882_v8 = vsel %vm2929_vm13, %v3880_v5, -inf  ;;  %v3881_v9 = vadd.f32 %v6644_v19, %v3879_v2 }
0x1a86   : > { %3883 = vmax.xlane.f32.xlu0 %v3882_v8 }
0x1a87   : > { %v3885_v11 = vsel %vm2929_vm13, %v3881_v9, -inf }
0x1a88   : > { %3886 = vmax.xlane.f32.xlu1 %v3885_v11 }
0x1b13   : > { %v3884_v12 = vpop.xlane.xlu0 %3883 }
0x1b14   : > { %v3888_v14 = vsub.f32 %v3880_v5, %v3884_v12 }
0x1b15   : > { %v3887_v15 = vpop.xlane.xlu1 %3886 }
0x1b16   : > { %v3890_v59 = vmul.f32 1.442695, %v3888_v14  ;;  %v3889_v62 = vsub.f32 %v3881_v9, %v3887_v15 }
0x1b18   : > { %6080 = vpow2.f32 %v3890_v59  ;;  %v3892_v63 = vmul.f32 1.442695, %v3889_v62  ;;  %v5260_v62 = vld [vmem:[%s6276_s20 + $0x17] ss:$0 sm:$0xff] }
0x1b1a   : > { %6082 = vpow2.f32 %v3892_v63 }
0x1b22   : > { %v6081_v16 = vpop.eup %6080 }
0x1b23   : > { %v3894_v18 = vsel %vm2929_vm13, %v6081_v16, 0.0 }
0x1b24   : > { %v6083_v20 = vpop.eup %6082  ;;  %3895 = vadd.xlane.f32.xlu0 %v3894_v18 }
0x1b25   : > { %v3897_v21 = vsel %vm2929_vm13, %v6083_v20, 0.0 }
0x1b26   : > { %3898 = vadd.xlane.f32.xlu1 %v3897_v21 }
0x1bb1   : > { %v3896_v22 = vpop.xlane.xlu0 %3895 }
0x1bb2   : > { %6084 = vrcp.f32 %v3896_v22 }
0x1bb3   : > { %v3899_v23 = vpop.xlane.xlu1 %3898 }
0x1bb4   : > { %6086 = vrcp.f32 %v3899_v23 }
0x1bbc   : > { %v6085_v45 = vpop.eup %6084 }
0x1bbd   : > { %v3902_v26 = vmul.f32 %v6085_v45, %v6081_v16 }
0x1bbe   : > { %v6087_v49 = vpop.eup %6086 }
0x1bbf   : > { %v3903_v28 = vmul.f32 %v6087_v49, %v6083_v20  ;;  %v3904_v31 = vpack.c.bf16 %v3902_v26, %v3902_v26 }
0x1bc1   : > { %5836 = vmatmul.mubr.msk.bf16.vlgmr.msra.gmra.mrb[100].mxu1 %vm2929_vm13, %v3904_v31  ;;  %v3905_v36 = vpack.c.bf16 %v3903_v28, %v3903_v28 }
0x1bc2   : > { %5846 = vmatpush3.bf16.msra.mxu1 %v3999_v13  ;;  %5847 = vmatprep.mubr.msk.bf16.mxu1 %vm6153_vm2, %v6152_v17 }
0x1bc3   : > { %5842 = vmatmul.mubr.msk.bf16.vlgmr.msra.gmra.mrb[112].mxu0 %vm2929_vm13, %v3905_v36  ;;  %5859 = vmatprep.subr.bf16.mxu1 %v6002_v38 }
0x1bc4   : > { %5852 = vmatpush3.bf16.msra.mxu0 %v6000_v35  ;;  %5855 = vmatprep.mubr.msk.bf16.mxu0 %vm6153_vm2, %v6152_v17 }
0x1bc5   : > { %5853 = vmatprep.subr.bf16.mxu0 %v6152_v17 }
0x1bc8   : > { %5854 = vmatpush3.bf16.msra.mxu0 %v6001_v37 }
0x1bc9   : > { %5867 = vmatprep.subr.bf16.mxu0 %v6004_v58 }
0x1bcb   : > { %5856 = vmatmul.mubr.msk.bf16.vlgmr.msra.gmra.mrb[116].mxu0 %vm587_vm1, %v6610_v46 }
0x1bcc   : > { %5871 = vmatprep.mubr.msk.bf16.mxu0 %vm587_vm1, %v6590_v42  ;;  %5868 = vmatpush3.bf16.msra.mxu0 %v6004_v58 }
0x1bcd   : > { %5869 = vmatprep.subr.bf16.mxu0 %v6005_v60 }
0x1bd0   : > { %5870 = vmatpush3.bf16.msra.mxu0 %v6005_v60 }
0x1bd1   : > { %5881 = vmatprep.subr.bf16.mxu0 %v6152_v17 }
0x1bd3   : > { %5872 = vmatmul.mubr.msk.bf16.vlgmr.msra.gmra.mrb[120].mxu0 %vm587_vm1, %v6599_v47 }
0x1bd4   : > { %5883 = vmatprep.mubr.msk.bf16.mxu0 %vm6153_vm2, %v6152_v17 }
0x1c94   : > { %v3943_v39 = vpop.f32.mrb[100].mxu1 }
0x1c95   : > { %v5837_v40 = vpop.f32.mrb[101].mxu1 }
0x1c96   : > { %v3946_v41 = vpop.f32.mrb[102].mxu1  ;;  %v3986_v43 = vpop.f32.mrb[112].mxu0 }
0x1c97   : > { %v3992_v44 = vpack.c.bf16 %v3986_v43, %v3943_v39  ;;  %v5838_v48 = vpop.f32.mrb[103].mxu1  ;;  %v5843_v50 = vpop.f32.mrb[113].mxu0 }
0x1c98   : > { %v3989_v52 = vpop.f32.mrb[114].mxu0 }
0x1c99   : > { %v5844_v54 = vpop.f32.mrb[115].mxu0  ;;  %5848 = vmatmul.mubr.msk.bf16.vlgmr.msra.gmra.mrb[104].mxu1 %vm854_vm7, %v3992_v44 }
0x1c9a   : > { %5860 = vmatpush3.bf16.msra.mxu1 %v6002_v38  ;;  %5863 = vmatprep.mubr.msk.bf16.mxu1 %vm587_vm1, %v6590_v42 }
0x1c9b   : > { %5861 = vmatprep.subr.bf16.mxu1 %v6003_v51 }
0x1c9e   : > { %v4117_v46 = vpop.f32.mrb[116].mxu0  ;;  %5862 = vmatpush3.bf16.msra.mxu1 %v6003_v51 }
0x1c9f   : > { %v5857_v55 = vpop.f32.mrb[117].mxu0  ;;  %5875 = vmatprep.subr.bf16.mxu1 %v6152_v17 }
0x1ca0   : > { %v4120_v56 = vpop.f32.mrb[118].mxu0 }
0x1ca1   : > { %v5858_v57 = vpop.f32.mrb[119].mxu0  ;;  %5864 = vmatmul.mubr.msk.bf16.vlgmr.msra.gmra.mrb[108].mxu1 %vm587_vm1, %v6599_v47 }
0x1ca2   : > { %5877 = vmatprep.mubr.msk.bf16.mxu1 %vm6153_vm2, %v6152_v17 }
0x1ca6   : > { %v5873_v63 = vpop.f32.mrb[120].mxu0 }
0x1ca7   : > { %v4252_v16 = vadd.f32 %v5873_v63, %v5260_v62  ;;  %v4243_v18 = vpop.f32.mrb[121].mxu0 }
0x1ca8   : > { %v4244_v20 = vadd.f32 %v5260_v62, %v4243_v18  ;;  %v5874_v21 = vpop.f32.mrb[122].mxu0 }
0x1ca9   : > { %v4255_v22 = vadd.f32 %v5874_v21, %v5260_v62  ;;  %v4246_v23 = vpop.f32.mrb[123].mxu0 }
0x1caa   : > { %v4247_v45 = vadd.f32 %v5260_v62, %v4246_v23 }
0x1cab   : > { %v4263_v25 = vpack.c.bf16 %v4255_v22, %v4252_v16 }
0x1cac   : > { %v4262_v26 = vpack.c.bf16 %v4247_v45, %v4244_v20 }
0x1d6c   : > { %v4035_v42 = vpop.f32.mrb[104].mxu1 }
0x1d6d   : > { %v6805_v24 = vadd.f32 %v4035_v42, %v6752_v30  ;;  %v5849_v61 = vpop.f32.mrb[105].mxu1  ;;  %v5251_v30 = vld [vmem:[%s6276_s20 + $0xf] ss:$0 sm:$0xff] }
0x1d6e   : > { %v4038_v0 = vpop.f32.mrb[106].mxu1  ;;  %v4121_v12 = vadd.f32 %v5251_v30, %v4120_v56  ;;  %v4118_v14 = vadd.f32 %v5251_v30, %v4117_v46 }
0x1d6f   : > { %v6808_v10 = vadd.f32 %v4038_v0, %v6754_v34  ;;  %v5850_v32 = vpop.f32.mrb[107].mxu1 }
0x1d70   : > { %v4259_v15 = vpack.c.bf16 %v4121_v12, %v4121_v12  ;;  %v4258_v59 = vpack.c.bf16 %v4118_v14, %v4118_v14  ;;  %v5269_v32 = vld [vmem:[%s6246_s15 + $0x1c] sm:$0xf] }
0x1d74   : > { %v5865_v33 = vpop.f32.mrb[108].mxu1 }
0x1d75   : > { %v4176_v2 = vpop.f32.mrb[109].mxu1  ;;  %v4185_v4 = vadd.f32 %v5865_v33, %v5255_v1 }
0x1d76   : > { %v5866_v3 = vpop.f32.mrb[110].mxu1  ;;  %v4177_v6 = vadd.f32 %v5255_v1, %v4176_v2 }
0x1d77   : > { %v4188_v47 = vadd.f32 %v5866_v3, %v5255_v1  ;;  %v4179_v5 = vpop.f32.mrb[111].mxu1  ;;  %v4477_v3 = vsel %vm978_vm8, %v5269_v32, 0 }
0x1d78   : > { %v4180_v7 = vadd.f32 %v5255_v1, %v4179_v5 }
0x1d79   : > { %v4261_v8 = vpack.c.bf16 %v4188_v47, %v4185_v4 }
0x1d7a   : > { %v4260_v9 = vpack.c.bf16 %v4180_v7, %v4177_v6 }
0x1d7b   : > { %v4314_v11 = vsel %vm854_vm7, %v4261_v8, 0 }
0x1d7c   : > { %5882 = vmatpush3.bf16.xpose.msra.mxu0 %v4314_v11  ;;  %v4268_v34 = vsel %vm854_vm7, %v4260_v9, 0 }
0x1d7d   : > { %5876 = vmatpush3.bf16.xpose.msra.mxu1 %v4268_v34  ;;  %5893 = vmatprep.subr.bf16.mxu0 %v6152_v17  ;;  %v5271_v34 = vld [vmem:[%s6285_s25 + $0x1] ss:$0 sm:$0xff] }
0x1d7e   : > { %5887 = vmatprep.subr.bf16.mxu1 %v6152_v17 }
0x1d83   : > { %5884 = vmatmul.mubr.msk.bf16.vlgmr.msra.gmra.mrb[124].mxu0 %vm854_vm7, %v4259_v15 }
0x1d84   : > { %5878 = vmatmul.mubr.msk.bf16.vlgmr.msra.gmra.mrb[112].mxu1 %vm854_vm7, %v4258_v59  ;;  %5895 = vmatprep.mubr.msk.bf16.mxu0 %vm6153_vm2, %v6152_v17 }
0x1d85   : > { %5889 = vmatprep.mubr.msk.bf16.mxu1 %vm6153_vm2, %v6152_v17  ;;  %5894 = vmatpush3.bf16.msra.mxu0 %v4263_v25 }
0x1d86   : > { %5888 = vmatpush3.bf16.msra.mxu1 %v4262_v26  ;;  %5905 = vmatprep.subr.bf16.mxu0 %v6152_v17 }
0x1d87   : > { %5899 = vmatprep.subr.bf16.mxu1 %v6152_v17 }
0x1e56   : > { %v4350_v49 = vpop.f32.mrb[124].mxu0 }
0x1e57   : > { %v4357_v28 = vmul.f32 0.35355338, %v4350_v49  ;;  %v4304_v31 = vpop.f32.mrb[112].mxu1  ;;  %v5885_v13 = vpop.f32.mrb[125].mxu0 }
0x1e58   : > { %v4356_v35 = vmul.f32 0.35355338, %v4304_v31  ;;  %v5879_v36 = vpop.f32.mrb[113].mxu1  ;;  %v4353_v37 = vpop.f32.mrb[126].mxu0  ;;  %v6006_v13 = vld [vmem:[%s6257_s22] sm:$0xff]  }
0x1e59   : > { %v4307_v38 = vpop.f32.mrb[114].mxu1  ;;  %v5886_v39 = vpop.f32.mrb[127].mxu0  ;;  %v4359_v40 = vadd.f32 %v6644_v19, %v4357_v28  ;;  %v6008_v36 = vld [vmem:[%s6264_s12] sm:$0xff]   ;;  %v6009_v37 = vld [vmem:[%s6264_s12 + $0x8] sm:$0xff]  }
0x1e5a   : > { %v5880_v41 = vpop.f32.mrb[115].mxu1  ;;  %v4358_v43 = vadd.f32 %v6639_v53, %v4356_v35  ;;  %v6007_v35 = vld [vmem:[%s6257_s22 + $0x8] sm:$0xff]   ;;  %v6010_v38 = vld [vmem:[%s6264_s12 + $0x10] sm:$0xff]   ;;  %v6011_v39 = vld [vmem:[%s6264_s12 + $0x18] sm:$0xff]  }
0x1e5b   : > { %v4363_v44 = vsel %vm2929_vm13, %v4359_v40, -inf  ;;  %v6013_v41 = vld [vmem:[%s6264_s12 + $0x28] sm:$0xff]  }
0x1e5c   : > { %4364 = vmax.xlane.f32.xlu1 %v4363_v44  ;;  %v4360_v48 = vsel %vm2929_vm13, %v4358_v43, -inf }
0x1e5d   : > { %4361 = vmax.xlane.f32.xlu0 %v4360_v48 }
0x1ee9   : > { %v4365_v50 = vpop.xlane.xlu1 %4364 }
0x1eea   : > { %v4367_v51 = vsub.f32 %v4359_v40, %v4365_v50  ;;  %v4362_v52 = vpop.xlane.xlu0 %4361  ;;  %v6012_v40 = vld [vmem:[%s6264_s12 + $0x20] sm:$0xff]  }
0x1eeb   : > { %v4366_v54 = vsub.f32 %v4358_v43, %v4362_v52 }
0x1eec   : > { %v4370_v46 = vmul.f32 1.442695, %v4367_v51 }
0x1eed   : > { %v4368_v55 = vmul.f32 1.442695, %v4366_v54 }
0x1eee   : > { %6088 = vpow2.f32 %v4370_v46 }
0x1eef   : > { %6090 = vpow2.f32 %v4368_v55 }
0x1ef8   : > { %v6089_v56 = vpop.eup %6088 }
0x1ef9   : > { %v6091_v19 = vpop.eup %6090  ;;  %v4375_v57 = vsel %vm2929_vm13, %v6089_v56, 0.0 }
0x1efa   : > { %4376 = vadd.xlane.f32.xlu1 %v4375_v57  ;;  %v4372_v53 = vsel %vm2929_vm13, %v6091_v19, 0.0 }
0x1efb   : > { %4373 = vadd.xlane.f32.xlu0 %v4372_v53 }
0x1f87   : > { %v4377_v58 = vpop.xlane.xlu1 %4376 }
0x1f88   : > { %6092 = vrcp.f32 %v4377_v58  ;;  %v4374_v60 = vpop.xlane.xlu0 %4373 }
0x1f89   : > { %6094 = vrcp.f32 %v4374_v60 }
0x1f92   : > { %v6093_v42 = vpop.eup %6092 }
0x1f93   : > { %v6095_v61 = vpop.eup %6094  ;;  %v4381_v0 = vmul.f32 %v6093_v42, %v6089_v56 }
0x1f94   : > { %v4380_v33 = vmul.f32 %v6095_v61, %v6091_v19 }
0x1f95   : > { %v4383_v1 = vpack.c.bf16 %v4381_v0, %v4381_v0  ;;  %v5274_v0 = vld [vmem:[%s6270_s5 + $0x4] ss:$0 sm:$0xff] }
0x1f96   : > { %v4382_v2 = vpack.c.bf16 %v4380_v33, %v4380_v33 }
0x1f97   : > { %5896 = vmatmul.mubr.msk.bf16.vlgmr.msra.gmra.mrb[128].mxu0 %vm2929_vm13, %v4383_v1 }
0x1f98   : > { %5890 = vmatmul.mubr.msk.bf16.vlgmr.msra.gmra.mrb[116].mxu1 %vm2929_vm13, %v4382_v2  ;;  %5909 = vmatprep.mubr.msk.bf16.mxu0 %vm6153_vm2, %v6152_v17 }
0x1f99   : > { %5900 = vmatpush3.bf16.msra.mxu1 %v4477_v3  ;;  %5901 = vmatprep.mubr.msk.bf16.mxu1 %vm6153_vm2, %v6152_v17  ;;  %v5275_v3 = vld [vmem:[%s6270_s5 + $0x5] ss:$0 sm:$0xff] }
0x1f9a   : > { %5913 = vmatprep.subr.bf16.mxu1 %v6152_v17  ;;  %5906 = vmatpush3.bf16.msra.mxu0 %v6006_v13 }
0x1f9b   : > { %5907 = vmatprep.subr.bf16.mxu0 %v6152_v17 }
0x1f9e   : > { %5908 = vmatpush3.bf16.msra.mxu0 %v6007_v35 }
0x206a   : > { %v4464_v4 = vpop.f32.mrb[128].mxu0 }
0x206b   : > { %v4421_v47 = vpop.f32.mrb[116].mxu1  ;;  %v5897_v5 = vpop.f32.mrb[129].mxu0 }
0x206c   : > { %v4470_v6 = vpack.c.bf16 %v4464_v4, %v4421_v47  ;;  %v5891_v7 = vpop.f32.mrb[117].mxu1  ;;  %v4467_v8 = vpop.f32.mrb[130].mxu0 }
0x206d   : > { %v4424_v9 = vpop.f32.mrb[118].mxu1  ;;  %v5898_v30 = vpop.f32.mrb[131].mxu0  ;;  %v6014_v7 = vld [vmem:[%s6264_s12 + $0x30] sm:$0xff]   ;;  %v6015_v8 = vld [vmem:[%s6264_s12 + $0x38] sm:$0xff]   ;;  %s6956_s12 = sld [smem:[#allocation10_spill]] (!%p5290_p5) }
0x206e   : > { %v5892_v11 = vpop.f32.mrb[119].mxu1  ;;  %5902 = vmatmul.mubr.msk.bf16.vlgmr.msra.gmra.mrb[120].mxu1 %vm854_vm7, %v4470_v6  ;;  %v5276_v9 = vld [vmem:[%s551_s4] ss:$0 sm:$0xff] }
0x206f   : > { %5929 = vmatprep.mubr.msk.bf16.mxu1 %vm6153_vm2, %v6152_v17  ;;  %5914 = vmatpush3.bf16.msra.mxu1 %v6008_v36 }
0x2070   : > { %5915 = vmatprep.subr.bf16.mxu1 %v6152_v17 }
0x2073   : > { %5916 = vmatpush3.bf16.msra.mxu1 %v6009_v37 }
0x2074   : > { %5917 = vmatprep.subr.bf16.mxu1 %v6152_v17 }
0x2077   : > { %5918 = vmatpush3.bf16.msra.mxu1 %v6010_v38 }
0x2078   : > { %5919 = vmatprep.subr.bf16.mxu1 %v6152_v17 }
0x207b   : > { %5920 = vmatpush3.bf16.msra.mxu1 %v6011_v39 }
0x207c   : > { %5921 = vmatprep.subr.bf16.mxu1 %v6152_v17 }
0x207f   : > { %5922 = vmatpush3.bf16.msra.mxu1 %v6012_v40 }
0x2080   : > { %5923 = vmatprep.subr.bf16.mxu1 %v6152_v17 }
0x2083   : > { %5924 = vmatpush3.bf16.msra.mxu1 %v6013_v41 }
0x2084   : > { %5925 = vmatprep.subr.bf16.mxu1 %v6152_v17 }
0x2087   : > { %5926 = vmatpush3.bf16.msra.mxu1 %v6014_v7 }
0x2088   : > { %5927 = vmatprep.subr.bf16.mxu1 %v6152_v17 }
0x208b   : > { %5928 = vmatpush3.bf16.msra.mxu1 %v6015_v8 }
0x2141   : > { %v4513_v12 = vpop.f32.mrb[120].mxu1 }
0x2142   : > { %v4520_v14 = vadd.f32 %v4513_v12, %v6805_v24  ;;  %v5903_v15 = vpop.f32.mrb[121].mxu1 }
0x2143   : > { %v4516_v59 = vpop.f32.mrb[122].mxu1 }
0x2144   : > { %v4528_v62 = vadd.f32 %v5271_v34, %v4520_v14  ;;  %v4521_v63 = vadd.f32 %v4516_v59, %v6808_v10  ;;  %v5904_v16 = vpop.f32.mrb[123].mxu1 }
0x2146   : > { %v6847_v18 = vadd.f32 %v4528_v62, %v6573_v27  ;;  %v4529_v20 = vadd.f32 %v5271_v34, %v4521_v63 }
0x2148   : > { %v6850_v21 = vadd.f32 %v4529_v20, %v6575_v29  ;;  %v4536_v22 = vsel %vm587_vm1, %v6847_v18, 0.0  ;;  %v5289_v20 = vld [vmem:[%s6285_s25 + $0x2] ss:$0 sm:$0xff] }
0x2149   : > { %4537 = vadd.xlane.f32.xlu0 %v4536_v22 }
0x214a   : > { %v4539_v24 = vsel %vm587_vm1, %v6850_v21, 0.0 }
0x214b   : > { %4540 = vadd.xlane.f32.xlu1 %v4539_v24 }
0x21d6   : > { %v4538_v23 = vpop.xlane.xlu0 %4537 }
0x21d7   : > { %v4542_v10 = vmul.f32 0.03125, %v4538_v23 }
0x21d8   : > { %v4541_v45 = vpop.xlane.xlu1 %4540 }
0x21d9   : > { %v4544_v27 = vsub.f32 %v6847_v18, %v4542_v10  ;;  %v4543_v25 = vmul.f32 0.03125, %v4541_v45 }
0x21db   : > { %v4545_v29 = vsub.f32 %v6850_v21, %v4543_v25  ;;  %v4546_v26 = vmul.f32 %v4544_v27, %v4544_v27 }
0x21dd   : > { %v4548_v49 = vsel %vm587_vm1, %v4546_v26, 0.0  ;;  %v4547_v28 = vmul.f32 %v4545_v29, %v4545_v29 }
0x21de   : > { %4549 = vadd.xlane.f32.xlu0 %v4548_v49 }
0x21df   : > { %v4551_v31 = vsel %vm587_vm1, %v4547_v28, 0.0 }
0x21e0   : > { %4552 = vadd.xlane.f32.xlu1 %v4551_v31 }
0x226b   : > { %v4550_v43 = vpop.xlane.xlu0 %4549 }
0x226c   : > { %v4554_v44 = vmul.f32 0.032258064, %v4550_v43 }
0x226d   : > { %v4553_v48 = vpop.xlane.xlu1 %4552 }
0x226e   : > { %6096 = vrsqrt.f32 %v4554_v44  ;;  %v4555_v50 = vmul.f32 0.032258064, %v4553_v48  ;;  %vm4558_vm14 = vcmp.eq.f32.partialorder %v4554_v44, inf  ;;  %v4561_v54 = vand.u32 2147483648, %v4554_v44 }
0x226f   : > { %vm4560_vm15 = vcmp.eq.f32.partialorder %v4554_v44, 0.0 }
0x2270   : > { %6098 = vrsqrt.f32 %v4555_v50  ;;  %vm4565_vm0 = vcmp.eq.f32.partialorder %v4555_v50, inf  ;;  %v4568_v53 = vand.u32 2147483648, %v4555_v50  ;;  %vm4567_vm2 = vcmp.eq.f32.partialorder %v4555_v50, 0.0 }
0x2278   : > { %v6097_v51 = vpop.eup %6096 }
0x2279   : > { %v4557_v52 = vmul.f32 %v6097_v51, %v4554_v44 }
0x227a   : > { %v6099_v46 = vpop.eup %6098 }
0x227b   : > { %v4559_v55 = vsel %vm4558_vm14, %v4554_v44, %v4557_v52  ;;  %v4564_v19 = vmul.f32 %v6099_v46, %v4555_v50 }
0x227c   : > { %v4562_v56 = vsel %vm4560_vm15, %v4561_v54, %v4559_v55 }
0x227d   : > { %v4570_v57 = vadd.f32 1e-06, %v4562_v56  ;;  %v4566_v58 = vsel %vm4565_vm0, %v4555_v50, %v4564_v19 }
0x227e   : > { %v4569_v60 = vsel %vm4567_vm2, %v4568_v53, %v4566_v58  ;;  %v5292_v58 = vld [vmem:[%s6956_s12] ss:$0 sm:$0xff] (!%p5290_p5) }
0x227f   : > { %6100 = vrcp.f32 %v4570_v57  ;;  %v4571_v42 = vadd.f32 1e-06, %v4569_v60 }
0x2281   : > { %6102 = vrcp.f32 %v4571_v42  ;;  %v5293_v42 = vld [vmem:[%s6956_s12 + $0x1] ss:$0 sm:$0xff] (!%p5290_p5) }
0x2289   : > { %v6101_v61 = vpop.eup %6100 }
0x228a   : > { %v4576_v32 = vmul.f32 %v6101_v61, %v4544_v27 }
0x228b   : > { %v6103_v33 = vpop.eup %6102 }
0x228c   : > { %v4577_v1 = vmul.f32 %v6103_v33, %v4545_v29  ;;  %v4584_v2 = vmul.f32 %v5274_v0, %v4576_v32 }
0x228e   : > { %v4585_v4 = vmul.f32 %v5274_v0, %v4577_v1  ;;  %v4592_v47 = vadd.f32 %v5275_v3, %v4584_v2 }
0x2290   : > { %v4593_v5 = vadd.f32 %v5275_v3, %v4585_v4 }
0x2292   : > { %v4594_v6 = vpack.c.bf16 %v4593_v5, %v4592_v47 }
0x2294   : > { %5910 = vmatmul.mubr.msk.bf16.vlgmr.msra.gmra.mrb[132].mxu0 %vm587_vm1, %v4594_v6 }
0x2367   : > { %v4655_v30 = vpop.f32.mrb[132].mxu0 }
0x2368   : > { %v4656_v11 = vadd.f32 %v5276_v9, %v4655_v30  ;;  %v5911_v34 = vpop.f32.mrb[133].mxu0 }
0x2369   : > { %v4658_v12 = vpop.f32.mrb[134].mxu0 }
0x236a   : > { %v4659_v14 = vadd.f32 %v5276_v9, %v4658_v12  ;;  %v5912_v15 = vpop.f32.mrb[135].mxu0  ;;  %v4662_v59 = vmax.f32 %v4656_v11, 0.0 }
0x236c   : > { %v4663_v62 = vmax.f32 %v4659_v14, 0.0 }
0x236e   : > { %v4664_v63 = vpack.c.bf16 %v4663_v62, %v4662_v59 }
0x2370   : > { %5930 = vmatmul.mubr.bf16.vlgmr.msra.gmra.mrb[124].mxu1 %v4664_v63 }
0x2443   : > { %v4763_v16 = vpop.f32.mrb[124].mxu1 }
0x2444   : > { %v4770_v17 = vadd.f32 %v4763_v16, %v6847_v18  ;;  %v5931_v22 = vpop.f32.mrb[125].mxu1  ;;  %4787 = sbr.rel (%p5290_p5) target bundleno = 9621 (0x2595), region = 80 }
0x2445   : > { %v4766_v24 = vpop.f32.mrb[126].mxu1 }
0x2446   : > { %v4780_v23 = vadd.f32 %v5289_v20, %v4770_v17  ;;  %v4771_v10 = vadd.f32 %v4766_v24, %v6850_v21  ;;  %v5932_v45 = vpop.f32.mrb[127].mxu1 }
0x2448   : > { %4782 = vst.msk [vmem:[#allocation2] sm:$0xff] %vm587_vm1, %v4780_v23  ;;  %v4781_v27 = vadd.f32 %v5289_v20, %v4771_v10  ;;  %v4791_v25 = vsel (!%p5290_p5), %vm587_vm1, %v4780_v23, 0.0 }
0x2449   : > { %4792 = vadd.xlane.f32.xlu0 (!%p5290_p5), %v4791_v25 }
0x244a   : > { %4783 = vst.msk [vmem:[#allocation2 + $0x8] sm:$0xff] %vm587_vm1, %v4781_v27  ;;  %v4794_v29 = vsel (!%p5290_p5), %vm587_vm1, %v4781_v27, 0.0 }
0x244d   : > { %4795 = vadd.xlane.f32.xlu0 %v4794_v29 }
0x24d6   : > { %v4793_v18 = vpop.xlane.xlu0 %4792 }
0x24d7   : > { %v4797_v26 = vmul.f32 0.03125, %v4793_v18 }
0x24d9   : > { %v4799_v49 = vsub.f32 %v4780_v23, %v4797_v26 }
0x24da   : > { %v4796_v28 = vpop.xlane.xlu0 %4795 }
0x24db   : > { %v4798_v21 = vmul.f32 0.03125, %v4796_v28  ;;  %v4801_v31 = vmul.f32 %v4799_v49, %v4799_v49 }
0x24dd   : > { %v4800_v13 = vsub.f32 %v4781_v27, %v4798_v21  ;;  %v4803_v35 = vsel %vm587_vm1, %v4801_v31, 0.0 }
0x24de   : > { %4804 = vadd.xlane.f32.xlu1 %v4803_v35 }
0x24df   : > { %v4802_v36 = vmul.f32 %v4800_v13, %v4800_v13 }
0x24e1   : > { %v4806_v37 = vsel %vm587_vm1, %v4802_v36, 0.0 }
0x24e2   : > { %4807 = vadd.xlane.f32.xlu1 %v4806_v37 }
0x256b   : > { %v4805_v38 = vpop.xlane.xlu1 %4804 }
0x256c   : > { %v4809_v39 = vmul.f32 0.032258064, %v4805_v38 }
0x256e   : > { %6106 = vrsqrt.f32 %v4809_v39  ;;  %vm4813_vm3 = vcmp.eq.f32.partialorder %v4809_v39, inf  ;;  %v4816_v48 = vand.u32 2147483648, %v4809_v39  ;;  %vm4815_vm4 = vcmp.eq.f32.partialorder %v4809_v39, 0.0 }
0x256f   : > { %v4808_v40 = vpop.xlane.xlu1 %4807 }
0x2570   : > { %v4810_v41 = vmul.f32 0.032258064, %v4808_v40 }
0x2572   : > { %6108 = vrsqrt.f32 %v4810_v41  ;;  %vm4820_vm5 = vcmp.eq.f32.partialorder %v4810_v41, inf  ;;  %v4823_v55 = vand.u32 2147483648, %v4810_v41  ;;  %vm4822_vm6 = vcmp.eq.f32.partialorder %v4810_v41, 0.0 }
0x2578   : > { %v6107_v43 = vpop.eup %6106 }
0x2579   : > { %v4812_v44 = vmul.f32 %v6107_v43, %v4809_v39 }
0x257b   : > { %v4814_v50 = vsel %vm4813_vm3, %v4809_v39, %v4812_v44 }
0x257c   : > { %v6109_v51 = vpop.eup %6108  ;;  %v4817_v52 = vsel %vm4815_vm4, %v4816_v48, %v4814_v50 }
0x257d   : > { %v4825_v54 = vadd.f32 1e-06, %v4817_v52  ;;  %v4819_v46 = vmul.f32 %v6109_v51, %v4810_v41 }
0x257f   : > { %6110 = vrcp.f32 %v4825_v54  ;;  %v4821_v56 = vsel %vm4820_vm5, %v4810_v41, %v4819_v46 }
0x2580   : > { %v4824_v19 = vsel %vm4822_vm6, %v4823_v55, %v4821_v56 }
0x2581   : > { %v4826_v57 = vadd.f32 1e-06, %v4824_v19 }
0x2583   : > { %6112 = vrcp.f32 %v4826_v57 }
0x2589   : > { %v6111_v53 = vpop.eup %6110 }
0x258a   : > { %v4831_v60 = vmul.f32 %v6111_v53, %v4799_v49 }
0x258c   : > { %v4839_v61 = vmul.f32 %v5292_v58, %v4831_v60 }
0x258d   : > { %v6113_v0 = vpop.eup %6112 }
0x258e   : > { %v4847_v32 = vadd.f32 %v5293_v42, %v4839_v61  ;;  %v4832_v33 = vmul.f32 %v6113_v0, %v4800_v13 }
0x2590   : > { %4849 = vst.msk [vmem:[#allocation3] sm:$0xff] %vm587_vm1, %v4847_v32  ;;  %v4840_v1 = vmul.f32 %v5292_v58, %v4832_v33 }
0x2592   : > { %v4848_v2 = vadd.f32 %v5293_v42, %v4840_v1 }
0x2594   : > { %4850 = vst.msk [vmem:[#allocation3 + $0x8] sm:$0xff] %vm587_vm1, %v4848_v2 }
0x2595 PF: > { %p5941_p6 = scmp.eq.s32.totalorder %s6233_s26, 1  ;;  %s6154_s20 = smov [#allocation3]  }
0x2596   : > { %s4857_s25 = sshll.u32 %s6154_s20, 4  ;;  %s4858_s25 = int_to_ptr.vmem [resolvable:$true] %s4857_s25 }
0x2597   : > { %s6114_s6 = scalar_lea.vmem %s4858_s25, 256  ;;  %p6121_p10 = scmp.lt.s32.totalorder %s4858_s25, %s4858_s25 }
0x2598   : > { %p6115_p7 = scmp.ne.s32.totalorder %s4858_s25, %s6114_s6  ;;  %p6122_p11 = scmp.lt.s32.totalorder %s6114_s6, %s6114_s6 }
0x259a   : > { %p6116_p8 = pnand %p6115_p7, %p5941_p6  ;;  %p6123_p12 = por %p6122_p11, %p6121_p10 }
0x259c   : > { %p6117_p9 = pneg %p6116_p8 }
0x259e   : > { %p6124_p13 = pnand %p6123_p12, %p6117_p9 }
0x25a0   : > { %6127 = shalt.err (!%p6124_p13)
}
0x25a1   : > { %s6957_s17 = sld [smem:[#allocation11_spill]] }
0x25a7   : > { %s6128_s18 = scalar_lea.hbm %s6957_s17, 256 }
0x25a8   : > { %p6129_p0 = scmp.ne.s32.totalorder %s6957_s17, %s6128_s18  ;;  %p6134_p3 = scmp.lt.u32.totalorder %s6128_s18, %s6957_s17 }
0x25aa   : > { %p6130_p1 = pnand %p6129_p0, %p5941_p6 }
0x25ac   : > { %p6131_p2 = pneg %p6130_p1 }
0x25ae   : > { %p6136_p4 = pnand %p6134_p3, %p6131_p2 }
0x25b0   : > { %6139 = shalt.err (!%p6136_p4)
}
0x25b1   : > { %s6155_s24 = smov 128   ;;  %s6156_s30 = smov 8  }
0x25b2   : > { %5938 = dma.vmem_to_hbm [thread:$0]  (%p5941_p6), %s4858_s25, 256, %s6957_s17, [#allocation4], %s6155_s24, %s6155_s24, %s6156_s30  }
0x25b3   : > { %6145 = dma.done.wait (%p5941_p6), [#allocation4], 256  }
0x25b4   : > { %6147 = vsyncadd (%p5941_p6), [#allocation4], 4294967040 }
0x25b5 PF: > { %s6958_s19 = sld [smem:[#allocation6_spill]] }
0x25bb   : > { %s24_s25 = sadd.s32 1, %s6958_s19  }
0x25bc   : > { %p21_p5 = scmp.ge.s32.totalorder %s24_s25, 4  }
0x25be   :  { %23 = sbr.rel (!%p21_p5) target bundleno = 7 (0x7), region = 189 }
0x25c5   :  { %4873 = vsyncpa [#allocation4], 1 }
0x25c6   :  { %4875 = vsyncpa [#allocation4 + $0x1], 1 }

</bundles_post_ra>
